<compile_context>
chip_gen: v6e
topology: v6e:2x2x1
jax: 0.10.0
libtpu: 0.0.40
codegen_flags: <defaults>
</compile_context>

<pallas_src>
import functools
import math

import jax
import jax.numpy as jnp
from jax.experimental import pallas as pl
from jax.experimental.pallas import tpu as pltpu


# TODO(synk): torch.nn.GELU() uses the exact erf form; Mosaic has no erf
# primitive, so we use the tanh approximation (max abs error ~1e-3).
def _gelu_tanh(x):
    c = math.sqrt(2.0 / math.pi)
    return 0.5 * x * (1.0 + jnp.tanh(c * (x + 0.044715 * x * x * x)))


def _layernorm(x, w, b, eps=1e-5):
    mu = jnp.mean(x, axis=-1, keepdims=True)
    var = jnp.mean(jnp.square(x - mu), axis=-1, keepdims=True)
    return (x - mu) * jax.lax.rsqrt(var + eps) * w + b


def _self_attention_kernel(
    x_ref,                       # (rows, C) f32 — block_b batch elements, flattened
    ln1w_ref, ln1b_ref,          # (1, C) f32
    wqkv_ref, bqkv_ref,          # (C, 3C) bf16, (1, 3C) f32  (Q columns pre-scaled)
    wout_ref, bout_ref,          # (C, C)  bf16, (1, C)  f32
    ln2w_ref, ln2b_ref,          # (1, C) f32
    w1_ref, b1_ref,              # (C, C)  bf16, (1, C)  f32
    w2_ref, b2_ref,              # (C, C)  bf16, (1, C)  f32
    o_ref,                       # (rows, C) output
    *, n_head, block_b, seq_len,
):
    f32 = jnp.float32
    bf16 = jnp.bfloat16

    x = x_ref[...]                                  # (rows, C) f32
    rows, C = x.shape
    H = n_head
    dh = C // H
    Bb, S = block_b, seq_len

    # --- LayerNorm 1 (f32) ---
    x_ln = _layernorm(x, ln1w_ref[...], ln1b_ref[...])

    # --- fused QKV projection: one fat MXU matmul over all packed rows ---
    # (1/sqrt(dh) scale already folded into the Q columns of wqkv/bqkv on host)
    qkv = jnp.dot(x_ln.astype(bf16), wqkv_ref[...],
                  preferred_element_type=f32) + bqkv_ref[...]      # (rows, 3C)
    q = qkv[:, 0 * C:1 * C]
    k = qkv[:, 1 * C:2 * C]
    v = qkv[:, 2 * C:3 * C]

    # --- merge heads into the batch dim: (rows, C) -> (Bb*H, S, dh) ---
    # One reshape + one transpose per tensor (done in bf16 to halve the bytes
    # moved), instead of 2H lane slices + an H-way lane concat.
    def to_heads(t):
        t = t.astype(bf16).reshape(Bb, S, H, dh)
        return t.transpose(0, 2, 1, 3).reshape(Bb * H, S, dh)

    qh, kh, vh = to_heads(q), to_heads(k), to_heads(v)

    # --- attention: ONE batched dot for scores, ONE for context ---
    # scores 'bqd,bkd->bqk' — contraction on dh, no explicit k.T
    s = jax.lax.dot_general(qh, kh, (((2,), (2,)), ((0,), (0,))),
                            preferred_element_type=f32)           # (Bb*H, S, S)
    m = jnp.max(s, axis=-1, keepdims=True)
    p = jnp.exp(s - m)
    l = jnp.sum(p, axis=-1, keepdims=True)

    # PV matmul with UN-normalized p; fold 1/l into ctx afterwards
    # (O(S*dh) multiplies instead of O(S*S)); reciprocal runs on the EUP.
    ctx = jax.lax.dot_general(p.astype(bf16), vh,
                              (((2,), (1,)), ((0,), (0,))),
                              preferred_element_type=f32)         # (Bb*H, S, dh)
    ctx = (ctx * pl.reciprocal(l, approx=True)).astype(bf16)

    # back to (rows, C): (Bb, H, S, dh) -> (Bb, S, H, dh) -> (rows, C)
    heads = ctx.reshape(Bb, H, S, dh).transpose(0, 2, 1, 3).reshape(rows, C)

    # --- output projection + residual 1 ---
    attn = jnp.dot(heads, wout_ref[...],
                   preferred_element_type=f32) + bout_ref[...]
    attn = attn + x

    # --- feed-forward: LN -> Linear -> GELU -> Linear, + residual 2 ---
    ff_in = _layernorm(attn, ln2w_ref[...], ln2b_ref[...])
    h1 = jnp.dot(ff_in.astype(bf16), w1_ref[...],
                 preferred_element_type=f32) + b1_ref[...]
    h1 = _gelu_tanh(h1)
    h2 = jnp.dot(h1.astype(bf16), w2_ref[...],
                 preferred_element_type=f32) + b2_ref[...]
    o_ref[...] = (h2 + attn).astype(o_ref.dtype)


def _pick_block_b(B, S, row_cap):
    """Pick how many batch elements each grid step processes.

    Constraints / preferences:
      * block_b divides B.
      * rows = block_b*S is a multiple of 8 unless block_b == B (full extent),
        otherwise the BlockSpec violates the (8,128) divisibility rule.
      * rows <= row_cap (generation-aware VMEM budget).
      * prefer a grid extent >= 2 so both v7x TensorCores get work.
      * among the remaining candidates, maximize rows (fat MXU matmuls,
        amortized per-step overhead, dense output stores).
    """
    legal = [d for d in range(1, B + 1)
             if B % d == 0 and (d == B or (d * S) % 8 == 0)]
    capped = [d for d in legal if d * S <= row_cap]
    if not capped:
        # even the smallest legal block busts the cap: take the smallest one
        return min(legal, key=lambda d: d * S)
    multi = [d for d in capped if B // d >= 2]
    pool = multi or capped
    return max(pool, key=lambda d: d * S)


def self_attention(x, params, n_head):
    """x: (B, S, C) float32; params: tuple in kernel argument order (float32)."""
    B, S, C = x.shape
    assert C % n_head == 0
    (ln1w, ln1b, wqkv, bqkv, wout, bout,
     ln2w, ln2b, w1, b1, w2, b2) = params

    # Fold the 1/sqrt(dh) attention scale into the Q columns of the fused QKV
    # projection (host-side constant fold), then cast matmul weights to bf16
    # for the MXU (accumulation stays f32). LN params / biases stay f32.
    scale = 1.0 / math.sqrt(C // n_head)
    q_col = jnp.concatenate(
        [jnp.full((C,), scale, jnp.float32), jnp.ones((2 * C,), jnp.float32)])
    wqkv = (wqkv * q_col[None, :]).astype(jnp.bfloat16)
    bqkv = bqkv * q_col[None, :]
    wout = wout.astype(jnp.bfloat16)
    w1 = w1.astype(jnp.bfloat16)
    w2 = w2.astype(jnp.bfloat16)

    # Generation-aware row cap / scoped-VMEM budget.
    try:
        kind = jax.devices()[0].device_kind.lower()
    except Exception:
        kind = ""
    if "v7" in kind:
        row_cap, vmem_limit = 128, 48 * 1024 * 1024    # 64 MiB physical VMEM
    elif "v5" in kind or "v6" in kind:
        row_cap, vmem_limit = 512, 96 * 1024 * 1024    # 128 MiB physical VMEM
    else:
        row_cap, vmem_limit = 256, 48 * 1024 * 1024    # conservative default

    block_b = _pick_block_b(B, S, row_cap)
    rows = block_b * S
    grid = (B // block_b,)

    x2 = x.reshape(B * S, C)
    args = (x2, ln1w, ln1b, wqkv, bqkv, wout, bout, ln2w, ln2b, w1, b1, w2, b2)

    kernel = functools.partial(_self_attention_kernel, n_head=n_head,
                               block_b=block_b, seq_len=S)

    def build(weight_pipeline_mode):
        wkw = ({} if weight_pipeline_mode is None
               else {"pipeline_mode": weight_pipeline_mode})

        def wspec(shape):
            # Constant index_map -> fetched once, resident across the grid.
            return pl.BlockSpec(shape, lambda r: (0, 0), **wkw)

        return pl.pallas_call(
            kernel,
            out_shape=jax.ShapeDtypeStruct((B * S, C), x.dtype),
            grid=grid,
            in_specs=[
                pl.BlockSpec((rows, C), lambda r: (r, 0)),   # x rows this step
                wspec((1, C)), wspec((1, C)),                # ln1 w, b
                wspec((C, 3 * C)), wspec((1, 3 * C)),        # in_proj W^T (bf16), b
                wspec((C, C)), wspec((1, C)),                # out_proj W^T (bf16), b
                wspec((1, C)), wspec((1, C)),                # ln2 w, b
                wspec((C, C)), wspec((1, C)),                # ff linear1 W^T (bf16), b
                wspec((C, C)), wspec((1, C)),                # ff linear2 W^T (bf16), b
            ],
            out_specs=pl.BlockSpec((rows, C), lambda r: (r, 0)),
            compiler_params=pltpu.CompilerParams(
                dimension_semantics=("parallel",),
                vmem_limit_bytes=vmem_limit,
            ),
        )

    try:
        # Single-buffer the resident weights (halves their VMEM footprint —
        # matters on v7x's 64 MiB VMEM); index_maps are constant so no
        # re-fetching is needed.
        out2 = build(pl.Buffered(1))(*args)
    except Exception:
        # Fallback: default (double-buffered) pipelining if pipeline_mode /
        # single-buffering is not supported by the installed JAX.
        out2 = build(None)(*args)
    return out2.reshape(B, S, C)


def init_params(key, channels):
    C = channels
    ks = jax.random.split(key, 8)
    w = lambda k, shape: (0.05 * jax.random.normal(k, shape, jnp.float32))
    ln1_w = jnp.ones((1, C), jnp.float32)
    ln1_b = jnp.zeros((1, C), jnp.float32)
    w_qkv = w(ks[0], (C, 3 * C))
    b_qkv = w(ks[1], (1, 3 * C))
    w_out = w(ks[2], (C, C))
    b_out = jnp.zeros((1, C), jnp.float32)
    ln2_w = jnp.ones((1, C), jnp.float32)
    ln2_b = jnp.zeros((1, C), jnp.float32)
    w1 = w(ks[3], (C, C))
    b1 = w(ks[4], (1, C))
    w2 = w(ks[5], (C, C))
    b2 = w(ks[6], (1, C))
    return (ln1_w, ln1_b, w_qkv, b_qkv, w_out, b_out,
            ln2_w, ln2_b, w1, b1, w2, b2)


if __name__ == "__main__":
    B, S, C, N_HEAD = 2, 8, 32, 4
    key = jax.random.PRNGKey(0)
    k_x, k_p = jax.random.split(key)
    x = jax.random.normal(k_x, (B, S, C), jnp.float32)
    params = init_params(k_p, C)

    out = self_attention(x, params, N_HEAD)
    jax.block_until_ready(out)
    assert out.shape == (B, S, C)
    print("KERNEL_OK")
</pallas_src>

<mosaic_0001>
module attributes {stable_mosaic.version = 11 : i64} {
  func.func @_self_attention_kernel(%arg0: i32, %arg1: memref<8x32xf32, #tpu.memory_space<vmem>>, %arg2: memref<1x32xf32, #tpu.memory_space<vmem>>, %arg3: memref<1x32xf32, #tpu.memory_space<vmem>>, %arg4: memref<32x96xbf16, #tpu.memory_space<vmem>>, %arg5: memref<1x96xf32, #tpu.memory_space<vmem>>, %arg6: memref<32x32xbf16, #tpu.memory_space<vmem>>, %arg7: memref<1x32xf32, #tpu.memory_space<vmem>>, %arg8: memref<1x32xf32, #tpu.memory_space<vmem>>, %arg9: memref<1x32xf32, #tpu.memory_space<vmem>>, %arg10: memref<32x32xbf16, #tpu.memory_space<vmem>>, %arg11: memref<1x32xf32, #tpu.memory_space<vmem>>, %arg12: memref<32x32xbf16, #tpu.memory_space<vmem>>, %arg13: memref<1x32xf32, #tpu.memory_space<vmem>>, %arg14: memref<8x32xf32, #tpu.memory_space<vmem>>) attributes {dimension_semantics = [#tpu.dimension_semantics<parallel>], iteration_bounds = array<i64: 2>, scalar_prefetch = 0 : i64, scratch_operands = 0 : i64, tpu.core_type = #tpu.core_type<tc>, window_params = [{transform_indices = @transform_0, window_bounds = array<i64: 8, 32>}, {pipeline_mode = #tpu.pipeline_mode<synchronous>, transform_indices = @transform_1, window_bounds = array<i64: 1, 32>}, {pipeline_mode = #tpu.pipeline_mode<synchronous>, transform_indices = @transform_2, window_bounds = array<i64: 1, 32>}, {pipeline_mode = #tpu.pipeline_mode<synchronous>, transform_indices = @transform_3, window_bounds = array<i64: 32, 96>}, {pipeline_mode = #tpu.pipeline_mode<synchronous>, transform_indices = @transform_4, window_bounds = array<i64: 1, 96>}, {pipeline_mode = #tpu.pipeline_mode<synchronous>, transform_indices = @transform_5, window_bounds = array<i64: 32, 32>}, {pipeline_mode = #tpu.pipeline_mode<synchronous>, transform_indices = @transform_6, window_bounds = array<i64: 1, 32>}, {pipeline_mode = #tpu.pipeline_mode<synchronous>, transform_indices = @transform_7, window_bounds = array<i64: 1, 32>}, {pipeline_mode = #tpu.pipeline_mode<synchronous>, transform_indices = @transform_8, window_bounds = array<i64: 1, 32>}, {pipeline_mode = #tpu.pipeline_mode<synchronous>, transform_indices = @transform_9, window_bounds = array<i64: 32, 32>}, {pipeline_mode = #tpu.pipeline_mode<synchronous>, transform_indices = @transform_10, window_bounds = array<i64: 1, 32>}, {pipeline_mode = #tpu.pipeline_mode<synchronous>, transform_indices = @transform_11, window_bounds = array<i64: 32, 32>}, {pipeline_mode = #tpu.pipeline_mode<synchronous>, transform_indices = @transform_12, window_bounds = array<i64: 1, 32>}, {transform_indices = @transform_13, window_bounds = array<i64: 8, 32>}]} {
    %c0 = arith.constant 0 : index
    %c0_0 = arith.constant 0 : index
    %0 = vector.load %arg1[%c0, %c0_0] : memref<8x32xf32, #tpu.memory_space<vmem>>, vector<8x32xf32>
    %c0_1 = arith.constant 0 : index
    %c0_2 = arith.constant 0 : index
    %1 = vector.load %arg2[%c0_1, %c0_2] : memref<1x32xf32, #tpu.memory_space<vmem>>, vector<1x32xf32>
    %c0_3 = arith.constant 0 : index
    %c0_4 = arith.constant 0 : index
    %2 = vector.load %arg3[%c0_3, %c0_4] : memref<1x32xf32, #tpu.memory_space<vmem>>, vector<1x32xf32>
    %cst = arith.constant dense<0.000000e+00> : vector<8xf32>
    %3 = vector.multi_reduction <add>, %0, %cst [1] : vector<8x32xf32> to vector<8xf32>
    %4 = vector.shape_cast %3 : vector<8xf32> to vector<8x1xf32>
    %cst_5 = arith.constant 3.200000e+01 : f32
    %5 = vector.broadcast %cst_5 : f32 to vector<8x1xf32>
    %6 = arith.divf %4, %5 : vector<8x1xf32>
    %7 = vector.broadcast %6 : vector<8x1xf32> to vector<8x32xf32>
    %8 = arith.subf %0, %7 : vector<8x32xf32>
    %9 = arith.mulf %8, %8 : vector<8x32xf32>
    %cst_6 = arith.constant dense<0.000000e+00> : vector<8xf32>
    %10 = vector.multi_reduction <add>, %9, %cst_6 [1] : vector<8x32xf32> to vector<8xf32>
    %11 = vector.shape_cast %10 : vector<8xf32> to vector<8x1xf32>
    %cst_7 = arith.constant 3.200000e+01 : f32
    %12 = vector.broadcast %cst_7 : f32 to vector<8x1xf32>
    %13 = arith.divf %11, %12 : vector<8x1xf32>
    %14 = vector.broadcast %6 : vector<8x1xf32> to vector<8x32xf32>
    %15 = arith.subf %0, %14 : vector<8x32xf32>
    %cst_8 = arith.constant 9.99999974E-6 : f32
    %16 = vector.broadcast %cst_8 : f32 to vector<8x1xf32>
    %17 = arith.addf %13, %16 : vector<8x1xf32>
    %18 = math.rsqrt %17 : vector<8x1xf32>
    %19 = vector.broadcast %18 : vector<8x1xf32> to vector<8x32xf32>
    %20 = arith.mulf %15, %19 : vector<8x32xf32>
    %21 = vector.broadcast %1 : vector<1x32xf32> to vector<8x32xf32>
    %22 = arith.mulf %20, %21 : vector<8x32xf32>
    %23 = vector.broadcast %2 : vector<1x32xf32> to vector<8x32xf32>
    %24 = arith.addf %22, %23 : vector<8x32xf32>
    %25 = arith.truncf %24 : vector<8x32xf32> to vector<8x32xbf16>
    %c0_9 = arith.constant 0 : index
    %c0_10 = arith.constant 0 : index
    %26 = vector.load %arg4[%c0_9, %c0_10] : memref<32x96xbf16, #tpu.memory_space<vmem>>, vector<32x96xbf16>
    %cst_11 = arith.constant dense<0.000000e+00> : vector<8x96xf32>
    %27 = tpu.matmul %25, %26, %cst_11 {dimension_numbers = #tpu.dot_dimension_numbers<[1], [0], [0], [1], [0, 0, 1, 1], [], []>} : vector<8x32xbf16>, vector<32x96xbf16>, vector<8x96xf32> -> vector<8x96xf32>
    %c0_12 = arith.constant 0 : index
    %c0_13 = arith.constant 0 : index
    %28 = vector.load %arg5[%c0_12, %c0_13] : memref<1x96xf32, #tpu.memory_space<vmem>>, vector<1x96xf32>
    %29 = vector.broadcast %28 : vector<1x96xf32> to vector<8x96xf32>
    %30 = arith.addf %27, %29 : vector<8x96xf32>
    %31 = vector.extract_strided_slice %30 {offsets = [0, 0], sizes = [8, 32], strides = [1, 1]} : vector<8x96xf32> to vector<8x32xf32>
    %32 = vector.extract_strided_slice %30 {offsets = [0, 32], sizes = [8, 32], strides = [1, 1]} : vector<8x96xf32> to vector<8x32xf32>
    %33 = vector.extract_strided_slice %30 {offsets = [0, 64], sizes = [8, 32], strides = [1, 1]} : vector<8x96xf32> to vector<8x32xf32>
    %34 = arith.truncf %31 : vector<8x32xf32> to vector<8x32xbf16>
    %35 = vector.shape_cast %34 : vector<8x32xbf16> to vector<1x8x4x8xbf16>
    %36 = tpu.transpose %35, [0, 2, 1, 3] : vector<1x8x4x8xbf16> -> vector<1x4x8x8xbf16>
    %37 = vector.shape_cast %36 : vector<1x4x8x8xbf16> to vector<4x8x8xbf16>
    %38 = arith.truncf %32 : vector<8x32xf32> to vector<8x32xbf16>
    %39 = vector.shape_cast %38 : vector<8x32xbf16> to vector<1x8x4x8xbf16>
    %40 = tpu.transpose %39, [0, 2, 1, 3] : vector<1x8x4x8xbf16> -> vector<1x4x8x8xbf16>
    %41 = vector.shape_cast %40 : vector<1x4x8x8xbf16> to vector<4x8x8xbf16>
    %42 = arith.truncf %33 : vector<8x32xf32> to vector<8x32xbf16>
    %43 = vector.shape_cast %42 : vector<8x32xbf16> to vector<1x8x4x8xbf16>
    %44 = tpu.transpose %43, [0, 2, 1, 3] : vector<1x8x4x8xbf16> -> vector<1x4x8x8xbf16>
    %45 = vector.shape_cast %44 : vector<1x4x8x8xbf16> to vector<4x8x8xbf16>
    %cst_14 = arith.constant dense<0.000000e+00> : vector<4x8x8xf32>
    %46 = tpu.matmul %37, %41, %cst_14 {dimension_numbers = #tpu.dot_dimension_numbers<[2], [2], [1], [1], [0, 0, 0, 1, 1, 1], [0], [0]>} : vector<4x8x8xbf16>, vector<4x8x8xbf16>, vector<4x8x8xf32> -> vector<4x8x8xf32>
    %cst_15 = arith.constant dense<0xFF800000> : vector<4x8xf32>
    %47 = vector.multi_reduction <maximumf>, %46, %cst_15 [2] : vector<4x8x8xf32> to vector<4x8xf32>
    %48 = vector.shape_cast %47 : vector<4x8xf32> to vector<4x8x1xf32>
    %49 = vector.broadcast %48 : vector<4x8x1xf32> to vector<4x8x8xf32>
    %50 = arith.subf %46, %49 : vector<4x8x8xf32>
    %51 = math.exp %50 : vector<4x8x8xf32>
    %cst_16 = arith.constant dense<0.000000e+00> : vector<4x8xf32>
    %52 = vector.multi_reduction <add>, %51, %cst_16 [2] : vector<4x8x8xf32> to vector<4x8xf32>
    %53 = vector.shape_cast %52 : vector<4x8xf32> to vector<4x8x1xf32>
    %54 = arith.truncf %51 : vector<4x8x8xf32> to vector<4x8x8xbf16>
    %cst_17 = arith.constant dense<0.000000e+00> : vector<4x8x8xf32>
    %55 = tpu.matmul %54, %45, %cst_17 {dimension_numbers = #tpu.dot_dimension_numbers<[2], [1], [1], [2], [0, 0, 0, 1, 1, 2], [0], [0]>} : vector<4x8x8xbf16>, vector<4x8x8xbf16>, vector<4x8x8xf32> -> vector<4x8x8xf32>
    %56 = tpu.reciprocal %53 {approx = true} : vector<4x8x1xf32> -> vector<4x8x1xf32>
    %57 = vector.broadcast %56 : vector<4x8x1xf32> to vector<4x8x8xf32>
    %58 = arith.mulf %55, %57 : vector<4x8x8xf32>
    %59 = arith.truncf %58 : vector<4x8x8xf32> to vector<4x8x8xbf16>
    %60 = vector.shape_cast %59 : vector<4x8x8xbf16> to vector<1x4x8x8xbf16>
    %61 = tpu.transpose %60, [0, 2, 1, 3] : vector<1x4x8x8xbf16> -> vector<1x8x4x8xbf16>
    %62 = vector.shape_cast %61 : vector<1x8x4x8xbf16> to vector<8x32xbf16>
    %c0_18 = arith.constant 0 : index
    %c0_19 = arith.constant 0 : index
    %63 = vector.load %arg6[%c0_18, %c0_19] : memref<32x32xbf16, #tpu.memory_space<vmem>>, vector<32x32xbf16>
    %cst_20 = arith.constant dense<0.000000e+00> : vector<8x32xf32>
    %64 = tpu.matmul %62, %63, %cst_20 {dimension_numbers = #tpu.dot_dimension_numbers<[1], [0], [0], [1], [0, 0, 1, 1], [], []>} : vector<8x32xbf16>, vector<32x32xbf16>, vector<8x32xf32> -> vector<8x32xf32>
    %c0_21 = arith.constant 0 : index
    %c0_22 = arith.constant 0 : index
    %65 = vector.load %arg7[%c0_21, %c0_22] : memref<1x32xf32, #tpu.memory_space<vmem>>, vector<1x32xf32>
    %66 = vector.broadcast %65 : vector<1x32xf32> to vector<8x32xf32>
    %67 = arith.addf %64, %66 : vector<8x32xf32>
    %68 = arith.addf %67, %0 : vector<8x32xf32>
    %c0_23 = arith.constant 0 : index
    %c0_24 = arith.constant 0 : index
    %69 = vector.load %arg8[%c0_23, %c0_24] : memref<1x32xf32, #tpu.memory_space<vmem>>, vector<1x32xf32>
    %c0_25 = arith.constant 0 : index
    %c0_26 = arith.constant 0 : index
    %70 = vector.load %arg9[%c0_25, %c0_26] : memref<1x32xf32, #tpu.memory_space<vmem>>, vector<1x32xf32>
    %cst_27 = arith.constant dense<0.000000e+00> : vector<8xf32>
    %71 = vector.multi_reduction <add>, %68, %cst_27 [1] : vector<8x32xf32> to vector<8xf32>
    %72 = vector.shape_cast %71 : vector<8xf32> to vector<8x1xf32>
    %cst_28 = arith.constant 3.200000e+01 : f32
    %73 = vector.broadcast %cst_28 : f32 to vector<8x1xf32>
    %74 = arith.divf %72, %73 : vector<8x1xf32>
    %75 = vector.broadcast %74 : vector<8x1xf32> to vector<8x32xf32>
    %76 = arith.subf %68, %75 : vector<8x32xf32>
    %77 = arith.mulf %76, %76 : vector<8x32xf32>
    %cst_29 = arith.constant dense<0.000000e+00> : vector<8xf32>
    %78 = vector.multi_reduction <add>, %77, %cst_29 [1] : vector<8x32xf32> to vector<8xf32>
    %79 = vector.shape_cast %78 : vector<8xf32> to vector<8x1xf32>
    %cst_30 = arith.constant 3.200000e+01 : f32
    %80 = vector.broadcast %cst_30 : f32 to vector<8x1xf32>
    %81 = arith.divf %79, %80 : vector<8x1xf32>
    %82 = vector.broadcast %74 : vector<8x1xf32> to vector<8x32xf32>
    %83 = arith.subf %68, %82 : vector<8x32xf32>
    %cst_31 = arith.constant 9.99999974E-6 : f32
    %84 = vector.broadcast %cst_31 : f32 to vector<8x1xf32>
    %85 = arith.addf %81, %84 : vector<8x1xf32>
    %86 = math.rsqrt %85 : vector<8x1xf32>
    %87 = vector.broadcast %86 : vector<8x1xf32> to vector<8x32xf32>
    %88 = arith.mulf %83, %87 : vector<8x32xf32>
    %89 = vector.broadcast %69 : vector<1x32xf32> to vector<8x32xf32>
    %90 = arith.mulf %88, %89 : vector<8x32xf32>
    %91 = vector.broadcast %70 : vector<1x32xf32> to vector<8x32xf32>
    %92 = arith.addf %90, %91 : vector<8x32xf32>
    %93 = arith.truncf %92 : vector<8x32xf32> to vector<8x32xbf16>
    %c0_32 = arith.constant 0 : index
    %c0_33 = arith.constant 0 : index
    %94 = vector.load %arg10[%c0_32, %c0_33] : memref<32x32xbf16, #tpu.memory_space<vmem>>, vector<32x32xbf16>
    %cst_34 = arith.constant dense<0.000000e+00> : vector<8x32xf32>
    %95 = tpu.matmul %93, %94, %cst_34 {dimension_numbers = #tpu.dot_dimension_numbers<[1], [0], [0], [1], [0, 0, 1, 1], [], []>} : vector<8x32xbf16>, vector<32x32xbf16>, vector<8x32xf32> -> vector<8x32xf32>
    %c0_35 = arith.constant 0 : index
    %c0_36 = arith.constant 0 : index
    %96 = vector.load %arg11[%c0_35, %c0_36] : memref<1x32xf32, #tpu.memory_space<vmem>>, vector<1x32xf32>
    %97 = vector.broadcast %96 : vector<1x32xf32> to vector<8x32xf32>
    %98 = arith.addf %95, %97 : vector<8x32xf32>
    %cst_37 = arith.constant 5.000000e-01 : f32
    %99 = vector.broadcast %cst_37 : f32 to vector<8x32xf32>
    %100 = arith.mulf %99, %98 : vector<8x32xf32>
    %cst_38 = arith.constant 4.471500e-02 : f32
    %101 = vector.broadcast %cst_38 : f32 to vector<8x32xf32>
    %102 = arith.mulf %101, %98 : vector<8x32xf32>
    %103 = arith.mulf %102, %98 : vector<8x32xf32>
    %104 = arith.mulf %103, %98 : vector<8x32xf32>
    %105 = arith.addf %98, %104 : vector<8x32xf32>
    %cst_39 = arith.constant 0.797884583 : f32
    %106 = vector.broadcast %cst_39 : f32 to vector<8x32xf32>
    %107 = arith.mulf %106, %105 : vector<8x32xf32>
    %108 = math.tanh %107 : vector<8x32xf32>
    %cst_40 = arith.constant 1.000000e+00 : f32
    %109 = vector.broadcast %cst_40 : f32 to vector<8x32xf32>
    %110 = arith.addf %109, %108 : vector<8x32xf32>
    %111 = arith.mulf %100, %110 : vector<8x32xf32>
    %112 = arith.truncf %111 : vector<8x32xf32> to vector<8x32xbf16>
    %c0_41 = arith.constant 0 : index
    %c0_42 = arith.constant 0 : index
    %113 = vector.load %arg12[%c0_41, %c0_42] : memref<32x32xbf16, #tpu.memory_space<vmem>>, vector<32x32xbf16>
    %cst_43 = arith.constant dense<0.000000e+00> : vector<8x32xf32>
    %114 = tpu.matmul %112, %113, %cst_43 {dimension_numbers = #tpu.dot_dimension_numbers<[1], [0], [0], [1], [0, 0, 1, 1], [], []>} : vector<8x32xbf16>, vector<32x32xbf16>, vector<8x32xf32> -> vector<8x32xf32>
    %c0_44 = arith.constant 0 : index
    %c0_45 = arith.constant 0 : index
    %115 = vector.load %arg13[%c0_44, %c0_45] : memref<1x32xf32, #tpu.memory_space<vmem>>, vector<1x32xf32>
    %116 = vector.broadcast %115 : vector<1x32xf32> to vector<8x32xf32>
    %117 = arith.addf %114, %116 : vector<8x32xf32>
    %118 = arith.addf %117, %68 : vector<8x32xf32>
    %c0_46 = arith.constant 0 : index
    %c0_47 = arith.constant 0 : index
    %119 = vector.load %arg14[%c0_46, %c0_47] : memref<8x32xf32, #tpu.memory_space<vmem>>, vector<8x32xf32>
    tpu.vector_store %arg14[%c0_46, %c0_47], %118 {strides = array<i32>} : memref<8x32xf32, #tpu.memory_space<vmem>>, vector<8x32xf32>,
    return
  }
  func.func @transform_0(%arg0: i32) -> (i32, i32) {
    %c0_i32 = arith.constant 0 : i32
    %c0_i32_0 = arith.constant 0 : i32
    return %arg0, %c0_i32 : i32, i32
  }
  func.func @transform_1(%arg0: i32) -> (i32, i32) {
    %c0_i32 = arith.constant 0 : i32
    %c0_i32_0 = arith.constant 0 : i32
    %c0_i32_1 = arith.constant 0 : i32
    return %c0_i32, %c0_i32_0 : i32, i32
  }
  func.func @transform_2(%arg0: i32) -> (i32, i32) {
    %c0_i32 = arith.constant 0 : i32
    %c0_i32_0 = arith.constant 0 : i32
    %c0_i32_1 = arith.constant 0 : i32
    return %c0_i32, %c0_i32_0 : i32, i32
  }
  func.func @transform_3(%arg0: i32) -> (i32, i32) {
    %c0_i32 = arith.constant 0 : i32
    %c0_i32_0 = arith.constant 0 : i32
    %c0_i32_1 = arith.constant 0 : i32
    return %c0_i32, %c0_i32_0 : i32, i32
  }
  func.func @transform_4(%arg0: i32) -> (i32, i32) {
    %c0_i32 = arith.constant 0 : i32
    %c0_i32_0 = arith.constant 0 : i32
    %c0_i32_1 = arith.constant 0 : i32
    return %c0_i32, %c0_i32_0 : i32, i32
  }
  func.func @transform_5(%arg0: i32) -> (i32, i32) {
    %c0_i32 = arith.constant 0 : i32
    %c0_i32_0 = arith.constant 0 : i32
    %c0_i32_1 = arith.constant 0 : i32
    return %c0_i32, %c0_i32_0 : i32, i32
  }
  func.func @transform_6(%arg0: i32) -> (i32, i32) {
    %c0_i32 = arith.constant 0 : i32
    %c0_i32_0 = arith.constant 0 : i32
    %c0_i32_1 = arith.constant 0 : i32
    return %c0_i32, %c0_i32_0 : i32, i32
  }
  func.func @transform_7(%arg0: i32) -> (i32, i32) {
    %c0_i32 = arith.constant 0 : i32
    %c0_i32_0 = arith.constant 0 : i32
    %c0_i32_1 = arith.constant 0 : i32
    return %c0_i32, %c0_i32_0 : i32, i32
  }
  func.func @transform_8(%arg0: i32) -> (i32, i32) {
    %c0_i32 = arith.constant 0 : i32
    %c0_i32_0 = arith.constant 0 : i32
    %c0_i32_1 = arith.constant 0 : i32
    return %c0_i32, %c0_i32_0 : i32, i32
  }
  func.func @transform_9(%arg0: i32) -> (i32, i32) {
    %c0_i32 = arith.constant 0 : i32
    %c0_i32_0 = arith.constant 0 : i32
    %c0_i32_1 = arith.constant 0 : i32
    return %c0_i32, %c0_i32_0 : i32, i32
  }
  func.func @transform_10(%arg0: i32) -> (i32, i32) {
    %c0_i32 = arith.constant 0 : i32
    %c0_i32_0 = arith.constant 0 : i32
    %c0_i32_1 = arith.constant 0 : i32
    return %c0_i32, %c0_i32_0 : i32, i32
  }
  func.func @transform_11(%arg0: i32) -> (i32, i32) {
    %c0_i32 = arith.constant 0 : i32
    %c0_i32_0 = arith.constant 0 : i32
    %c0_i32_1 = arith.constant 0 : i32
    return %c0_i32, %c0_i32_0 : i32, i32
  }
  func.func @transform_12(%arg0: i32) -> (i32, i32) {
    %c0_i32 = arith.constant 0 : i32
    %c0_i32_0 = arith.constant 0 : i32
    %c0_i32_1 = arith.constant 0 : i32
    return %c0_i32, %c0_i32_0 : i32, i32
  }
  func.func @transform_13(%arg0: i32) -> (i32, i32) {
    %c0_i32 = arith.constant 0 : i32
    %c0_i32_0 = arith.constant 0 : i32
    return %arg0, %c0_i32 : i32, i32
  }
}

module attributes {stable_mosaic.version = 11 : i64} {
  func.func @_self_attention_kernel(%arg0: i32, %arg1: memref<8x32xf32, #tpu.memory_space<vmem>>, %arg2: memref<1x32xf32, #tpu.memory_space<vmem>>, %arg3: memref<1x32xf32, #tpu.memory_space<vmem>>, %arg4: memref<32x96xbf16, #tpu.memory_space<vmem>>, %arg5: memref<1x96xf32, #tpu.memory_space<vmem>>, %arg6: memref<32x32xbf16, #tpu.memory_space<vmem>>, %arg7: memref<1x32xf32, #tpu.memory_space<vmem>>, %arg8: memref<1x32xf32, #tpu.memory_space<vmem>>, %arg9: memref<1x32xf32, #tpu.memory_space<vmem>>, %arg10: memref<32x32xbf16, #tpu.memory_space<vmem>>, %arg11: memref<1x32xf32, #tpu.memory_space<vmem>>, %arg12: memref<32x32xbf16, #tpu.memory_space<vmem>>, %arg13: memref<1x32xf32, #tpu.memory_space<vmem>>, %arg14: memref<8x32xf32, #tpu.memory_space<vmem>>) attributes {dimension_semantics = [#tpu.dimension_semantics<parallel>], iteration_bounds = array<i64: 2>, scalar_prefetch = 0 : i64, scratch_operands = 0 : i64, tpu.core_type = #tpu.core_type<tc>, window_params = [{transform_indices = @transform_0, window_bounds = array<i64: 8, 32>}, {pipeline_mode = #tpu.pipeline_mode<synchronous>, transform_indices = @transform_1, window_bounds = array<i64: 1, 32>}, {pipeline_mode = #tpu.pipeline_mode<synchronous>, transform_indices = @transform_2, window_bounds = array<i64: 1, 32>}, {pipeline_mode = #tpu.pipeline_mode<synchronous>, transform_indices = @transform_3, window_bounds = array<i64: 32, 96>}, {pipeline_mode = #tpu.pipeline_mode<synchronous>, transform_indices = @transform_4, window_bounds = array<i64: 1, 96>}, {pipeline_mode = #tpu.pipeline_mode<synchronous>, transform_indices = @transform_5, window_bounds = array<i64: 32, 32>}, {pipeline_mode = #tpu.pipeline_mode<synchronous>, transform_indices = @transform_6, window_bounds = array<i64: 1, 32>}, {pipeline_mode = #tpu.pipeline_mode<synchronous>, transform_indices = @transform_7, window_bounds = array<i64: 1, 32>}, {pipeline_mode = #tpu.pipeline_mode<synchronous>, transform_indices = @transform_8, window_bounds = array<i64: 1, 32>}, {pipeline_mode = #tpu.pipeline_mode<synchronous>, transform_indices = @transform_9, window_bounds = array<i64: 32, 32>}, {pipeline_mode = #tpu.pipeline_mode<synchronous>, transform_indices = @transform_10, window_bounds = array<i64: 1, 32>}, {pipeline_mode = #tpu.pipeline_mode<synchronous>, transform_indices = @transform_11, window_bounds = array<i64: 32, 32>}, {pipeline_mode = #tpu.pipeline_mode<synchronous>, transform_indices = @transform_12, window_bounds = array<i64: 1, 32>}, {transform_indices = @transform_13, window_bounds = array<i64: 8, 32>}]} {
    %c0 = arith.constant 0 : index
    %c0_0 = arith.constant 0 : index
    %0 = vector.load %arg1[%c0, %c0_0] : memref<8x32xf32, #tpu.memory_space<vmem>>, vector<8x32xf32>
    %c0_1 = arith.constant 0 : index
    %c0_2 = arith.constant 0 : index
    %1 = vector.load %arg2[%c0_1, %c0_2] : memref<1x32xf32, #tpu.memory_space<vmem>>, vector<1x32xf32>
    %c0_3 = arith.constant 0 : index
    %c0_4 = arith.constant 0 : index
    %2 = vector.load %arg3[%c0_3, %c0_4] : memref<1x32xf32, #tpu.memory_space<vmem>>, vector<1x32xf32>
    %cst = arith.constant dense<0.000000e+00> : vector<8xf32>
    %3 = vector.multi_reduction <add>, %0, %cst [1] : vector<8x32xf32> to vector<8xf32>
    %4 = vector.shape_cast %3 : vector<8xf32> to vector<8x1xf32>
    %cst_5 = arith.constant 3.200000e+01 : f32
    %5 = vector.broadcast %cst_5 : f32 to vector<8x1xf32>
    %6 = arith.divf %4, %5 : vector<8x1xf32>
    %7 = vector.broadcast %6 : vector<8x1xf32> to vector<8x32xf32>
    %8 = arith.subf %0, %7 : vector<8x32xf32>
    %9 = arith.mulf %8, %8 : vector<8x32xf32>
    %cst_6 = arith.constant dense<0.000000e+00> : vector<8xf32>
    %10 = vector.multi_reduction <add>, %9, %cst_6 [1] : vector<8x32xf32> to vector<8xf32>
    %11 = vector.shape_cast %10 : vector<8xf32> to vector<8x1xf32>
    %cst_7 = arith.constant 3.200000e+01 : f32
    %12 = vector.broadcast %cst_7 : f32 to vector<8x1xf32>
    %13 = arith.divf %11, %12 : vector<8x1xf32>
    %14 = vector.broadcast %6 : vector<8x1xf32> to vector<8x32xf32>
    %15 = arith.subf %0, %14 : vector<8x32xf32>
    %cst_8 = arith.constant 9.99999974E-6 : f32
    %16 = vector.broadcast %cst_8 : f32 to vector<8x1xf32>
    %17 = arith.addf %13, %16 : vector<8x1xf32>
    %18 = math.rsqrt %17 : vector<8x1xf32>
    %19 = vector.broadcast %18 : vector<8x1xf32> to vector<8x32xf32>
    %20 = arith.mulf %15, %19 : vector<8x32xf32>
    %21 = vector.broadcast %1 : vector<1x32xf32> to vector<8x32xf32>
    %22 = arith.mulf %20, %21 : vector<8x32xf32>
    %23 = vector.broadcast %2 : vector<1x32xf32> to vector<8x32xf32>
    %24 = arith.addf %22, %23 : vector<8x32xf32>
    %25 = arith.truncf %24 : vector<8x32xf32> to vector<8x32xbf16>
    %c0_9 = arith.constant 0 : index
    %c0_10 = arith.constant 0 : index
    %26 = vector.load %arg4[%c0_9, %c0_10] : memref<32x96xbf16, #tpu.memory_space<vmem>>, vector<32x96xbf16>
    %cst_11 = arith.constant dense<0.000000e+00> : vector<8x96xf32>
    %27 = tpu.matmul %25, %26, %cst_11 {dimension_numbers = #tpu.dot_dimension_numbers<[1], [0], [0], [1], [0, 0, 1, 1], [], []>} : vector<8x32xbf16>, vector<32x96xbf16>, vector<8x96xf32> -> vector<8x96xf32>
    %c0_12 = arith.constant 0 : index
    %c0_13 = arith.constant 0 : index
    %28 = vector.load %arg5[%c0_12, %c0_13] : memref<1x96xf32, #tpu.memory_space<vmem>>, vector<1x96xf32>
    %29 = vector.broadcast %28 : vector<1x96xf32> to vector<8x96xf32>
    %30 = arith.addf %27, %29 : vector<8x96xf32>
    %31 = vector.extract_strided_slice %30 {offsets = [0, 0], sizes = [8, 32], strides = [1, 1]} : vector<8x96xf32> to vector<8x32xf32>
    %32 = vector.extract_strided_slice %30 {offsets = [0, 32], sizes = [8, 32], strides = [1, 1]} : vector<8x96xf32> to vector<8x32xf32>
    %33 = vector.extract_strided_slice %30 {offsets = [0, 64], sizes = [8, 32], strides = [1, 1]} : vector<8x96xf32> to vector<8x32xf32>
    %34 = arith.truncf %31 : vector<8x32xf32> to vector<8x32xbf16>
    %35 = vector.shape_cast %34 : vector<8x32xbf16> to vector<1x8x4x8xbf16>
    %36 = tpu.transpose %35, [0, 2, 1, 3] : vector<1x8x4x8xbf16> -> vector<1x4x8x8xbf16>
    %37 = vector.shape_cast %36 : vector<1x4x8x8xbf16> to vector<4x8x8xbf16>
    %38 = arith.truncf %32 : vector<8x32xf32> to vector<8x32xbf16>
    %39 = vector.shape_cast %38 : vector<8x32xbf16> to vector<1x8x4x8xbf16>
    %40 = tpu.transpose %39, [0, 2, 1, 3] : vector<1x8x4x8xbf16> -> vector<1x4x8x8xbf16>
    %41 = vector.shape_cast %40 : vector<1x4x8x8xbf16> to vector<4x8x8xbf16>
    %42 = arith.truncf %33 : vector<8x32xf32> to vector<8x32xbf16>
    %43 = vector.shape_cast %42 : vector<8x32xbf16> to vector<1x8x4x8xbf16>
    %44 = tpu.transpose %43, [0, 2, 1, 3] : vector<1x8x4x8xbf16> -> vector<1x4x8x8xbf16>
    %45 = vector.shape_cast %44 : vector<1x4x8x8xbf16> to vector<4x8x8xbf16>
    %cst_14 = arith.constant dense<0.000000e+00> : vector<4x8x8xf32>
    %46 = tpu.matmul %37, %41, %cst_14 {dimension_numbers = #tpu.dot_dimension_numbers<[2], [2], [1], [1], [0, 0, 0, 1, 1, 1], [0], [0]>} : vector<4x8x8xbf16>, vector<4x8x8xbf16>, vector<4x8x8xf32> -> vector<4x8x8xf32>
    %cst_15 = arith.constant dense<0xFF800000> : vector<4x8xf32>
    %47 = vector.multi_reduction <maximumf>, %46, %cst_15 [2] : vector<4x8x8xf32> to vector<4x8xf32>
    %48 = vector.shape_cast %47 : vector<4x8xf32> to vector<4x8x1xf32>
    %49 = vector.broadcast %48 : vector<4x8x1xf32> to vector<4x8x8xf32>
    %50 = arith.subf %46, %49 : vector<4x8x8xf32>
    %51 = math.exp %50 : vector<4x8x8xf32>
    %cst_16 = arith.constant dense<0.000000e+00> : vector<4x8xf32>
    %52 = vector.multi_reduction <add>, %51, %cst_16 [2] : vector<4x8x8xf32> to vector<4x8xf32>
    %53 = vector.shape_cast %52 : vector<4x8xf32> to vector<4x8x1xf32>
    %54 = arith.truncf %51 : vector<4x8x8xf32> to vector<4x8x8xbf16>
    %cst_17 = arith.constant dense<0.000000e+00> : vector<4x8x8xf32>
    %55 = tpu.matmul %54, %45, %cst_17 {dimension_numbers = #tpu.dot_dimension_numbers<[2], [1], [1], [2], [0, 0, 0, 1, 1, 2], [0], [0]>} : vector<4x8x8xbf16>, vector<4x8x8xbf16>, vector<4x8x8xf32> -> vector<4x8x8xf32>
    %56 = tpu.reciprocal %53 {approx = true} : vector<4x8x1xf32> -> vector<4x8x1xf32>
    %57 = vector.broadcast %56 : vector<4x8x1xf32> to vector<4x8x8xf32>
    %58 = arith.mulf %55, %57 : vector<4x8x8xf32>
    %59 = arith.truncf %58 : vector<4x8x8xf32> to vector<4x8x8xbf16>
    %60 = vector.shape_cast %59 : vector<4x8x8xbf16> to vector<1x4x8x8xbf16>
    %61 = tpu.transpose %60, [0, 2, 1, 3] : vector<1x4x8x8xbf16> -> vector<1x8x4x8xbf16>
    %62 = vector.shape_cast %61 : vector<1x8x4x8xbf16> to vector<8x32xbf16>
    %c0_18 = arith.constant 0 : index
    %c0_19 = arith.constant 0 : index
    %63 = vector.load %arg6[%c0_18, %c0_19] : memref<32x32xbf16, #tpu.memory_space<vmem>>, vector<32x32xbf16>
    %cst_20 = arith.constant dense<0.000000e+00> : vector<8x32xf32>
    %64 = tpu.matmul %62, %63, %cst_20 {dimension_numbers = #tpu.dot_dimension_numbers<[1], [0], [0], [1], [0, 0, 1, 1], [], []>} : vector<8x32xbf16>, vector<32x32xbf16>, vector<8x32xf32> -> vector<8x32xf32>
    %c0_21 = arith.constant 0 : index
    %c0_22 = arith.constant 0 : index
    %65 = vector.load %arg7[%c0_21, %c0_22] : memref<1x32xf32, #tpu.memory_space<vmem>>, vector<1x32xf32>
    %66 = vector.broadcast %65 : vector<1x32xf32> to vector<8x32xf32>
    %67 = arith.addf %64, %66 : vector<8x32xf32>
    %68 = arith.addf %67, %0 : vector<8x32xf32>
    %c0_23 = arith.constant 0 : index
    %c0_24 = arith.constant 0 : index
    %69 = vector.load %arg8[%c0_23, %c0_24] : memref<1x32xf32, #tpu.memory_space<vmem>>, vector<1x32xf32>
    %c0_25 = arith.constant 0 : index
    %c0_26 = arith.constant 0 : index
    %70 = vector.load %arg9[%c0_25, %c0_26] : memref<1x32xf32, #tpu.memory_space<vmem>>, vector<1x32xf32>
    %cst_27 = arith.constant dense<0.000000e+00> : vector<8xf32>
    %71 = vector.multi_reduction <add>, %68, %cst_27 [1] : vector<8x32xf32> to vector<8xf32>
    %72 = vector.shape_cast %71 : vector<8xf32> to vector<8x1xf32>
    %cst_28 = arith.constant 3.200000e+01 : f32
    %73 = vector.broadcast %cst_28 : f32 to vector<8x1xf32>
    %74 = arith.divf %72, %73 : vector<8x1xf32>
    %75 = vector.broadcast %74 : vector<8x1xf32> to vector<8x32xf32>
    %76 = arith.subf %68, %75 : vector<8x32xf32>
    %77 = arith.mulf %76, %76 : vector<8x32xf32>
    %cst_29 = arith.constant dense<0.000000e+00> : vector<8xf32>
    %78 = vector.multi_reduction <add>, %77, %cst_29 [1] : vector<8x32xf32> to vector<8xf32>
    %79 = vector.shape_cast %78 : vector<8xf32> to vector<8x1xf32>
    %cst_30 = arith.constant 3.200000e+01 : f32
    %80 = vector.broadcast %cst_30 : f32 to vector<8x1xf32>
    %81 = arith.divf %79, %80 : vector<8x1xf32>
    %82 = vector.broadcast %74 : vector<8x1xf32> to vector<8x32xf32>
    %83 = arith.subf %68, %82 : vector<8x32xf32>
    %cst_31 = arith.constant 9.99999974E-6 : f32
    %84 = vector.broadcast %cst_31 : f32 to vector<8x1xf32>
    %85 = arith.addf %81, %84 : vector<8x1xf32>
    %86 = math.rsqrt %85 : vector<8x1xf32>
    %87 = vector.broadcast %86 : vector<8x1xf32> to vector<8x32xf32>
    %88 = arith.mulf %83, %87 : vector<8x32xf32>
    %89 = vector.broadcast %69 : vector<1x32xf32> to vector<8x32xf32>
    %90 = arith.mulf %88, %89 : vector<8x32xf32>
    %91 = vector.broadcast %70 : vector<1x32xf32> to vector<8x32xf32>
    %92 = arith.addf %90, %91 : vector<8x32xf32>
    %93 = arith.truncf %92 : vector<8x32xf32> to vector<8x32xbf16>
    %c0_32 = arith.constant 0 : index
    %c0_33 = arith.constant 0 : index
    %94 = vector.load %arg10[%c0_32, %c0_33] : memref<32x32xbf16, #tpu.memory_space<vmem>>, vector<32x32xbf16>
    %cst_34 = arith.constant dense<0.000000e+00> : vector<8x32xf32>
    %95 = tpu.matmul %93, %94, %cst_34 {dimension_numbers = #tpu.dot_dimension_numbers<[1], [0], [0], [1], [0, 0, 1, 1], [], []>} : vector<8x32xbf16>, vector<32x32xbf16>, vector<8x32xf32> -> vector<8x32xf32>
    %c0_35 = arith.constant 0 : index
    %c0_36 = arith.constant 0 : index
    %96 = vector.load %arg11[%c0_35, %c0_36] : memref<1x32xf32, #tpu.memory_space<vmem>>, vector<1x32xf32>
    %97 = vector.broadcast %96 : vector<1x32xf32> to vector<8x32xf32>
    %98 = arith.addf %95, %97 : vector<8x32xf32>
    %cst_37 = arith.constant 5.000000e-01 : f32
    %99 = vector.broadcast %cst_37 : f32 to vector<8x32xf32>
    %100 = arith.mulf %99, %98 : vector<8x32xf32>
    %cst_38 = arith.constant 4.471500e-02 : f32
    %101 = vector.broadcast %cst_38 : f32 to vector<8x32xf32>
    %102 = arith.mulf %101, %98 : vector<8x32xf32>
    %103 = arith.mulf %102, %98 : vector<8x32xf32>
    %104 = arith.mulf %103, %98 : vector<8x32xf32>
    %105 = arith.addf %98, %104 : vector<8x32xf32>
    %cst_39 = arith.constant 0.797884583 : f32
    %106 = vector.broadcast %cst_39 : f32 to vector<8x32xf32>
    %107 = arith.mulf %106, %105 : vector<8x32xf32>
    %108 = math.tanh %107 : vector<8x32xf32>
    %cst_40 = arith.constant 1.000000e+00 : f32
    %109 = vector.broadcast %cst_40 : f32 to vector<8x32xf32>
    %110 = arith.addf %109, %108 : vector<8x32xf32>
    %111 = arith.mulf %100, %110 : vector<8x32xf32>
    %112 = arith.truncf %111 : vector<8x32xf32> to vector<8x32xbf16>
    %c0_41 = arith.constant 0 : index
    %c0_42 = arith.constant 0 : index
    %113 = vector.load %arg12[%c0_41, %c0_42] : memref<32x32xbf16, #tpu.memory_space<vmem>>, vector<32x32xbf16>
    %cst_43 = arith.constant dense<0.000000e+00> : vector<8x32xf32>
    %114 = tpu.matmul %112, %113, %cst_43 {dimension_numbers = #tpu.dot_dimension_numbers<[1], [0], [0], [1], [0, 0, 1, 1], [], []>} : vector<8x32xbf16>, vector<32x32xbf16>, vector<8x32xf32> -> vector<8x32xf32>
    %c0_44 = arith.constant 0 : index
    %c0_45 = arith.constant 0 : index
    %115 = vector.load %arg13[%c0_44, %c0_45] : memref<1x32xf32, #tpu.memory_space<vmem>>, vector<1x32xf32>
    %116 = vector.broadcast %115 : vector<1x32xf32> to vector<8x32xf32>
    %117 = arith.addf %114, %116 : vector<8x32xf32>
    %118 = arith.addf %117, %68 : vector<8x32xf32>
    %c0_46 = arith.constant 0 : index
    %c0_47 = arith.constant 0 : index
    %119 = vector.load %arg14[%c0_46, %c0_47] : memref<8x32xf32, #tpu.memory_space<vmem>>, vector<8x32xf32>
    tpu.vector_store %arg14[%c0_46, %c0_47], %118 {strides = array<i32>} : memref<8x32xf32, #tpu.memory_space<vmem>>, vector<8x32xf32>,
    return
  }
  func.func @transform_0(%arg0: i32) -> (i32, i32) {
    %c0_i32 = arith.constant 0 : i32
    %c0_i32_0 = arith.constant 0 : i32
    return %arg0, %c0_i32 : i32, i32
  }
  func.func @transform_1(%arg0: i32) -> (i32, i32) {
    %c0_i32 = arith.constant 0 : i32
    %c0_i32_0 = arith.constant 0 : i32
    %c0_i32_1 = arith.constant 0 : i32
    return %c0_i32, %c0_i32_0 : i32, i32
  }
  func.func @transform_2(%arg0: i32) -> (i32, i32) {
    %c0_i32 = arith.constant 0 : i32
    %c0_i32_0 = arith.constant 0 : i32
    %c0_i32_1 = arith.constant 0 : i32
    return %c0_i32, %c0_i32_0 : i32, i32
  }
  func.func @transform_3(%arg0: i32) -> (i32, i32) {
    %c0_i32 = arith.constant 0 : i32
    %c0_i32_0 = arith.constant 0 : i32
    %c0_i32_1 = arith.constant 0 : i32
    return %c0_i32, %c0_i32_0 : i32, i32
  }
  func.func @transform_4(%arg0: i32) -> (i32, i32) {
    %c0_i32 = arith.constant 0 : i32
    %c0_i32_0 = arith.constant 0 : i32
    %c0_i32_1 = arith.constant 0 : i32
    return %c0_i32, %c0_i32_0 : i32, i32
  }
  func.func @transform_5(%arg0: i32) -> (i32, i32) {
    %c0_i32 = arith.constant 0 : i32
    %c0_i32_0 = arith.constant 0 : i32
    %c0_i32_1 = arith.constant 0 : i32
    return %c0_i32, %c0_i32_0 : i32, i32
  }
  func.func @transform_6(%arg0: i32) -> (i32, i32) {
    %c0_i32 = arith.constant 0 : i32
    %c0_i32_0 = arith.constant 0 : i32
    %c0_i32_1 = arith.constant 0 : i32
    return %c0_i32, %c0_i32_0 : i32, i32
  }
  func.func @transform_7(%arg0: i32) -> (i32, i32) {
    %c0_i32 = arith.constant 0 : i32
    %c0_i32_0 = arith.constant 0 : i32
    %c0_i32_1 = arith.constant 0 : i32
    return %c0_i32, %c0_i32_0 : i32, i32
  }
  func.func @transform_8(%arg0: i32) -> (i32, i32) {
    %c0_i32 = arith.constant 0 : i32
    %c0_i32_0 = arith.constant 0 : i32
    %c0_i32_1 = arith.constant 0 : i32
    return %c0_i32, %c0_i32_0 : i32, i32
  }
  func.func @transform_9(%arg0: i32) -> (i32, i32) {
    %c0_i32 = arith.constant 0 : i32
    %c0_i32_0 = arith.constant 0 : i32
    %c0_i32_1 = arith.constant 0 : i32
    return %c0_i32, %c0_i32_0 : i32, i32
  }
  func.func @transform_10(%arg0: i32) -> (i32, i32) {
    %c0_i32 = arith.constant 0 : i32
    %c0_i32_0 = arith.constant 0 : i32
    %c0_i32_1 = arith.constant 0 : i32
    return %c0_i32, %c0_i32_0 : i32, i32
  }
  func.func @transform_11(%arg0: i32) -> (i32, i32) {
    %c0_i32 = arith.constant 0 : i32
    %c0_i32_0 = arith.constant 0 : i32
    %c0_i32_1 = arith.constant 0 : i32
    return %c0_i32, %c0_i32_0 : i32, i32
  }
  func.func @transform_12(%arg0: i32) -> (i32, i32) {
    %c0_i32 = arith.constant 0 : i32
    %c0_i32_0 = arith.constant 0 : i32
    %c0_i32_1 = arith.constant 0 : i32
    return %c0_i32, %c0_i32_0 : i32, i32
  }
  func.func @transform_13(%arg0: i32) -> (i32, i32) {
    %c0_i32 = arith.constant 0 : i32
    %c0_i32_0 = arith.constant 0 : i32
    return %arg0, %c0_i32 : i32, i32
  }
}

</mosaic_0001>

<bundles_post_ra>
// kernel: tpu_custom_call.1
= control target key start
LH: loop header
LB: loop body
LE: loop exit
PB: predicated region body
PF: predicated region fallthrough
CT: control target
= control target key end

     0   :  { %s3472_s0 = inlined_call_operand.hbm [shape: f32[16,32], index: 0, kind: input, shape index: {}]   ;;  %s3473_s1 = inlined_call_operand.hbm [shape: f32[1,32], index: 1, kind: input, shape index: {}]   ;;  %s3474_s2 = inlined_call_operand.hbm [shape: f32[1,32], index: 2, kind: input, shape index: {}]   ;;  %s3475_s3 = inlined_call_operand.hbm [shape: bf16[32,96], index: 3, kind: input, shape index: {}]   ;;  %s3476_s4 = inlined_call_operand.hbm [shape: f32[1,96], index: 4, kind: input, shape index: {}]   ;;  %s3477_s5 = inlined_call_operand.hbm [shape: bf16[32,32], index: 5, kind: input, shape index: {}]   ;;  %s3478_s6 = inlined_call_operand.hbm [shape: f32[1,32], index: 6, kind: input, shape index: {}]   ;;  %s3479_s7 = inlined_call_operand.hbm [shape: f32[1,32], index: 7, kind: input, shape index: {}]   ;;  %s3480_s8 = inlined_call_operand.hbm [shape: f32[1,32], index: 8, kind: input, shape index: {}]   ;;  %s3481_s9 = inlined_call_operand.vmem [shape: bf16[32,32], index: 9, kind: input, shape index: {}]   ;;  %s3482_s10 = inlined_call_operand.vmem [shape: f32[1,32], index: 10, kind: input, shape index: {}]   ;;  %s3483_s11 = inlined_call_operand.hbm [shape: bf16[32,32], index: 11, kind: input, shape index: {}]   ;;  %s3484_s12 = inlined_call_operand.vmem [shape: f32[1,32], index: 12, kind: input, shape index: {}]   ;;  %s3485_s13 = inlined_call_operand.hbm [shape: f32[16,32], index: 13, kind: output, shape index: {}]  }
   0x1   :  { %3491 = sst [smem:[#allocation27_spill]] %s3473_s1 }
   0x2   :  { %3492 = sst [smem:[#allocation28_spill]] %s3474_s2 }
   0x3   :  { %3493 = sst [smem:[#allocation29_spill]] %s3475_s3 }
   0x4   :  { %3494 = sst [smem:[#allocation30_spill]] %s3476_s4 }
   0x5   :  { %3495 = sst [smem:[#allocation31_spill]] %s3477_s5 }
   0x6   :  { %3496 = sst [smem:[#allocation32_spill]] %s3478_s6 }
   0x7   :  { %3497 = sst [smem:[#allocation33_spill]] %s3479_s7 }
   0x8   :  { %3498 = sst [smem:[#allocation34_spill]] %s3480_s8 }
   0x9   :  { %18 = vsyncpa [#allocation3], 0 }
   0xa   :  { %20 = vsyncpa [#allocation3 + $0x1], 0 }
   0xb   :  { %21 = vsyncpa [#allocation6], 0 }
   0xc   :  { %22 = vsyncpa [#allocation9], 0 }
   0xd   :  { %23 = vsyncpa [#allocation12], 0 }
   0xe   :  { %24 = vsyncpa [#allocation15], 0 }
   0xf   :  { %25 = vsyncpa [#allocation18], 0 }
  0x10   :  { %26 = vsyncpa [#allocation4], 0 }
  0x11   :  { %28 = vsyncpa [#allocation4 + $0x1], 0  ;;  %s2981_s25 = smov 0   ;;  %s2983_s26 = smov 0  }
  0x12   :  { %s2985_s27 = smov 0   ;;  %s2987_s28 = smov 0  }
  0x13 LB: > { %s2885_s29 = smov [#allocation5]   ;;  %s3002_s14 = sadd.s32 4294967295, %s2883_s28   ;;  %s2883_s28 = sphi %s2987_s28, %s3534_s28   ;;  %s2879_s27 = sphi %s2985_s27, %s3533_s27   ;;  %s2875_s26 = sphi %s2983_s26, %s3532_s26   ;;  %s2871_s25 = sphi %s2981_s25, %s3531_s25  }
  0x14   : > { %s356_s30 = sshll.u32 %s2885_s29, 4  ;;  %p2190_p0 = scmp.ge.s32.totalorder %s2883_s28, 1  ;;  %s357_s30 = int_to_ptr.vmem [resolvable:$true] %s356_s30 }
  0x15   : > { %p3486_p1 = scmp.eq.s32.totalorder %s3002_s14, 0  ;;  %p343_p2 = scmp.lt.s32.totalorder %s2883_s28, 3 }
  0x16   : > { %s2886_s16 = smov [#allocation8]   ;;  %s2887_s19 = smov [#allocation11]  }
  0x17   : > { %p3007_p3 = pnand %p2190_p0, %p343_p2  ;;  %s377_s17 = sshll.u32 %s2886_s16, 4  ;;  %s3014_s17 = int_to_ptr.vmem [resolvable:$true] %s377_s17 }
  0x18   : > { %s401_s20 = sshll.u32 %s2887_s19, 4  ;;  %s2548_s22 = scalar_lea.vmem %s357_s30, 16  ;;  %s3022_s20 = int_to_ptr.vmem [resolvable:$true] %s401_s20 }
  0x19   : > { %s3499_s15 = scalar_select %p3007_p3, 1, 0 }
  0x1a   : > { %p2395_p5 = pneg %p3007_p3  ;;  %p2549_p8 = scmp.ne.s32.totalorder %s357_s30, %s2548_s22 }
  0x1b   : > { %s2555_s23 = scalar_lea.vmem %s357_s30, 32  ;;  %p2556_p11 = scmp.lt.s32.totalorder %s357_s30, %s357_s30 }
  0x1c   : > { %p3018_p6 = pnand %p2395_p5, %p3486_p1  ;;  %p2557_p12 = scmp.lt.s32.totalorder %s2555_s23, %s2548_s22 }
  0x1e   : > { %p3026_p7 = pneg %p3018_p6  ;;  %p2558_p13 = por %p2557_p12, %p2556_p11 }
  0x20   : > { %p2551_p9 = pnand %p2549_p8, %p3026_p7 }
  0x22   : > { %p2552_p10 = pneg %p2551_p9 }
  0x24   : > { %p2559_p0 = pnand %p2558_p13, %p2552_p10 }
  0x26   : > { %2562 = shalt.err (!%p2559_p0)
}
  0x27   : > { %s3502_s1 = sld [smem:[#allocation27_spill]]  ;;  %s2574_s16 = scalar_lea.vmem %s3014_s17, 256 }
  0x28   : > { %p2575_p2 = scmp.ne.s32.totalorder %s3014_s17, %s2574_s16  ;;  %p2582_p9 = scmp.lt.s32.totalorder %s3014_s17, %s3014_s17 }
  0x29   : > { %p2583_p11 = scmp.lt.s32.totalorder %s2574_s16, %s2574_s16 }
  0x2a   : > { %p2577_p5 = pnand %p2575_p2, %p3026_p7 }
  0x2b   : > { %p2584_p10 = por %p2583_p11, %p2582_p9 }
  0x2c   : > { %p2578_p8 = pneg %p2577_p5 }
  0x2d   : > { %2398 = dma.hbm_to_vmem [thread:$0]  (!%p3018_p6), %s3502_s1, 16, %s357_s30, [#allocation6]  }
  0x2e   : > { %p2585_p12 = pnand %p2584_p10, %p2578_p8 }
  0x30   : > { %2588 = shalt.err (!%p2585_p12)
}
  0x31   : > { %s3487_s19 = smov 64   ;;  %s2889_s22 = smov 4  }
  0x32   : > { %s3503_s3 = sld [smem:[#allocation29_spill]]  ;;  %s2600_s24 = scalar_lea.vmem %s3022_s20, 256 }
  0x33   : > { %p2601_p13 = scmp.ne.s32.totalorder %s3022_s20, %s2600_s24  ;;  %p2608_p5 = scmp.lt.s32.totalorder %s3022_s20, %s3022_s20 }
  0x34   : > { %p2609_p8 = scmp.lt.s32.totalorder %s2600_s24, %s2600_s24 }
  0x35   : > { %p2603_p0 = pnand %p2601_p13, %p3026_p7 }
  0x36   : > { %p2610_p9 = por %p2609_p8, %p2608_p5 }
  0x37   : > { %p2604_p2 = pneg %p2603_p0 }
  0x38   : > { %2404 = dma.hbm_to_vmem [thread:$0]  (!%p3018_p6), %s3503_s3, 256, %s3014_s17, [#allocation9], %s3487_s19, %s3487_s19, %s2889_s22  }
  0x39   : > { %p2611_p11 = pnand %p2610_p9, %p2604_p2 }
  0x3b   : > { %2614 = shalt.err (!%p2611_p11)
}
  0x3c   : > { %s3504_s5 = sld [smem:[#allocation31_spill]]  ;;  %s2890_s17 = smov [#allocation14]  }
  0x3d   : > { %s426_s30 = sshll.u32 %s2890_s17, 4  ;;  %s2891_s23 = smov [#allocation7]   ;;  %s427_s30 = int_to_ptr.vmem [resolvable:$true] %s426_s30 }
  0x3e   : > { %s367_s1 = sshll.u32 %s2891_s23, 4  ;;  %s2626_s24 = scalar_lea.vmem %s427_s30, 16  ;;  %s368_s1 = int_to_ptr.vmem [resolvable:$true] %s367_s1 }
  0x3f   : > { %p2627_p10 = scmp.ne.s32.totalorder %s427_s30, %s2626_s24  ;;  %s2633_s3 = scalar_lea.vmem %s427_s30, 32 }
  0x40   : > { %p2634_p0 = scmp.lt.s32.totalorder %s427_s30, %s427_s30  ;;  %p2635_p2 = scmp.lt.s32.totalorder %s2633_s3, %s2626_s24 }
  0x41   : > { %p2629_p12 = pnand %p2627_p10, %p3026_p7 }
  0x42   : > { %2410 = dma.hbm_to_vmem [thread:$0]  (!%p3018_p6), %s3504_s5, 256, %s3022_s20, [#allocation12], %s3487_s19, %s3487_s19, %s2889_s22  }
  0x43   : > { %p2630_p13 = pneg %p2629_p12  ;;  %p2636_p5 = por %p2635_p2, %p2634_p0 }
  0x45   : > { %p2637_p8 = pnand %p2636_p5, %p2630_p13 }
  0x47   : > { %2640 = shalt.err (!%p2637_p8)
}
  0x48   : > { %s3505_s7 = sld [smem:[#allocation33_spill]]  ;;  %s2652_s16 = scalar_lea.vmem %s368_s1, 16 }
  0x49   : > { %p2653_p9 = scmp.ne.s32.totalorder %s368_s1, %s2652_s16  ;;  %s2659_s17 = scalar_lea.vmem %s368_s1, 32 }
  0x4a   : > { %p2660_p12 = scmp.lt.s32.totalorder %s368_s1, %s368_s1  ;;  %p2661_p4 = scmp.lt.s32.totalorder %s2659_s17, %s2652_s16 }
  0x4b   : > { %p2655_p11 = pnand %p2653_p9, %p3026_p7 }
  0x4c   : > { %p2662_p1 = por %p2661_p4, %p2660_p12 }
  0x4d   : > { %p2656_p10 = pneg %p2655_p11 }
  0x4e   : > { %2416 = dma.hbm_to_vmem [thread:$0]  (!%p3018_p6), %s3505_s7, 16, %s427_s30, [#allocation15]  }
  0x4f   : > { %p2663_p0 = pnand %p2662_p1, %p2656_p10 }
  0x51   : > { %2666 = shalt.err (!%p2663_p0)
}
  0x52   : > { %s3506_s2 = sld [smem:[#allocation28_spill]]  ;;  %s2892_s30 = smov [#allocation10]  }
  0x53   : > { %s391_s24 = sshll.u32 %s2892_s30, 4  ;;  %s2893_s29 = smov [#allocation13]   ;;  %s392_s24 = int_to_ptr.vmem [resolvable:$true] %s391_s24 }
  0x54   : > { %s415_s20 = sshll.u32 %s2893_s29, 4  ;;  %s2678_s19 = scalar_lea.vmem %s392_s24, 16  ;;  %s416_s20 = int_to_ptr.vmem [resolvable:$true] %s415_s20 }
  0x55   : > { %p2679_p13 = scmp.ne.s32.totalorder %s392_s24, %s2678_s19  ;;  %s2685_s16 = scalar_lea.vmem %s392_s24, 32 }
  0x56   : > { %p2686_p1 = scmp.lt.s32.totalorder %s392_s24, %s392_s24  ;;  %p2687_p4 = scmp.lt.s32.totalorder %s2685_s16, %s2678_s19 }
  0x57   : > { %p2681_p2 = pnand %p2679_p13, %p3026_p7 }
  0x58   : > { %2401 = dma.hbm_to_vmem [thread:$0]  (!%p3018_p6), %s3506_s2, 16, %s368_s1, [#allocation6]  }
  0x59   : > { %p2682_p5 = pneg %p2681_p2  ;;  %p2688_p8 = por %p2687_p4, %p2686_p1 }
  0x5b   : > { %p2689_p9 = pnand %p2688_p8, %p2682_p5 }
  0x5d   : > { %2692 = shalt.err (!%p2689_p9)
}
  0x5e   : > { %s3507_s4 = sld [smem:[#allocation30_spill]]  ;;  %s2704_s3 = scalar_lea.vmem %s416_s20, 16 }
  0x5f   : > { %p2705_p11 = scmp.ne.s32.totalorder %s416_s20, %s2704_s3  ;;  %s2711_s23 = scalar_lea.vmem %s416_s20, 32 }
  0x60   : > { %p2712_p0 = scmp.lt.s32.totalorder %s416_s20, %s416_s20  ;;  %p2713_p13 = scmp.lt.s32.totalorder %s2711_s23, %s2704_s3 }
  0x61   : > { %p2707_p10 = pnand %p2705_p11, %p3026_p7 }
  0x62   : > { %p2714_p2 = por %p2713_p13, %p2712_p0 }
  0x63   : > { %p2708_p12 = pneg %p2707_p10 }
  0x64   : > { %2407 = dma.hbm_to_vmem [thread:$0]  (!%p3018_p6), %s3507_s4, 16, %s392_s24, [#allocation9]  }
  0x65   : > { %p2715_p1 = pnand %p2714_p2, %p2708_p12 }
  0x67   : > { %2718 = shalt.err (!%p2715_p1)
}
  0x68   : > { %s3508_s6 = sld [smem:[#allocation32_spill]]  ;;  %s2894_s24 = smov [#allocation16]  }
  0x69   : > { %s437_s29 = sshll.u32 %s2894_s24, 4  ;;  %s2895_s16 = smov [#allocation17]   ;;  %s438_s29 = int_to_ptr.vmem [resolvable:$true] %s437_s29 }
  0x6a   : > { %s453_s17 = sshll.u32 %s2895_s16, 4  ;;  %s2730_s1 = scalar_lea.vmem %s438_s29, 16  ;;  %s454_s17 = int_to_ptr.vmem [resolvable:$true] %s453_s17 }
  0x6b   : > { %p2731_p5 = scmp.ne.s32.totalorder %s438_s29, %s2730_s1  ;;  %s2737_s3 = scalar_lea.vmem %s438_s29, 32 }
  0x6c   : > { %p2738_p9 = scmp.lt.s32.totalorder %s438_s29, %s438_s29  ;;  %p2739_p11 = scmp.lt.s32.totalorder %s2737_s3, %s2730_s1 }
  0x6d   : > { %p2733_p4 = pnand %p2731_p5, %p3026_p7 }
  0x6e   : > { %2413 = dma.hbm_to_vmem [thread:$0]  (!%p3018_p6), %s3508_s6, 16, %s416_s20, [#allocation12]  }
  0x6f   : > { %p2734_p8 = pneg %p2733_p4  ;;  %p2740_p10 = por %p2739_p11, %p2738_p9 }
  0x71   : > { %p2741_p12 = pnand %p2740_p10, %p2734_p8 }
  0x73   : > { %2744 = shalt.err (!%p2741_p12)
}
  0x74   : > { %s3509_s8 = sld [smem:[#allocation34_spill]]  ;;  %s2756_s19 = scalar_lea.vmem %s454_s17, 256 }
  0x75   : > { %p2757_p0 = scmp.ne.s32.totalorder %s454_s17, %s2756_s19  ;;  %p2764_p1 = scmp.lt.s32.totalorder %s454_s17, %s454_s17 }
  0x76   : > { %p2765_p5 = scmp.lt.s32.totalorder %s2756_s19, %s2756_s19 }
  0x77   : > { %p2759_p13 = pnand %p2757_p0, %p3026_p7 }
  0x78   : > { %p2766_p4 = por %p2765_p5, %p2764_p1 }
  0x79   : > { %p2760_p2 = pneg %p2759_p13 }
  0x7a   : > { %2419 = dma.hbm_to_vmem [thread:$0]  (!%p3018_p6), %s3509_s8, 16, %s438_s29, [#allocation15]  }
  0x7b   : > { %p2767_p3 = pnand %p2766_p4, %p2760_p2 }
  0x7d   : > { %2770 = shalt.err (!%p2767_p3)
}
  0x7e   : > { %s3510_s30 = smov 64   ;;  %s2189_s18 = sadd.s32 4294967294, %s2883_s28  }
  0x7f   : > { %2422 = dma.hbm_to_vmem [thread:$0]  (!%p3018_p6), %s3483_s11, 256, %s454_s17, [#allocation18], %s3510_s30, %s3510_s30, %s2889_s22  }
  0x80   : > { %s3114_s21 = sadd.s32 1, %s2883_s28   ;;  %s41_s29 = sadd.s32 1, %s2879_s27 }
  0x81   : > { %s38_s1 = ssub.s32 %s2883_s28, %s3114_s21  ;;  %p48_p3 = scmp.ne.s32.totalorder %s2879_s27, %s2875_s26 }
  0x82   : > { %p39_p7 = scmp.eq.s32.totalorder %s38_s1, 0  ;;  %p49_p8 = scmp.eq.s32.totalorder %s2883_s28, 0 }
  0x83   : > { %p54_p9 = scmp.ne.s32.totalorder %s2875_s26, %s2871_s25  ;;  %p330_p11 = scmp.eq.s32.totalorder %s3002_s14, 1 }
  0x84   : > { %s3126_s3 = scalar_select %p39_p7, %s2879_s27, %s41_s29  }
  0x85   : > { %p50_p10 = por %p49_p8, %p48_p3  ;;  %p3511_p12 = scmp.eq.s32.totalorder %s3002_s14, 0 }
  0x86   : > { %p3134_p6 = por %p330_p11, %p48_p3  ;;  %p336_p13 = scmp.eq.s32.totalorder %s2189_s18, 1 }
  0x87   : > { %p3130_p0 = por %p3511_p12, %p54_p9  ;;  %p2440_p2 = scmp.lt.s32.totalorder %s2883_s28, 2 }
  0x88   : > { %s3513_s22 = scalar_select %p3134_p6, 1, 0 }
  0x89   : > { %s3512_s23 = scalar_select %p3130_p0, 1, 0 }
  0x8a   : > { %s470_s17 = sand.u32 1, %s2879_s27   ;;  %p3140_p1 = por %p336_p13, %p54_p9 }
  0x8b   : > { %s2201_s19 = sshll.u32 %s470_s17, 3  ;;  %s2202_s30 = sshll.u32 %s2883_s28, 7 }
  0x8c   : > { %s3514_s20 = scalar_select %p3140_p1, 1, 0 }
  0x8d   : > { %s3148_s29 = scalar_lea.hbm %s3472_s0, %s2202_s30  ;;  %s474_s1 = scalar_lea.vmem [#allocation2], %s2201_s19 }
  0x8e   : > { %s481_s2 = sshll.u32 %s474_s1, 4  ;;  %p3150_p5 = pnand %p2440_p2, %p50_p10  ;;  %s482_s2 = int_to_ptr.vmem [resolvable:$true] %s481_s2 }
  0x8f   : > { %s471_s4 = scalar_lea.sflag [#allocation3], %s470_s17  ;;  %s2771_s5 = scalar_lea.hbm %s3148_s29, 128 }
  0x90   : > { %p2772_p4 = scmp.ne.s32.totalorder %s3148_s29, %s2771_s5  ;;  %p2773_p3 = pneg %p3150_p5 }
  0x91   : > { %s2776_s16 = scalar_lea.hbm %s3472_s0, 256  ;;  %p2777_p9 = scmp.lt.s32.totalorder %s3148_s29, %s3472_s0 }
  0x92   : > { %p2774_p7 = pnand %p2773_p3, %p2772_p4  ;;  %p2778_p11 = scmp.lt.s32.totalorder %s2776_s16, %s2771_s5 }
  0x94   : > { %p2775_p8 = pneg %p2774_p7  ;;  %p2779_p10 = por %p2778_p11, %p2777_p9 }
  0x96   : > { %p2780_p12 = pnand %p2779_p10, %p2775_p8 }
  0x98   : > { %2783 = shalt.err (!%p2780_p12)
}
  0x99   : > { %s2784_s1 = scalar_lea.vmem %s482_s2, 128  ;;  %s2896_s17 = smov [#allocation2]  }
  0x9a   : > { %p2785_p13 = scmp.ne.s32.totalorder %s482_s2, %s2784_s1  ;;  %s2789_s7 = sshll.u32 %s2896_s17, 4  ;;  %s2790_s7 = int_to_ptr.vmem [resolvable:$false] %s2789_s7 }
  0x9b   : > { %s2791_s8 = scalar_lea.vmem %s2790_s7, 256  ;;  %p2792_p4 = scmp.lt.s32.totalorder %s482_s2, %s2790_s7 }
  0x9c   : > { %p2787_p2 = pnand %p2785_p13, %p2773_p3  ;;  %p2793_p7 = scmp.lt.s32.totalorder %s2791_s8, %s2784_s1 }
  0x9e   : > { %p2788_p1 = pneg %p2787_p2  ;;  %p2794_p6 = por %p2793_p7, %p2792_p4 }
  0xa0   : > { %p2795_p0 = pnand %p2794_p6, %p2788_p1 }
  0xa2   : > { %2798 = shalt.err (!%p2795_p0)
}
  0xa3   : > { %2426 = dma.hbm_to_vmem [thread:$0]  (!%p3150_p5), %s3148_s29, 128, %s482_s2, %s471_s4  }
  0xa4   : > { %p3516_p8 = scmp.ne.s32.totalorder %s3499_s15, 0 }
  0xa5   : > { %s3171_s5 = sand.u32 (!%p3516_p8), 1, %s2875_s26   ;;  %p3517_p6 = scmp.ne.s32.totalorder (!%p3516_p8), %s3512_s23, 0 }
  0xa6   : > { %490 = sbr.rel (%p3516_p8) target bundleno = 2658 (0xa62), region = 72  ;;  %s2204_s6 = sshll.u32 (!%p3516_p8), %s3171_s5, 3 }
  0xa7   : > { %s493_s7 = scalar_lea.sflag (!%p3516_p8), [#allocation3], %s3171_s5  ;;  %s496_s8 = scalar_lea.vmem (!%p3516_p8), [#allocation2], %s2204_s6 }
  0xab   : > { %2842 = dma.done.wait (%p3517_p6), %s493_s7, 128  }
  0xac   : > { %2844 = vsyncadd (%p3517_p6), %s493_s7, 4294967168  ;;  %p3518_p0 = scmp.eq.s32.totalorder %s3002_s14, 0 }
  0xae   : > { %2846 = dma.done.wait (%p3518_p0), [#allocation6], 32   ;;  %p3519_p1 = pmov %p3518_p0 }
  0xaf   : > { %p3520_p5 = pmov %p3518_p0 }
  0xb0   : > { %2848 = vsyncadd (%p3519_p1), [#allocation6], 4294967264 }
  0xb1   : > { %2850 = dma.done.wait (%p3520_p5), [#allocation9], 272   ;;  %p3521_p3 = pmov %p3518_p0 }
  0xb2   : > { %p3522_p9 = pmov %p3518_p0 }
  0xb3   : > { %2852 = vsyncadd (%p3521_p3), [#allocation9], 4294967024 }
  0xb4   : > { %2854 = dma.done.wait (%p3522_p9), [#allocation12], 272   ;;  %p3523_p11 = pmov %p3518_p0 }
  0xb5   : > { %p3524_p10 = pmov %p3518_p0 }
  0xb6   : > { %2856 = vsyncadd (%p3523_p11), [#allocation12], 4294967024 }
  0xb7   : > { %2858 = dma.done.wait (%p3524_p10), [#allocation15], 32   ;;  %p3525_p12 = pmov %p3518_p0 }
  0xb8   : > { %p3526_p13 = pmov %p3518_p0 }
  0xb9   : > { %2860 = vsyncadd (%p3525_p12), [#allocation15], 4294967264 }
  0xba   : > { %2862 = dma.done.wait (%p3526_p13), [#allocation18], 256   ;;  %p3527_p2 = pmov %p3518_p0 }
  0xbb   : > { %vm579_vm0 = vcmask 261120   ;;  %v3201_v0 = vld [vmem:[%s496_s8] sm:$0xff]  ;;  %v2897_v8 = vmov 0.0   ;;  %vm2898_vm1 = vmmov 0   ;;  %v2508_v9 = vld [vmem:[#allocation8] sm:$0xff]   ;;  %s2899_s2 = smov 104   ;;  %v686_v32 = vlaneseq }
  0xbc   : > { %2864 = vsyncadd (%p3527_p2), [#allocation18], 4294967040  ;;  %v580_v1 = vsel %vm579_vm0, %v3201_v0, 0.0  ;;  %v2507_v7 = vld [vmem:[#allocation8 + $0x8] sm:$0xff]   ;;  %2275 = vmatprep.subr.bf16.mxu0 %v2897_v8  ;;  %2279 = vmatprep.mubr.msk.bf16.mxu0 %vm2898_vm1, %v2897_v8  ;;  %v2215_v14 = vld [vmem:[#allocation5] ss:$0 sm:$0xff] }
  0xbd   : > { %581 = vadd.xlane.f32.xlu0 %v580_v1  ;;  %2276 = vmatpush3.bf16.msra.mxu0 %v2507_v7  ;;  %v2216_v16 = vld [vmem:[#allocation7] ss:$0 sm:$0xff]  ;;  %v2217_v20 = vld [vmem:[#allocation10] ss:$0 sm:$0xff]  ;;  %s2900_s4 = smov 120   ;;  %s2901_s15 = smov 112  }
  0xbe   : > { %2283 = vmatprep.subr.bf16.mxu1 %v2897_v8  ;;  %2277 = vmatprep.subr.bf16.mxu0 %v2897_v8  ;;  %s2902_s23 = smov 96   ;;  %s2903_s29 = smov 64   ;;  %v2904_v30 = vmov 1983009808   ;;  %v687_v34 = vshrl.u32 %v686_v32, 7  ;;  %v2906_v57 = vmov 0  }
  0xbf   : > { %2285 = vmatprep.mubr.msk.bf16.mxu1 %vm2898_vm1, %v2897_v8  ;;  %v684_v31 = vunpack.c.l.s4 %v2904_v30  ;;  %v2905_v35 = vmov 1934713408   ;;  %vm1184_vm2 = vcmask 64512   ;;  %vm1412_vm3 = vcmask 1043456   ;;  %s2907_s18 = smov 8   ;;  %s2908_s30 = smov 16  }
  0xc0   : > { %v701_v36 = vunpack.c.l.s4 %v2905_v35  ;;  %s2909_s24 = smov 24   ;;  %vm1773_vm4 = vcmask 130048   ;;  %vm1776_vm5 = vcmask 195584   ;;  %p3528_p7 = scmp.ne.s32.totalorder %s3513_s22, 0 }
  0xc1   : > { %2278 = vmatpush3.bf16.msra.mxu0 %v2508_v9  ;;  %v685_v33 = vunpack.c.0.s8 %v684_v31  ;;  %s2910_s16 = smov [#allocation19]  }
  0xc2   : > { %2289 = vmatprep.subr.bf16.mxu0 %v2897_v8  ;;  %v702_v40 = vunpack.c.0.s8 %v701_v36  ;;  %s2803_s19 = sshll.u32 %s2910_s16, 4  ;;  %s2804_s19 = int_to_ptr.vmem [resolvable:$false] %s2803_s19 }
  0xc3   : > { %v3228_v37 = vsub.s32 %v685_v33, %v687_v34  ;;  %s2805_s1 = scalar_lea.vmem %s2804_s19, 256 }
  0xc4   : > { %v3237_v46 = vsub.s32 %v702_v40, %v687_v34 }
 0x146   : > { %v582_v2 = vpop.xlane.xlu0 %581 }
 0x147   : > { %v584_v3 = vmul.f32 0.03125, %v582_v2 }
 0x149   : > { %v585_v4 = vsub.f32 %v3201_v0, %v584_v3 }
 0x14b   : > { %v586_v5 = vmul.f32 %v585_v4, %v585_v4 }
 0x14d   : > { %v587_v6 = vsel %vm579_vm0, %v586_v5, 0.0 }
 0x14e   : > { %588 = vadd.xlane.f32.xlu0 %v587_v6 }
 0x1d7   : > { %v589_v10 = vpop.xlane.xlu0 %588 }
 0x1d8   : > { %v590_v11 = vmul.f32 0.03125, %v589_v10 }
 0x1da   : > { %v591_v12 = vadd.f32 1e-05, %v590_v11 }
 0x1dc   : > { %2515 = vrsqrt.f32 %v591_v12 }
 0x1e9   : > { %v2516_v13 = vpop.eup %2515 }
 0x1ea   : > { %v593_v15 = vmul.f32 %v2516_v13, %v585_v4 }
 0x1ec   : > { %v600_v17 = vmul.f32 %v2215_v14, %v593_v15 }
 0x1ee   : > { %v607_v18 = vadd.f32 %v2216_v16, %v600_v17 }
 0x1f0   : > { %v608_v19 = vpack.c.bf16 %v607_v18, %v607_v18 }
 0x1f2   : > { %2280 = vmatmul.mubr.msk.bf16.vlgmr.msra.gmra.mxu0 %vm579_vm0, %v608_v19 }
 0x1f3   : > { %2291 = vmatprep.mubr.msk.bf16.mxu0 %vm2898_vm1, %v2897_v8 }
 0x2b2   : > { %v669_v21 = vpop.f32.mrf.mxu0 }
 0x2b3   : > { %v670_v22 = vadd.f32 %v2217_v20, %v669_v21 }
 0x2b4   : > { %v2281_v23 = vpop.f32.mrf.mxu0 }
 0x2b5   : > { %v675_v24 = vpack.c.bf16 %v670_v22, %v670_v22 }
 0x2b6   : > { %v672_v25 = vpop.f32.mrf.mxu0 }
 0x2b7   : > { %681 = vrot.lane.b32.xlu0 %v675_v24, %s2899_s2  ;;  %677 = vrot.lane.b32.xlu1 %v675_v24, %s2900_s4  ;;  %v689_v43 = vrot.slane %v675_v24, %v3228_v37 }
 0x2b8   : > { %v2282_v26 = vpop.f32.mrf.mxu0 }
 0x2bb   : > { %679 = vrot.lane.b32.xlu1 %v675_v24, %s2901_s15  ;;  %s2244_s15 = sshll.u32 %s3002_s14, 7  ;;  %s2020_s14 = scalar_lea.sflag [#allocation4], %s3171_s5 }
 0x2bf   : > { %844 = vrot.lane.b32.xlu1 %v675_v24, %s2902_s23 }
 0x329   : > { %v3218_v27 = vpop.permute.xlu1 %677  ;;  %v3224_v29 = vpop.permute.xlu0 %681 }
 0x32a   : > { %846 = vrot.lane.b32.xlu1 %v3218_v27, %s2902_s23  ;;  %v731_v39 = vrot.slane %v3224_v29, %v3228_v37  ;;  %v723_v41 = vrot.slane %v3218_v27, %v3228_v37 }
 0x32c   : > { %v732_v47 = vcombine.low %v723_v41, %v731_v39  ;;  %v733_v49 = vcombine.high %v723_v41, %v731_v39 }
 0x32d   : > { %v3221_v28 = vpop.permute.xlu1 %679 }
 0x32e   : > { %848 = vrot.lane.b32.xlu1 %v3221_v28, %s2902_s23  ;;  %v697_v38 = vrot.slane %v3221_v28, %v3228_v37  ;;  %v3246_v52 = vrot.slane %v732_v47, %v3237_v46  ;;  %v3249_v54 = vrot.slane %v733_v49, %v3237_v46 }
 0x330   : > { %v698_v44 = vcombine.low %v689_v43, %v697_v38  ;;  %v699_v45 = vcombine.high %v689_v43, %v697_v38  ;;  %v748_v62 = vcombine.high %v3246_v52, %v2906_v57  ;;  %v749_v1 = vcombine.high %v3249_v54, %v2906_v57 }
 0x331   : > { %v845_v42 = vpop.permute.xlu1 %844  ;;  %v755_v7 = vshrl.u32 %v3246_v52, 16  ;;  %v771_v13 = vshrl.u32 %v3249_v54, 16 }
 0x332   : > { %850 = vrot.lane.b32.xlu1 %v3224_v29, %s2902_s23  ;;  %v3240_v50 = vrot.slane %v698_v44, %v3237_v46  ;;  %v3243_v51 = vrot.slane %v699_v45, %v3237_v46  ;;  %v859_v55 = vrot.slane %v845_v42, %v3228_v37  ;;  %v763_v12 = vshrl.u32 %v748_v62, 16  ;;  %s574_s23 = scalar_lea.vmem [#allocation19], %s2204_s6 }
 0x333   : > { %v779_v16 = vshrl.u32 %v749_v1, 16 }
 0x334   : > { %v714_v58 = vcombine.high %v3240_v50, %v2906_v57  ;;  %v715_v59 = vcombine.high %v3243_v51, %v2906_v57  ;;  %v754_v2 = vshrl.u32 %v3240_v50, 16  ;;  %v770_v5 = vshrl.u32 %v3243_v51, 16 }
 0x335   : > { %v752_v49 = vpack.i.b16 %v3246_v52, %v3240_v50 }
 0x336   : > { %1014 = vrot.lane.b32.xlu1 %v675_v24, %s2903_s29  ;;  %v762_v9 = vshrl.u32 %v714_v58, 16  ;;  %v778_v10 = vshrl.u32 %v715_v59, 16  ;;  %v756_v17 = vpack.i.b16 %v755_v7, %v754_v2  ;;  %v760_v18 = vpack.i.b16 %v748_v62, %v714_v58 }
 0x337   : > { %v772_v20 = vpack.i.b16 %v771_v13, %v770_v5  ;;  %v776_v21 = vpack.i.b16 %v749_v1, %v715_v59 }
 0x338   : > { %v764_v24 = vpack.i.b16 %v763_v12, %v762_v9  ;;  %v780_v25 = vpack.i.b16 %v779_v16, %v778_v10 }
 0x339   : > { %v807_v1 = vcombine.low %v756_v17, %v772_v20 }
 0x33b   : > { %v814_v7 = vrot.slane %v807_v1, %v3228_v37 }
 0x39c   : > { %v847_v48 = vpop.permute.xlu1 %846 }
 0x39d   : > { %v893_v6 = vrot.slane %v847_v48, %v3228_v37 }
 0x3a0   : > { %v849_v53 = vpop.permute.xlu1 %848 }
 0x3a1   : > { %v867_v56 = vrot.slane %v849_v53, %v3228_v37  ;;  %v768_v53 = vpack.i.b16 %v3249_v54, %v3243_v51 }
 0x3a3   : > { %v868_v60 = vcombine.low %v859_v55, %v867_v56  ;;  %v869_v61 = vcombine.high %v859_v55, %v867_v56 }
 0x3a4   : > { %v851_v63 = vpop.permute.xlu1 %850 }
 0x3a5   : > { %v876_v3 = vrot.slane %v868_v60, %v3237_v46  ;;  %v901_v4 = vrot.slane %v851_v63, %v3228_v37  ;;  %v883_v11 = vrot.slane %v869_v61, %v3237_v46  ;;  %v815_v60 = vcombine.low %v764_v24, %v780_v25 }
 0x3a6   : > { %v790_v61 = vcombine.low %v760_v18, %v776_v21 }
 0x3a7   : > { %v902_v14 = vcombine.low %v893_v6, %v901_v4  ;;  %v903_v15 = vcombine.high %v893_v6, %v901_v4  ;;  %v884_v19 = vcombine.high %v876_v3, %v2906_v57  ;;  %v885_v26 = vcombine.high %v883_v11, %v2906_v57 }
 0x3a8   : > { %v924_v30 = vshrl.u32 %v876_v3, 16  ;;  %v940_v36 = vshrl.u32 %v883_v11, 16  ;;  %v822_v51 = vrot.slane %v815_v60, %v3228_v37  ;;  %v797_v52 = vrot.slane %v790_v61, %v3228_v37 }
 0x3a9   : > { %v910_v22 = vrot.slane %v902_v14, %v3237_v46  ;;  %v917_v23 = vrot.slane %v903_v15, %v3237_v46  ;;  %v932_v35 = vshrl.u32 %v884_v19, 16  ;;  %v948_v44 = vshrl.u32 %v885_v26, 16 }
 0x3ab   : > { %v918_v31 = vcombine.high %v910_v22, %v2906_v57  ;;  %v919_v32 = vcombine.high %v917_v23, %v2906_v57  ;;  %v922_v33 = vpack.i.b16 %v910_v22, %v876_v3  ;;  %v925_v34 = vshrl.u32 %v910_v22, 16 }
 0x3ac   : > { %v938_v38 = vpack.i.b16 %v917_v23, %v883_v11  ;;  %v941_v39 = vshrl.u32 %v917_v23, 16  ;;  %v782_v3 = vcombine.low %v752_v49, %v768_v53  ;;  %v823_v11 = vcombine.low %v814_v7, %v822_v51 }
 0x3ad   : > { %v926_v40 = vpack.i.b16 %v925_v34, %v924_v30  ;;  %v930_v41 = vpack.i.b16 %v918_v31, %v884_v19  ;;  %v933_v42 = vshrl.u32 %v918_v31, 16  ;;  %v946_v43 = vpack.i.b16 %v919_v32, %v885_v26 }
 0x3ae   : > { %v942_v45 = vpack.i.b16 %v941_v39, %v940_v36  ;;  %v949_v47 = vshrl.u32 %v919_v32, 16  ;;  %v952_v48 = vcombine.low %v922_v33, %v938_v38  ;;  %v789_v9 = vrot.slane %v782_v3, %v3228_v37 }
 0x3af   : > { %v934_v55 = vpack.i.b16 %v933_v42, %v932_v35  ;;  %v960_v56 = vcombine.low %v930_v41, %v946_v43  ;;  %v830_v19 = vrot.slane %v823_v11, %v3237_v46 }
 0x3b0   : > { %v950_v58 = vpack.i.b16 %v949_v47, %v948_v44  ;;  %v977_v59 = vcombine.low %v926_v40, %v942_v45  ;;  %v959_v62 = vrot.slane %v952_v48, %v3228_v37  ;;  %v798_v12 = vcombine.low %v789_v9, %v797_v52 }
 0x3b1   : > { %v967_v63 = vrot.slane %v960_v56, %v3228_v37  ;;  %v836_v25 = vshrl.u32 %v830_v19, 16  ;;  %v831_v35 = vcombine.high %v830_v19, %v2906_v57 }
 0x3b2   : > { %v985_v2 = vcombine.low %v934_v55, %v950_v58  ;;  %v984_v5 = vrot.slane %v977_v59, %v3228_v37  ;;  %v805_v22 = vrot.slane %v798_v12, %v3237_v46 }
 0x3b3   : > { %v968_v4 = vcombine.low %v959_v62, %v967_v63  ;;  %v842_v39 = vshrl.u32 %v831_v35, 16 }
 0x3b4   : > { %v992_v50 = vrot.slane %v985_v2, %v3228_v37  ;;  %v834_v30 = vpack.i.b16 %v830_v19, %v805_v22  ;;  %v835_v31 = vshrl.u32 %v805_v22, 16  ;;  %v806_v38 = vcombine.high %v805_v22, %v2906_v57 }
 0x3b5   : > { %v975_v54 = vrot.slane %v968_v4, %v3237_v46 }
 0x3b6   : > { %v993_v6 = vcombine.low %v984_v5, %v992_v50  ;;  %v837_v34 = vpack.i.b16 %v836_v25, %v835_v31  ;;  %v840_v40 = vpack.i.b16 %v831_v35, %v806_v38  ;;  %v841_v41 = vshrl.u32 %v806_v38, 16  ;;  %v1015_v50 = vpop.permute.xlu1 %1014 }
 0x3b7   : > { %v1005_v14 = vshrl.u32 %v975_v54, 16  ;;  %v976_v20 = vcombine.high %v975_v54, %v2906_v57 }
 0x3b8   : > { %v1000_v10 = vrot.slane %v993_v6, %v3237_v46  ;;  %v843_v42 = vpack.i.b16 %v842_v39, %v841_v41 }
 0x3b9   : > { %v1011_v26 = vshrl.u32 %v976_v20, 16 }
 0x3ba   : > { %v1004_v13 = vpack.i.b16 %v1000_v10, %v975_v54  ;;  %v1006_v15 = vshrl.u32 %v1000_v10, 16  ;;  %v1001_v16 = vcombine.high %v1000_v10, %v2906_v57 }
 0x3bc   : > { %v1189_v17 = vsel %vm1184_vm2, %v1004_v13, 0  ;;  %v1007_v18 = vpack.i.b16 %v1006_v15, %v1005_v14  ;;  %v1012_v23 = vshrl.u32 %v1001_v16, 16  ;;  %v1010_v24 = vpack.i.b16 %v1001_v16, %v976_v20 }
 0x3bd   : > { %2284 = vmatpush3.bf16.xpose.msra.mxu1 %v1189_v17 }
 0x3be   : > { %v1235_v21 = vsel %vm1184_vm2, %v1007_v18, 0  ;;  %2295 = vmatprep.subr.bf16.mxu1 %v2897_v8  ;;  %v1013_v32 = vpack.i.b16 %v1012_v23, %v1011_v26  ;;  %v1281_v33 = vsel %vm1184_vm2, %v1010_v24, 0 }
 0x3bf   : > { %2290 = vmatpush3.bf16.xpose.msra.mxu0 %v1235_v21 }
 0x3c0   : > { %2301 = vmatprep.subr.bf16.mxu0 %v2897_v8  ;;  %v1327_v36 = vsel %vm1184_vm2, %v1013_v32, 0 }
 0x3c4   : > { %2286 = vmatmul.mubr.msk.bf16.vlgmr.msra.gmra.mxu1 %vm1184_vm2, %v834_v30 }
 0x3c5   : > { %2296 = vmatpush3.bf16.xpose.msra.mxu1 %v1281_v33  ;;  %2297 = vmatprep.mubr.msk.bf16.mxu1 %vm2898_vm1, %v2897_v8 }
 0x3c6   : > { %2292 = vmatmul.mubr.msk.bf16.vlgmr.msra.gmra.mxu0 %vm1184_vm2, %v837_v34  ;;  %2307 = vmatprep.subr.bf16.mxu1 %v2897_v8 }
 0x3c7   : > { %2302 = vmatpush3.bf16.xpose.msra.mxu0 %v1327_v36  ;;  %2303 = vmatprep.mubr.msk.bf16.mxu0 %vm2898_vm1, %v2897_v8 }
 0x3c8   : > { %2313 = vmatprep.subr.bf16.mxu0 %v2897_v8 }
 0x3cc   : > { %2298 = vmatmul.mubr.msk.bf16.vlgmr.msra.gmra.mxu1 %vm1184_vm2, %v840_v40 }
 0x3cd   : > { %2309 = vmatprep.mubr.msk.bf16.mxu1 %vm2898_vm1, %v2897_v8 }
 0x3ce   : > { %2304 = vmatmul.mubr.msk.bf16.vlgmr.msra.gmra.mxu0 %vm1184_vm2, %v843_v42 }
 0x3cf   : > { %2315 = vmatprep.mubr.msk.bf16.mxu0 %vm2898_vm1, %v2897_v8 }
 0x484   : > { %v1225_v43 = vpop.f32.mrf.mxu1 }
 0x485   : > { %v1369_v44 = vsel %vm1184_vm2, %v1225_v43, -inf }
 0x486   : > { %1370 = vmax.xlane.f32.xlu1 %v1369_v44  ;;  %v2287_v45 = vpop.f32.mrf.mxu1  ;;  %v1271_v47 = vpop.f32.mrf.mxu0 }
 0x487   : > { %v1372_v48 = vsel %vm1184_vm2, %v1271_v47, -inf }
 0x488   : > { %v1228_v49 = vpop.f32.mrf.mxu1  ;;  %1373 = vmax.xlane.f32.xlu0 %v1372_v48  ;;  %v2293_v53 = vpop.f32.mrf.mxu0 }
 0x48a   : > { %v2288_v55 = vpop.f32.mrf.mxu1  ;;  %v1274_v56 = vpop.f32.mrf.mxu0 }
 0x48c   : > { %v2294_v58 = vpop.f32.mrf.mxu0  ;;  %v3317_v59 = vpop.f32.mrf.mxu1 }
 0x48d   : > { %v1375_v4 = vsel %vm1184_vm2, %v3317_v59, -inf }
 0x48e   : > { %v2299_v60 = vpop.f32.mrf.mxu1  ;;  %v3319_v61 = vpop.f32.mrf.mxu0 }
 0x48f   : > { %v1378_v5 = vsel %vm1184_vm2, %v3319_v61, -inf }
 0x490   : > { %v1320_v62 = vpop.f32.mrf.mxu1  ;;  %v2305_v63 = vpop.f32.mrf.mxu0 }
 0x492   : > { %v2300_v1 = vpop.f32.mrf.mxu1  ;;  %v1366_v2 = vpop.f32.mrf.mxu0 }
 0x494   : > { %v2306_v3 = vpop.f32.mrf.mxu0 }
 0x497   : > { %1018 = vrot.lane.b32.xlu1 %v3221_v28, %s2903_s29 }
 0x49b   : > { %1020 = vrot.lane.b32.xlu1 %v3224_v29, %s2903_s29  ;;  %v1029_v29 = vrot.slane %v1015_v50, %v3228_v37 }
 0x49e   : > { %1016 = vrot.lane.b32.xlu0 %v3218_v27, %s2903_s29  ;;  %s2033_s29 = sshll.u32 %s574_s23, 4  ;;  %s3430_s29 = int_to_ptr.vmem [resolvable:$true] %s2033_s29 }
 0x49f   : > { %s2799_s6 = scalar_lea.vmem %s3430_s29, 128  ;;  %p2806_p0 = scmp.lt.s32.totalorder %s3430_s29, %s2804_s19 }
 0x4a0   : > { %p2800_p4 = scmp.ne.s32.totalorder %s3430_s29, %s2799_s6  ;;  %p2807_p1 = scmp.lt.s32.totalorder %s2805_s1, %s2799_s6 }
 0x4a2   : > { %p2801_p8 = pnand %p2800_p4, %p3528_p7  ;;  %p2808_p5 = por %p2807_p1, %p2806_p0 }
 0x4a4   : > { %p2802_p6 = pneg %p2801_p8 }
 0x4a6   : > { %p2809_p3 = pnand %p2808_p5, %p2802_p6 }
 0x4bd   : > { %1376 = vmax.xlane.f32.xlu0 %v1375_v4 }
 0x4bf   : > { %1379 = vmax.xlane.f32.xlu1 %v1378_v5 }
 0x50f   : > { %v1371_v51 = vpop.xlane.xlu1 %1370 }
 0x510   : > { %v1381_v52 = vsub.f32 %v1225_v43, %v1371_v51 }
 0x511   : > { %v1374_v54 = vpop.xlane.xlu0 %1373 }
 0x512   : > { %v1385_v6 = vmul.f32 1.442695, %v1381_v52  ;;  %v1382_v28 = vsub.f32 %v1271_v47, %v1374_v54 }
 0x513   : > { %v1019_v7 = vpop.permute.xlu1 %1018 }
 0x514   : > { %2517 = vpow2.f32 %v1385_v6  ;;  %v1387_v9 = vmul.f32 1.442695, %v1382_v28  ;;  %v1037_v27 = vrot.slane %v1019_v7, %v3228_v37 }
 0x515   : > { %v1017_v12 = vpop.permute.xlu0 %1016 }
 0x516   : > { %2519 = vpow2.f32 %v1387_v9  ;;  %v1038_v10 = vcombine.low %v1029_v29, %v1037_v27  ;;  %v1039_v11 = vcombine.high %v1029_v29, %v1037_v27  ;;  %v1063_v17 = vrot.slane %v1017_v12, %v3228_v37 }
 0x517   : > { %v1021_v13 = vpop.permute.xlu1 %1020 }
 0x518   : > { %v1046_v14 = vrot.slane %v1038_v10, %v3237_v46  ;;  %v1053_v15 = vrot.slane %v1039_v11, %v3237_v46  ;;  %v1071_v16 = vrot.slane %v1021_v13, %v3228_v37 }
 0x51a   : > { %v1072_v18 = vcombine.low %v1063_v17, %v1071_v16  ;;  %v1073_v19 = vcombine.high %v1063_v17, %v1071_v16  ;;  %v1054_v20 = vcombine.high %v1046_v14, %v2906_v57  ;;  %v1055_v21 = vcombine.high %v1053_v15, %v2906_v57 }
 0x51b   : > { %v1094_v24 = vshrl.u32 %v1046_v14, 16  ;;  %v1110_v25 = vshrl.u32 %v1053_v15, 16 }
 0x51c   : > { %v1080_v22 = vrot.slane %v1072_v18, %v3237_v46  ;;  %v1087_v23 = vrot.slane %v1073_v19, %v3237_v46  ;;  %v1102_v33 = vshrl.u32 %v1054_v20, 16  ;;  %v1118_v34 = vshrl.u32 %v1055_v21, 16 }
 0x51e   : > { %v1088_v26 = vcombine.high %v1080_v22, %v2906_v57  ;;  %v1089_v30 = vcombine.high %v1087_v23, %v2906_v57  ;;  %v1092_v31 = vpack.i.b16 %v1080_v22, %v1046_v14  ;;  %v1095_v32 = vshrl.u32 %v1080_v22, 16 }
 0x51f   : > { %v1108_v35 = vpack.i.b16 %v1087_v23, %v1053_v15  ;;  %v1111_v36 = vshrl.u32 %v1087_v23, 16 }
 0x520   : > { %v1096_v39 = vpack.i.b16 %v1095_v32, %v1094_v24  ;;  %v1100_v40 = vpack.i.b16 %v1088_v26, %v1054_v20  ;;  %v1103_v41 = vshrl.u32 %v1088_v26, 16  ;;  %v1116_v42 = vpack.i.b16 %v1089_v30, %v1055_v21 }
 0x521   : > { %v2518_v38 = vpop.eup %2517  ;;  %v1112_v43 = vpack.i.b16 %v1111_v36, %v1110_v25  ;;  %v1119_v44 = vshrl.u32 %v1089_v30, 16  ;;  %v1122_v45 = vcombine.low %v1092_v31, %v1108_v35 }
 0x522   : > { %v1393_v47 = vsel %vm1184_vm2, %v2518_v38, 0.0  ;;  %v1104_v49 = vpack.i.b16 %v1103_v41, %v1102_v33  ;;  %v1130_v53 = vcombine.low %v1100_v40, %v1116_v42  ;;  %v1405_v12 = vpack.c.bf16 %v2518_v38, %v2518_v38 }
 0x523   : > { %v2520_v48 = vpop.eup %2519  ;;  %1394 = vadd.xlane.f32.xlu0 %v1393_v47  ;;  %v1120_v55 = vpack.i.b16 %v1119_v44, %v1118_v34  ;;  %v1147_v56 = vcombine.low %v1096_v39, %v1112_v43  ;;  %v1129_v58 = vrot.slane %v1122_v45, %v3228_v37 }
 0x524   : > { %v1137_v60 = vrot.slane %v1130_v53, %v3228_v37  ;;  %v1396_v63 = vsel %vm1184_vm2, %v2520_v48, 0.0  ;;  %v1406_v15 = vpack.c.bf16 %v2520_v48, %v2520_v48 }
 0x525   : > { %v1155_v62 = vcombine.low %v1104_v49, %v1120_v55  ;;  %v1154_v2 = vrot.slane %v1147_v56, %v3228_v37 }
 0x526   : > { %v1138_v1 = vcombine.low %v1129_v58, %v1137_v60 }
 0x527   : > { %1397 = vadd.xlane.f32.xlu0 %v1396_v63  ;;  %v1162_v3 = vrot.slane %v1155_v62, %v3228_v37 }
 0x528   : > { %v1145_v4 = vrot.slane %v1138_v1, %v3237_v46 }
 0x529   : > { %v1163_v5 = vcombine.low %v1154_v2, %v1162_v3 }
 0x52a   : > { %v1146_v50 = vcombine.high %v1145_v4, %v2906_v57  ;;  %v1175_v54 = vshrl.u32 %v1145_v4, 16 }
 0x52b   : > { %v1170_v51 = vrot.slane %v1163_v5, %v3237_v46 }
 0x52c   : > { %v1181_v7 = vshrl.u32 %v1146_v50, 16 }
 0x52d   : > { %v1174_v52 = vpack.i.b16 %v1170_v51, %v1145_v4  ;;  %v1176_v6 = vshrl.u32 %v1170_v51, 16  ;;  %v1171_v28 = vcombine.high %v1170_v51, %v2906_v57 }
 0x52f   : > { %v1414_v29 = vsel %vm1412_vm3, %v1174_v52, 0  ;;  %v1177_v9 = vpack.i.b16 %v1176_v6, %v1175_v54  ;;  %v1180_v27 = vpack.i.b16 %v1171_v28, %v1146_v50  ;;  %v1182_v10 = vshrl.u32 %v1171_v28, 16 }
 0x530   : > { %2308 = vmatpush3.bf16.msra.mxu1 %v1414_v29 }
 0x531   : > { %v1460_v11 = vsel %vm1412_vm3, %v1177_v9, 0  ;;  %2319 = vmatprep.subr.bf16.mxu1 %v2897_v8  ;;  %v1183_v13 = vpack.i.b16 %v1182_v10, %v1181_v7  ;;  %v1506_v14 = vsel %vm1412_vm3, %v1180_v27, 0 }
 0x532   : > { %2314 = vmatpush3.bf16.msra.mxu0 %v1460_v11 }
 0x533   : > { %2310 = vmatmul.mubr.msk.bf16.vlgmr.msra.gmra.mxu1 %vm1184_vm2, %v1405_v12  ;;  %2325 = vmatprep.subr.bf16.mxu0 %v2897_v8  ;;  %v1552_v16 = vsel %vm1412_vm3, %v1183_v13, 0 }
 0x534   : > { %2320 = vmatpush3.bf16.msra.mxu1 %v1506_v14  ;;  %2321 = vmatprep.mubr.msk.bf16.mxu1 %vm2898_vm1, %v2897_v8 }
 0x535   : > { %2316 = vmatmul.mubr.msk.bf16.vlgmr.msra.gmra.mxu0 %vm1184_vm2, %v1406_v15  ;;  %2331 = vmatprep.subr.bf16.mxu1 %v2897_v8 }
 0x536   : > { %2326 = vmatpush3.bf16.msra.mxu0 %v1552_v16  ;;  %2327 = vmatprep.mubr.msk.bf16.mxu0 %vm2898_vm1, %v2897_v8 }
 0x537   : > { %2339 = vmatprep.subr.bf16.mxu0 %v2897_v8 }
 0x546   : > { %v1377_v17 = vpop.xlane.xlu0 %1376 }
 0x547   : > { %v1383_v18 = vsub.f32 %v3317_v59, %v1377_v17  ;;  %v2509_v59 = vld [vmem:[#allocation11 + $0x8] sm:$0xff]  }
 0x548   : > { %v1380_v19 = vpop.xlane.xlu1 %1379 }
 0x549   : > { %v1389_v20 = vmul.f32 1.442695, %v1383_v18  ;;  %v1384_v21 = vsub.f32 %v3319_v61, %v1380_v19 }
 0x54b   : > { %2521 = vpow2.f32 %v1389_v20  ;;  %v1391_v22 = vmul.f32 1.442695, %v1384_v21 }
 0x54d   : > { %2523 = vpow2.f32 %v1391_v22 }
 0x558   : > { %v2522_v23 = vpop.eup %2521 }
 0x559   : > { %v1399_v24 = vsel %vm1184_vm2, %v2522_v23, 0.0  ;;  %v1407_v25 = vpack.c.bf16 %v2522_v23, %v2522_v23 }
 0x55a   : > { %v2524_v26 = vpop.eup %2523  ;;  %1400 = vadd.xlane.f32.xlu1 %v1399_v24 }
 0x55b   : > { %2322 = vmatmul.mubr.msk.bf16.vlgmr.msra.gmra.mxu1 %vm1184_vm2, %v1407_v25  ;;  %v1402_v30 = vsel %vm1184_vm2, %v2524_v26, 0.0  ;;  %v1408_v31 = vpack.c.bf16 %v2524_v26, %v2524_v26 }
 0x55c   : > { %1403 = vadd.xlane.f32.xlu0 %v1402_v30  ;;  %2335 = vmatprep.mubr.msk.bf16.mxu1 %vm2898_vm1, %v2897_v8 }
 0x55d   : > { %2328 = vmatmul.mubr.msk.bf16.vlgmr.msra.gmra.mxu0 %vm1184_vm2, %v1408_v31  ;;  %2332 = vmatpush3.bf16.msra.mxu1 %v2509_v59 }
 0x55e   : > { %2343 = vmatprep.mubr.msk.bf16.mxu0 %vm2898_vm1, %v2897_v8  ;;  %2333 = vmatprep.subr.bf16.mxu1 %v2897_v8 }
 0x5ac   : > { %v1395_v40 = vpop.xlane.xlu0 %1394 }
 0x5ad   : > { %2525 = vrcp.f32 %v1395_v40 }
 0x5b0   : > { %v1398_v41 = vpop.xlane.xlu0 %1397 }
 0x5b1   : > { %2527 = vrcp.f32 %v1398_v41 }
 0x5ba   : > { %v2526_v44 = vpop.eup %2525 }
 0x5be   : > { %v2528_v47 = vpop.eup %2527 }
 0x5e3   : > { %v1401_v42 = vpop.xlane.xlu1 %1400 }
 0x5e4   : > { %2529 = vrcp.f32 %v1401_v42  ;;  %v2510_v42 = vld [vmem:[#allocation11] sm:$0xff]  }
 0x5e5   : > { %v1404_v43 = vpop.xlane.xlu0 %1403  ;;  %2334 = vmatpush3.bf16.msra.mxu1 %v2510_v42 }
 0x5e6   : > { %2531 = vrcp.f32 %v1404_v43  ;;  %2347 = vmatprep.subr.bf16.mxu1 %v2897_v8 }
 0x5f1   : > { %v2530_v49 = vpop.eup %2529 }
 0x5f3   : > { %v1450_v61 = vpop.f32.mrf.mxu1  ;;  %v2532_v58 = vpop.eup %2531 }
 0x5f4   : > { %v1598_v45 = vmul.f32 %v2526_v44, %v1450_v61 }
 0x5f5   : > { %v2311_v32 = vpop.f32.mrf.mxu1  ;;  %v1496_v33 = vpop.f32.mrf.mxu0 }
 0x5f6   : > { %v1599_v48 = vmul.f32 %v2528_v47, %v1496_v33  ;;  %v1602_v55 = vpack.c.bf16 %v1598_v45, %v1598_v45 }
 0x5f7   : > { %v1453_v34 = vpop.f32.mrf.mxu1  ;;  %v2317_v35 = vpop.f32.mrf.mxu0 }
 0x5f8   : > { %v1636_v63 = vpack.c.bf16 %v1599_v48, %v1599_v48  ;;  %v1609_v5 = vrot.slane %v1602_v55, %v3228_v37 }
 0x5f9   : > { %v2312_v36 = vpop.f32.mrf.mxu1  ;;  %v1499_v38 = vpop.f32.mrf.mxu0 }
 0x5fa   : > { %v1643_v6 = vrot.slane %v1636_v63, %v3228_v37 }
 0x5fb   : > { %v2318_v39 = vpop.f32.mrf.mxu0 }
 0x61b   : > { %v1542_v53 = vpop.f32.mrf.mxu1 }
 0x61c   : > { %v1600_v56 = vmul.f32 %v2530_v49, %v1542_v53 }
 0x61d   : > { %v2323_v60 = vpop.f32.mrf.mxu1  ;;  %v1588_v62 = vpop.f32.mrf.mxu0 }
 0x61e   : > { %v1610_v1 = vpack.c.bf16 %v1600_v56, %v1600_v56  ;;  %v1601_v2 = vmul.f32 %v2532_v58, %v1588_v62 }
 0x61f   : > { %v1545_v3 = vpop.f32.mrf.mxu1  ;;  %v2329_v4 = vpop.f32.mrf.mxu0 }
 0x620   : > { %v1617_v50 = vrot.slane %v1610_v1, %v3228_v37  ;;  %v1644_v51 = vpack.c.bf16 %v1601_v2, %v1601_v2 }
 0x621   : > { %v2324_v52 = vpop.f32.mrf.mxu1  ;;  %v1591_v54 = vpop.f32.mrf.mxu0 }
 0x622   : > { %v1618_v28 = vcombine.low %v1609_v5, %v1617_v50  ;;  %v1619_v7 = vcombine.high %v1609_v5, %v1617_v50  ;;  %v1651_v29 = vrot.slane %v1644_v51, %v3228_v37  ;;  %v2229_v52 = vld [vmem:[#allocation13] ss:$0 sm:$0xff] }
 0x623   : > { %v2330_v9 = vpop.f32.mrf.mxu0 }
 0x624   : > { %v1626_v27 = vrot.slane %v1618_v28, %v3237_v46  ;;  %v1633_v10 = vrot.slane %v1619_v7, %v3237_v46  ;;  %v1652_v11 = vcombine.low %v1643_v6, %v1651_v29  ;;  %v1653_v12 = vcombine.high %v1643_v6, %v1651_v29 }
 0x626   : > { %v1634_v13 = vcombine.high %v1626_v27, %v2906_v57  ;;  %v1660_v14 = vrot.slane %v1652_v11, %v3237_v46  ;;  %v1667_v15 = vrot.slane %v1653_v12, %v3237_v46  ;;  %v1635_v16 = vcombine.high %v1633_v10, %v2906_v57 }
 0x627   : > { %v1674_v17 = vshrl.u32 %v1626_v27, 16  ;;  %v1690_v23 = vshrl.u32 %v1633_v10, 16 }
 0x628   : > { %v1668_v18 = vcombine.high %v1660_v14, %v2906_v57  ;;  %v1669_v19 = vcombine.high %v1667_v15, %v2906_v57  ;;  %v1672_v20 = vpack.i.b16 %v1660_v14, %v1626_v27  ;;  %v1675_v21 = vshrl.u32 %v1660_v14, 16 }
 0x629   : > { %v1682_v22 = vshrl.u32 %v1634_v13, 16  ;;  %v1688_v24 = vpack.i.b16 %v1667_v15, %v1633_v10  ;;  %v1691_v25 = vshrl.u32 %v1667_v15, 16  ;;  %v1698_v61 = vshrl.u32 %v1635_v16, 16  ;;  %v2511_v15 = vld [vmem:[%s3481_s9 + $0x8] sm:$0xff]  }
 0x62a   : > { %v1676_v26 = vpack.i.b16 %v1675_v21, %v1674_v17  ;;  %v1680_v30 = vpack.i.b16 %v1668_v18, %v1634_v13  ;;  %v1683_v31 = vshrl.u32 %v1668_v18, 16  ;;  %v1696_v59 = vpack.i.b16 %v1669_v19, %v1635_v16  ;;  %2340 = vmatpush3.bf16.msra.mxu0 %v2511_v15 }
 0x62b   : > { %v1692_v32 = vpack.i.b16 %v1691_v25, %v1690_v23  ;;  %v1699_v33 = vshrl.u32 %v1669_v19, 16  ;;  %v1702_v34 = vcombine.low %v1672_v20, %v1688_v24  ;;  %2341 = vmatprep.subr.bf16.mxu0 %v2897_v8  ;;  %v2233_v20 = vld [vmem:[#allocation14] ss:$0 sm:$0xff] }
 0x62c   : > { %v1684_v35 = vpack.i.b16 %v1683_v31, %v1682_v22  ;;  %v1710_v36 = vcombine.low %v1680_v30, %v1696_v59  ;;  %v2234_v22 = vld [vmem:[#allocation16] ss:$0 sm:$0xff]  ;;  %v2514_v30 = vld [vmem:[#allocation17] sm:$0xff]  }
 0x62d   : > { %v1700_v38 = vpack.i.b16 %v1699_v33, %v1698_v61  ;;  %v1727_v39 = vcombine.low %v1676_v26, %v1692_v32  ;;  %v1709_v40 = vrot.slane %v1702_v34, %v3228_v37  ;;  %v2513_v26 = vld [vmem:[#allocation17 + $0x8] sm:$0xff]   ;;  %v2235_v31 = vld [vmem:[%s3482_s10] ss:$0 sm:$0xff] }
 0x62e   : > { %v1717_v41 = vrot.slane %v1710_v36, %v3228_v37 }
 0x62f   : > { %v1735_v43 = vcombine.low %v1684_v35, %v1700_v38  ;;  %v1734_v45 = vrot.slane %v1727_v39, %v3228_v37 }
 0x630   : > { %v1718_v44 = vcombine.low %v1709_v40, %v1717_v41 }
 0x631   : > { %v1742_v47 = vrot.slane %v1735_v43, %v3228_v37 }
 0x632   : > { %v1725_v48 = vrot.slane %v1718_v44, %v3237_v46 }
 0x633   : > { %v1743_v49 = vcombine.low %v1734_v45, %v1742_v47  ;;  %v2239_v45 = vld [vmem:[%s3484_s12] ss:$0 sm:$0xff] }
 0x634   : > { %v1755_v55 = vshrl.u32 %v1725_v48, 16  ;;  %v1726_v58 = vcombine.high %v1725_v48, %v2906_v57 }
 0x635   : > { %v1750_v53 = vrot.slane %v1743_v49, %v3237_v46 }
 0x636   : > { %v1761_v37 = vshrl.u32 %v1726_v58, 16 }
 0x637   : > { %v1756_v56 = vshrl.u32 %v1750_v53, 16  ;;  %v1751_v60 = vcombine.high %v1750_v53, %v2906_v57  ;;  %v1754_v62 = vpack.i.b16 %v1750_v53, %v1725_v48 }
 0x639   : > { %v1757_v63 = vpack.i.b16 %v1756_v56, %v1755_v55  ;;  %v1760_v1 = vpack.i.b16 %v1751_v60, %v1726_v58  ;;  %v1762_v2 = vshrl.u32 %v1751_v60, 16 }
 0x63b   : > { %1764 = vrot.lane.b32.xlu1 %v1757_v63, %s2907_s18  ;;  %1766 = vrot.lane.b32.xlu0 %v1760_v1, %s2908_s30  ;;  %v1763_v3 = vpack.i.b16 %v1762_v2, %v1761_v37 }
 0x63f   : > { %1768 = vrot.lane.b32.xlu1 %v1763_v3, %s2909_s24  ;;  %s3428_s24 = scalar_lea.hbm %s3485_s13, %s2244_s15 }
 0x6ad   : > { %v1765_v4 = vpop.permute.xlu1 %1764  ;;  %v1767_v5 = vpop.permute.xlu0 %1766 }
 0x6ae   : > { %v1772_v46 = vsel %vm1184_vm2, %v1754_v62, %v1765_v4 }
 0x6af   : > { %v1775_v50 = vsel %vm1773_vm4, %v1772_v46, %v1767_v5 }
 0x6b1   : > { %v1769_v57 = vpop.permute.xlu1 %1768 }
 0x6b2   : > { %v1778_v51 = vsel %vm1776_vm5, %v1775_v50, %v1769_v57 }
 0x6b3   : > { %2336 = vmatmul.mubr.msk.bf16.vlgmr.msra.gmra.mxu1 %vm579_vm0, %v1778_v51 }
 0x6b4   : > { %2351 = vmatprep.mubr.msk.bf16.mxu1 %vm2898_vm1, %v2897_v8  ;;  %2348 = vmatpush3.bf16.msra.mxu1 %v2513_v26 }
 0x6b5   : > { %2349 = vmatprep.subr.bf16.mxu1 %v2897_v8 }
 0x6b8   : > { %2350 = vmatpush3.bf16.msra.mxu1 %v2514_v30 }
 0x773   : > { %v1838_v54 = vpop.f32.mrf.mxu1 }
 0x774   : > { %v1839_v6 = vadd.f32 %v2229_v52, %v1838_v54 }
 0x775   : > { %v2337_v28 = vpop.f32.mrf.mxu1 }
 0x776   : > { %v1844_v7 = vadd.f32 %v1839_v6, %v3201_v0  ;;  %v2512_v0 = vld [vmem:[%s3481_s9] sm:$0xff]  }
 0x777   : > { %v1841_v29 = vpop.f32.mrf.mxu1  ;;  %2342 = vmatpush3.bf16.msra.mxu0 %v2512_v0 }
 0x778   : > { %v1847_v9 = vsel %vm579_vm0, %v1844_v7, 0.0 }
 0x779   : > { %1848 = vadd.xlane.f32.xlu1 %v1847_v9  ;;  %v2338_v27 = vpop.f32.mrf.mxu1 }
 0x802   : > { %v1849_v10 = vpop.xlane.xlu1 %1848 }
 0x803   : > { %v1850_v11 = vmul.f32 0.03125, %v1849_v10 }
 0x805   : > { %v1851_v12 = vsub.f32 %v1844_v7, %v1850_v11 }
 0x807   : > { %v1852_v13 = vmul.f32 %v1851_v12, %v1851_v12 }
 0x809   : > { %v1853_v14 = vsel %vm579_vm0, %v1852_v13, 0.0 }
 0x80a   : > { %1854 = vadd.xlane.f32.xlu0 %v1853_v14 }
 0x893   : > { %v1855_v16 = vpop.xlane.xlu0 %1854 }
 0x894   : > { %v1856_v17 = vmul.f32 0.03125, %v1855_v16 }
 0x896   : > { %v1857_v18 = vadd.f32 1e-05, %v1856_v17 }
 0x898   : > { %2533 = vrsqrt.f32 %v1857_v18 }
 0x8a5   : > { %v2534_v19 = vpop.eup %2533 }
 0x8a6   : > { %v1859_v21 = vmul.f32 %v2534_v19, %v1851_v12 }
 0x8a8   : > { %v1866_v23 = vmul.f32 %v2233_v20, %v1859_v21 }
 0x8aa   : > { %v1873_v24 = vadd.f32 %v2234_v22, %v1866_v23 }
 0x8ac   : > { %v1874_v25 = vpack.c.bf16 %v1873_v24, %v1873_v24 }
 0x8ae   : > { %2344 = vmatmul.mubr.msk.bf16.vlgmr.msra.gmra.mxu0 %vm579_vm0, %v1874_v25 }
 0x96e   : > { %v1935_v59 = vpop.f32.mrf.mxu0 }
 0x96f   : > { %v1936_v61 = vadd.f32 %v2235_v31, %v1935_v59 }
 0x970   : > { %v2345_v32 = vpop.f32.mrf.mxu0 }
 0x971   : > { %v1942_v33 = vmul.f32 0.044715, %v1936_v61  ;;  %v1941_v8 = vmul.f32 0.5, %v1936_v61 }
 0x972   : > { %v1938_v34 = vpop.f32.mrf.mxu0 }
 0x973   : > { %v1943_v35 = vmul.f32 %v1942_v33, %v1936_v61 }
 0x974   : > { %v2346_v36 = vpop.f32.mrf.mxu0 }
 0x975   : > { %v1944_v38 = vmul.f32 %v1943_v35, %v1936_v61 }
 0x977   : > { %v1945_v39 = vadd.f32 %v1944_v38, %v1936_v61 }
 0x979   : > { %v1946_v40 = vmul.f32 0.7978846, %v1945_v39 }
 0x97b   : > { %2535 = vtanh.f32 %v1946_v40 }
 0x988   : > { %v2536_v41 = vpop.eup %2535 }
 0x989   : > { %v1948_v42 = vadd.f32 1.0, %v2536_v41 }
 0x98b   : > { %v1949_v43 = vmul.f32 %v1948_v42, %v1941_v8 }
 0x98d   : > { %v1950_v44 = vpack.c.bf16 %v1949_v43, %v1949_v43 }
 0x98f   : > { %2352 = vmatmul.mubr.msk.bf16.vlgmr.msra.gmra.mxu1 %vm579_vm0, %v1950_v44 }
 0xa4f   : > { %v2011_v47 = vpop.f32.mrf.mxu1 }
 0xa50   : > { %v2012_v48 = vadd.f32 %v2239_v45, %v2011_v47 }
 0xa51   : > { %v2353_v49 = vpop.f32.mrf.mxu1 }
 0xa52   : > { %v2017_v53 = vadd.f32 %v2012_v48, %v1844_v7 }
 0xa53   : > { %v2014_v55 = vpop.f32.mrf.mxu1 }
 0xa54   : > { %2018 = vst.msk [vmem:[%s574_s23] sm:$0xff] %vm579_vm0, %v2017_v53 }
 0xa55   : > { %v2354_v56 = vpop.f32.mrf.mxu1 }
 0xa56   : > { %2812 = shalt.err (!%p2809_p3)
}
 0xa57   : > { %s2813_s17 = scalar_lea.hbm %s3428_s24, 128  ;;  %s2817_s8 = scalar_lea.hbm %s3485_s13, 256 }
 0xa58   : > { %p2814_p9 = scmp.ne.s32.totalorder %s3428_s24, %s2813_s17  ;;  %p2818_p12 = scmp.lt.s32.totalorder %s3428_s24, %s3485_s13 }
 0xa59   : > { %p2819_p13 = scmp.lt.s32.totalorder %s2817_s8, %s2813_s17 }
 0xa5a   : > { %p2815_p11 = pnand %p2814_p9, %p3528_p7 }
 0xa5b   : > { %p2820_p2 = por %p2819_p13, %p2818_p12 }
 0xa5c   : > { %p2816_p10 = pneg %p2815_p11 }
 0xa5e   : > { %p2821_p4 = pnand %p2820_p2, %p2816_p10 }
 0xa60   : > { %2824 = shalt.err (!%p2821_p4)
}
 0xa61   : > { %2393 = dma.vmem_to_hbm [thread:$0]  (%p3528_p7), %s3430_s29, 128, %s3428_s24, %s2020_s14  }
 0xa62 PF: > { %s2045_s15 = sand.u32 1, %s2871_s25   ;;  %p3529_p8 = scmp.ne.s32.totalorder %s3514_s20, 0 }
 0xa63   : > { %p3530_p6 = scmp.ge.s32.totalorder %s2883_s28, 2  ;;  %s2046_s23 = scalar_lea.sflag [#allocation4], %s2045_s15 }
 0xa65   : > { %p2428_p0 = pnand %p3530_p6, %p3529_p8 }
 0xa67   : > { %p2429_p1 = pneg %p2428_p0 }
 0xa69   : > { %2866 = dma.done.wait (%p2429_p1), %s2046_s23, 128  }
 0xa6a   : > { %2868 = vsyncadd (%p2429_p1), %s2046_s23, 4294967168  ;;  %p31_p5 = scmp.ge.s32.totalorder %s3114_s21, 4   ;;  %s3531_s25 = smov %s2875_s26 }
 0xa6b   : > { %s3532_s26 = smov %s2879_s27  ;;  %s3533_s27 = smov %s3126_s3 }
 0xa6c   : > { %s3534_s28 = smov %s3114_s21  ;;  %33 = sbr.rel (!%p31_p5) target bundleno = 19 (0x13), region = 153 }
 0xa71   :  { %2051 = vsyncpa [#allocation3], 1 }
 0xa72   :  { %2053 = vsyncpa [#allocation3 + $0x1], 1 }
 0xa73   :  { %2054 = vsyncpa [#allocation6], 1 }
 0xa74   :  { %2055 = vsyncpa [#allocation9], 1 }
 0xa75   :  { %2056 = vsyncpa [#allocation12], 1 }
 0xa76   :  { %2057 = vsyncpa [#allocation15], 1 }
 0xa77   :  { %2058 = vsyncpa [#allocation18], 1 }
 0xa78   :  { %2059 = vsyncpa [#allocation4], 1 }
 0xa79   :  { %2061 = vsyncpa [#allocation4 + $0x1], 1 }

// kernel: tpu_custom_call.1
= control target key start
LH: loop header
LB: loop body
LE: loop exit
PB: predicated region body
PF: predicated region fallthrough
CT: control target
= control target key end

     0   :  { %s3472_s0 = inlined_call_operand.hbm [shape: f32[16,32], index: 0, kind: input, shape index: {}]   ;;  %s3473_s1 = inlined_call_operand.hbm [shape: f32[1,32], index: 1, kind: input, shape index: {}]   ;;  %s3474_s2 = inlined_call_operand.hbm [shape: f32[1,32], index: 2, kind: input, shape index: {}]   ;;  %s3475_s3 = inlined_call_operand.hbm [shape: bf16[32,96], index: 3, kind: input, shape index: {}]   ;;  %s3476_s4 = inlined_call_operand.hbm [shape: f32[1,96], index: 4, kind: input, shape index: {}]   ;;  %s3477_s5 = inlined_call_operand.hbm [shape: bf16[32,32], index: 5, kind: input, shape index: {}]   ;;  %s3478_s6 = inlined_call_operand.hbm [shape: f32[1,32], index: 6, kind: input, shape index: {}]   ;;  %s3479_s7 = inlined_call_operand.hbm [shape: f32[1,32], index: 7, kind: input, shape index: {}]   ;;  %s3480_s8 = inlined_call_operand.hbm [shape: f32[1,32], index: 8, kind: input, shape index: {}]   ;;  %s3481_s9 = inlined_call_operand.vmem [shape: bf16[32,32], index: 9, kind: input, shape index: {}]   ;;  %s3482_s10 = inlined_call_operand.vmem [shape: f32[1,32], index: 10, kind: input, shape index: {}]   ;;  %s3483_s11 = inlined_call_operand.hbm [shape: bf16[32,32], index: 11, kind: input, shape index: {}]   ;;  %s3484_s12 = inlined_call_operand.vmem [shape: f32[1,32], index: 12, kind: input, shape index: {}]   ;;  %s3485_s13 = inlined_call_operand.hbm [shape: f32[16,32], index: 13, kind: output, shape index: {}]  }
   0x1   :  { %3491 = sst [smem:[#allocation27_spill]] %s3473_s1 }
   0x2   :  { %3492 = sst [smem:[#allocation28_spill]] %s3474_s2 }
   0x3   :  { %3493 = sst [smem:[#allocation29_spill]] %s3475_s3 }
   0x4   :  { %3494 = sst [smem:[#allocation30_spill]] %s3476_s4 }
   0x5   :  { %3495 = sst [smem:[#allocation31_spill]] %s3477_s5 }
   0x6   :  { %3496 = sst [smem:[#allocation32_spill]] %s3478_s6 }
   0x7   :  { %3497 = sst [smem:[#allocation33_spill]] %s3479_s7 }
   0x8   :  { %3498 = sst [smem:[#allocation34_spill]] %s3480_s8 }
   0x9   :  { %18 = vsyncpa [#allocation3], 0 }
   0xa   :  { %20 = vsyncpa [#allocation3 + $0x1], 0 }
   0xb   :  { %21 = vsyncpa [#allocation6], 0 }
   0xc   :  { %22 = vsyncpa [#allocation9], 0 }
   0xd   :  { %23 = vsyncpa [#allocation12], 0 }
   0xe   :  { %24 = vsyncpa [#allocation15], 0 }
   0xf   :  { %25 = vsyncpa [#allocation18], 0 }
  0x10   :  { %26 = vsyncpa [#allocation4], 0 }
  0x11   :  { %28 = vsyncpa [#allocation4 + $0x1], 0  ;;  %s2981_s25 = smov 0   ;;  %s2983_s26 = smov 0  }
  0x12   :  { %s2985_s27 = smov 0   ;;  %s2987_s28 = smov 0  }
  0x13 LB: > { %s2885_s29 = smov [#allocation5]   ;;  %s3002_s14 = sadd.s32 4294967295, %s2883_s28   ;;  %s2883_s28 = sphi %s2987_s28, %s3534_s28   ;;  %s2879_s27 = sphi %s2985_s27, %s3533_s27   ;;  %s2875_s26 = sphi %s2983_s26, %s3532_s26   ;;  %s2871_s25 = sphi %s2981_s25, %s3531_s25  }
  0x14   : > { %s356_s30 = sshll.u32 %s2885_s29, 4  ;;  %p2190_p0 = scmp.ge.s32.totalorder %s2883_s28, 1  ;;  %s357_s30 = int_to_ptr.vmem [resolvable:$true] %s356_s30 }
  0x15   : > { %p3486_p1 = scmp.eq.s32.totalorder %s3002_s14, 0  ;;  %p343_p2 = scmp.lt.s32.totalorder %s2883_s28, 3 }
  0x16   : > { %s2886_s16 = smov [#allocation8]   ;;  %s2887_s19 = smov [#allocation11]  }
  0x17   : > { %p3007_p3 = pnand %p2190_p0, %p343_p2  ;;  %s377_s17 = sshll.u32 %s2886_s16, 4  ;;  %s3014_s17 = int_to_ptr.vmem [resolvable:$true] %s377_s17 }
  0x18   : > { %s401_s20 = sshll.u32 %s2887_s19, 4  ;;  %s2548_s22 = scalar_lea.vmem %s357_s30, 16  ;;  %s3022_s20 = int_to_ptr.vmem [resolvable:$true] %s401_s20 }
  0x19   : > { %s3499_s15 = scalar_select %p3007_p3, 1, 0 }
  0x1a   : > { %p2395_p5 = pneg %p3007_p3  ;;  %p2549_p8 = scmp.ne.s32.totalorder %s357_s30, %s2548_s22 }
  0x1b   : > { %s2555_s23 = scalar_lea.vmem %s357_s30, 32  ;;  %p2556_p11 = scmp.lt.s32.totalorder %s357_s30, %s357_s30 }
  0x1c   : > { %p3018_p6 = pnand %p2395_p5, %p3486_p1  ;;  %p2557_p12 = scmp.lt.s32.totalorder %s2555_s23, %s2548_s22 }
  0x1e   : > { %p3026_p7 = pneg %p3018_p6  ;;  %p2558_p13 = por %p2557_p12, %p2556_p11 }
  0x20   : > { %p2551_p9 = pnand %p2549_p8, %p3026_p7 }
  0x22   : > { %p2552_p10 = pneg %p2551_p9 }
  0x24   : > { %p2559_p0 = pnand %p2558_p13, %p2552_p10 }
  0x26   : > { %2562 = shalt.err (!%p2559_p0)
}
  0x27   : > { %s3502_s1 = sld [smem:[#allocation27_spill]]  ;;  %s2574_s16 = scalar_lea.vmem %s3014_s17, 256 }
  0x28   : > { %p2575_p2 = scmp.ne.s32.totalorder %s3014_s17, %s2574_s16  ;;  %p2582_p9 = scmp.lt.s32.totalorder %s3014_s17, %s3014_s17 }
  0x29   : > { %p2583_p11 = scmp.lt.s32.totalorder %s2574_s16, %s2574_s16 }
  0x2a   : > { %p2577_p5 = pnand %p2575_p2, %p3026_p7 }
  0x2b   : > { %p2584_p10 = por %p2583_p11, %p2582_p9 }
  0x2c   : > { %p2578_p8 = pneg %p2577_p5 }
  0x2d   : > { %2398 = dma.hbm_to_vmem [thread:$0]  (!%p3018_p6), %s3502_s1, 16, %s357_s30, [#allocation6]  }
  0x2e   : > { %p2585_p12 = pnand %p2584_p10, %p2578_p8 }
  0x30   : > { %2588 = shalt.err (!%p2585_p12)
}
  0x31   : > { %s3487_s19 = smov 64   ;;  %s2889_s22 = smov 4  }
  0x32   : > { %s3503_s3 = sld [smem:[#allocation29_spill]]  ;;  %s2600_s24 = scalar_lea.vmem %s3022_s20, 256 }
  0x33   : > { %p2601_p13 = scmp.ne.s32.totalorder %s3022_s20, %s2600_s24  ;;  %p2608_p5 = scmp.lt.s32.totalorder %s3022_s20, %s3022_s20 }
  0x34   : > { %p2609_p8 = scmp.lt.s32.totalorder %s2600_s24, %s2600_s24 }
  0x35   : > { %p2603_p0 = pnand %p2601_p13, %p3026_p7 }
  0x36   : > { %p2610_p9 = por %p2609_p8, %p2608_p5 }
  0x37   : > { %p2604_p2 = pneg %p2603_p0 }
  0x38   : > { %2404 = dma.hbm_to_vmem [thread:$0]  (!%p3018_p6), %s3503_s3, 256, %s3014_s17, [#allocation9], %s3487_s19, %s3487_s19, %s2889_s22  }
  0x39   : > { %p2611_p11 = pnand %p2610_p9, %p2604_p2 }
  0x3b   : > { %2614 = shalt.err (!%p2611_p11)
}
  0x3c   : > { %s3504_s5 = sld [smem:[#allocation31_spill]]  ;;  %s2890_s17 = smov [#allocation14]  }
  0x3d   : > { %s426_s30 = sshll.u32 %s2890_s17, 4  ;;  %s2891_s23 = smov [#allocation7]   ;;  %s427_s30 = int_to_ptr.vmem [resolvable:$true] %s426_s30 }
  0x3e   : > { %s367_s1 = sshll.u32 %s2891_s23, 4  ;;  %s2626_s24 = scalar_lea.vmem %s427_s30, 16  ;;  %s368_s1 = int_to_ptr.vmem [resolvable:$true] %s367_s1 }
  0x3f   : > { %p2627_p10 = scmp.ne.s32.totalorder %s427_s30, %s2626_s24  ;;  %s2633_s3 = scalar_lea.vmem %s427_s30, 32 }
  0x40   : > { %p2634_p0 = scmp.lt.s32.totalorder %s427_s30, %s427_s30  ;;  %p2635_p2 = scmp.lt.s32.totalorder %s2633_s3, %s2626_s24 }
  0x41   : > { %p2629_p12 = pnand %p2627_p10, %p3026_p7 }
  0x42   : > { %2410 = dma.hbm_to_vmem [thread:$0]  (!%p3018_p6), %s3504_s5, 256, %s3022_s20, [#allocation12], %s3487_s19, %s3487_s19, %s2889_s22  }
  0x43   : > { %p2630_p13 = pneg %p2629_p12  ;;  %p2636_p5 = por %p2635_p2, %p2634_p0 }
  0x45   : > { %p2637_p8 = pnand %p2636_p5, %p2630_p13 }
  0x47   : > { %2640 = shalt.err (!%p2637_p8)
}
  0x48   : > { %s3505_s7 = sld [smem:[#allocation33_spill]]  ;;  %s2652_s16 = scalar_lea.vmem %s368_s1, 16 }
  0x49   : > { %p2653_p9 = scmp.ne.s32.totalorder %s368_s1, %s2652_s16  ;;  %s2659_s17 = scalar_lea.vmem %s368_s1, 32 }
  0x4a   : > { %p2660_p12 = scmp.lt.s32.totalorder %s368_s1, %s368_s1  ;;  %p2661_p4 = scmp.lt.s32.totalorder %s2659_s17, %s2652_s16 }
  0x4b   : > { %p2655_p11 = pnand %p2653_p9, %p3026_p7 }
  0x4c   : > { %p2662_p1 = por %p2661_p4, %p2660_p12 }
  0x4d   : > { %p2656_p10 = pneg %p2655_p11 }
  0x4e   : > { %2416 = dma.hbm_to_vmem [thread:$0]  (!%p3018_p6), %s3505_s7, 16, %s427_s30, [#allocation15]  }
  0x4f   : > { %p2663_p0 = pnand %p2662_p1, %p2656_p10 }
  0x51   : > { %2666 = shalt.err (!%p2663_p0)
}
  0x52   : > { %s3506_s2 = sld [smem:[#allocation28_spill]]  ;;  %s2892_s30 = smov [#allocation10]  }
  0x53   : > { %s391_s24 = sshll.u32 %s2892_s30, 4  ;;  %s2893_s29 = smov [#allocation13]   ;;  %s392_s24 = int_to_ptr.vmem [resolvable:$true] %s391_s24 }
  0x54   : > { %s415_s20 = sshll.u32 %s2893_s29, 4  ;;  %s2678_s19 = scalar_lea.vmem %s392_s24, 16  ;;  %s416_s20 = int_to_ptr.vmem [resolvable:$true] %s415_s20 }
  0x55   : > { %p2679_p13 = scmp.ne.s32.totalorder %s392_s24, %s2678_s19  ;;  %s2685_s16 = scalar_lea.vmem %s392_s24, 32 }
  0x56   : > { %p2686_p1 = scmp.lt.s32.totalorder %s392_s24, %s392_s24  ;;  %p2687_p4 = scmp.lt.s32.totalorder %s2685_s16, %s2678_s19 }
  0x57   : > { %p2681_p2 = pnand %p2679_p13, %p3026_p7 }
  0x58   : > { %2401 = dma.hbm_to_vmem [thread:$0]  (!%p3018_p6), %s3506_s2, 16, %s368_s1, [#allocation6]  }
  0x59   : > { %p2682_p5 = pneg %p2681_p2  ;;  %p2688_p8 = por %p2687_p4, %p2686_p1 }
  0x5b   : > { %p2689_p9 = pnand %p2688_p8, %p2682_p5 }
  0x5d   : > { %2692 = shalt.err (!%p2689_p9)
}
  0x5e   : > { %s3507_s4 = sld [smem:[#allocation30_spill]]  ;;  %s2704_s3 = scalar_lea.vmem %s416_s20, 16 }
  0x5f   : > { %p2705_p11 = scmp.ne.s32.totalorder %s416_s20, %s2704_s3  ;;  %s2711_s23 = scalar_lea.vmem %s416_s20, 32 }
  0x60   : > { %p2712_p0 = scmp.lt.s32.totalorder %s416_s20, %s416_s20  ;;  %p2713_p13 = scmp.lt.s32.totalorder %s2711_s23, %s2704_s3 }
  0x61   : > { %p2707_p10 = pnand %p2705_p11, %p3026_p7 }
  0x62   : > { %p2714_p2 = por %p2713_p13, %p2712_p0 }
  0x63   : > { %p2708_p12 = pneg %p2707_p10 }
  0x64   : > { %2407 = dma.hbm_to_vmem [thread:$0]  (!%p3018_p6), %s3507_s4, 16, %s392_s24, [#allocation9]  }
  0x65   : > { %p2715_p1 = pnand %p2714_p2, %p2708_p12 }
  0x67   : > { %2718 = shalt.err (!%p2715_p1)
}
  0x68   : > { %s3508_s6 = sld [smem:[#allocation32_spill]]  ;;  %s2894_s24 = smov [#allocation16]  }
  0x69   : > { %s437_s29 = sshll.u32 %s2894_s24, 4  ;;  %s2895_s16 = smov [#allocation17]   ;;  %s438_s29 = int_to_ptr.vmem [resolvable:$true] %s437_s29 }
  0x6a   : > { %s453_s17 = sshll.u32 %s2895_s16, 4  ;;  %s2730_s1 = scalar_lea.vmem %s438_s29, 16  ;;  %s454_s17 = int_to_ptr.vmem [resolvable:$true] %s453_s17 }
  0x6b   : > { %p2731_p5 = scmp.ne.s32.totalorder %s438_s29, %s2730_s1  ;;  %s2737_s3 = scalar_lea.vmem %s438_s29, 32 }
  0x6c   : > { %p2738_p9 = scmp.lt.s32.totalorder %s438_s29, %s438_s29  ;;  %p2739_p11 = scmp.lt.s32.totalorder %s2737_s3, %s2730_s1 }
  0x6d   : > { %p2733_p4 = pnand %p2731_p5, %p3026_p7 }
  0x6e   : > { %2413 = dma.hbm_to_vmem [thread:$0]  (!%p3018_p6), %s3508_s6, 16, %s416_s20, [#allocation12]  }
  0x6f   : > { %p2734_p8 = pneg %p2733_p4  ;;  %p2740_p10 = por %p2739_p11, %p2738_p9 }
  0x71   : > { %p2741_p12 = pnand %p2740_p10, %p2734_p8 }
  0x73   : > { %2744 = shalt.err (!%p2741_p12)
}
  0x74   : > { %s3509_s8 = sld [smem:[#allocation34_spill]]  ;;  %s2756_s19 = scalar_lea.vmem %s454_s17, 256 }
  0x75   : > { %p2757_p0 = scmp.ne.s32.totalorder %s454_s17, %s2756_s19  ;;  %p2764_p1 = scmp.lt.s32.totalorder %s454_s17, %s454_s17 }
  0x76   : > { %p2765_p5 = scmp.lt.s32.totalorder %s2756_s19, %s2756_s19 }
  0x77   : > { %p2759_p13 = pnand %p2757_p0, %p3026_p7 }
  0x78   : > { %p2766_p4 = por %p2765_p5, %p2764_p1 }
  0x79   : > { %p2760_p2 = pneg %p2759_p13 }
  0x7a   : > { %2419 = dma.hbm_to_vmem [thread:$0]  (!%p3018_p6), %s3509_s8, 16, %s438_s29, [#allocation15]  }
  0x7b   : > { %p2767_p3 = pnand %p2766_p4, %p2760_p2 }
  0x7d   : > { %2770 = shalt.err (!%p2767_p3)
}
  0x7e   : > { %s3510_s30 = smov 64   ;;  %s2189_s18 = sadd.s32 4294967294, %s2883_s28  }
  0x7f   : > { %2422 = dma.hbm_to_vmem [thread:$0]  (!%p3018_p6), %s3483_s11, 256, %s454_s17, [#allocation18], %s3510_s30, %s3510_s30, %s2889_s22  }
  0x80   : > { %s3114_s21 = sadd.s32 1, %s2883_s28   ;;  %s41_s29 = sadd.s32 1, %s2879_s27 }
  0x81   : > { %s38_s1 = ssub.s32 %s2883_s28, %s3114_s21  ;;  %p48_p3 = scmp.ne.s32.totalorder %s2879_s27, %s2875_s26 }
  0x82   : > { %p39_p7 = scmp.eq.s32.totalorder %s38_s1, 0  ;;  %p49_p8 = scmp.eq.s32.totalorder %s2883_s28, 0 }
  0x83   : > { %p54_p9 = scmp.ne.s32.totalorder %s2875_s26, %s2871_s25  ;;  %p330_p11 = scmp.eq.s32.totalorder %s3002_s14, 1 }
  0x84   : > { %s3126_s3 = scalar_select %p39_p7, %s2879_s27, %s41_s29  }
  0x85   : > { %p50_p10 = por %p49_p8, %p48_p3  ;;  %p3511_p12 = scmp.eq.s32.totalorder %s3002_s14, 0 }
  0x86   : > { %p3134_p6 = por %p330_p11, %p48_p3  ;;  %p336_p13 = scmp.eq.s32.totalorder %s2189_s18, 1 }
  0x87   : > { %p3130_p0 = por %p3511_p12, %p54_p9  ;;  %p2440_p2 = scmp.lt.s32.totalorder %s2883_s28, 2 }
  0x88   : > { %s3513_s22 = scalar_select %p3134_p6, 1, 0 }
  0x89   : > { %s3512_s23 = scalar_select %p3130_p0, 1, 0 }
  0x8a   : > { %s470_s17 = sand.u32 1, %s2879_s27   ;;  %p3140_p1 = por %p336_p13, %p54_p9 }
  0x8b   : > { %s2201_s19 = sshll.u32 %s470_s17, 3  ;;  %s2202_s30 = sshll.u32 %s2883_s28, 7 }
  0x8c   : > { %s3514_s20 = scalar_select %p3140_p1, 1, 0 }
  0x8d   : > { %s3148_s29 = scalar_lea.hbm %s3472_s0, %s2202_s30  ;;  %s474_s1 = scalar_lea.vmem [#allocation2], %s2201_s19 }
  0x8e   : > { %s481_s2 = sshll.u32 %s474_s1, 4  ;;  %p3150_p5 = pnand %p2440_p2, %p50_p10  ;;  %s482_s2 = int_to_ptr.vmem [resolvable:$true] %s481_s2 }
  0x8f   : > { %s471_s4 = scalar_lea.sflag [#allocation3], %s470_s17  ;;  %s2771_s5 = scalar_lea.hbm %s3148_s29, 128 }
  0x90   : > { %p2772_p4 = scmp.ne.s32.totalorder %s3148_s29, %s2771_s5  ;;  %p2773_p3 = pneg %p3150_p5 }
  0x91   : > { %s2776_s16 = scalar_lea.hbm %s3472_s0, 256  ;;  %p2777_p9 = scmp.lt.s32.totalorder %s3148_s29, %s3472_s0 }
  0x92   : > { %p2774_p7 = pnand %p2773_p3, %p2772_p4  ;;  %p2778_p11 = scmp.lt.s32.totalorder %s2776_s16, %s2771_s5 }
  0x94   : > { %p2775_p8 = pneg %p2774_p7  ;;  %p2779_p10 = por %p2778_p11, %p2777_p9 }
  0x96   : > { %p2780_p12 = pnand %p2779_p10, %p2775_p8 }
  0x98   : > { %2783 = shalt.err (!%p2780_p12)
}
  0x99   : > { %s2784_s1 = scalar_lea.vmem %s482_s2, 128  ;;  %s2896_s17 = smov [#allocation2]  }
  0x9a   : > { %p2785_p13 = scmp.ne.s32.totalorder %s482_s2, %s2784_s1  ;;  %s2789_s7 = sshll.u32 %s2896_s17, 4  ;;  %s2790_s7 = int_to_ptr.vmem [resolvable:$false] %s2789_s7 }
  0x9b   : > { %s2791_s8 = scalar_lea.vmem %s2790_s7, 256  ;;  %p2792_p4 = scmp.lt.s32.totalorder %s482_s2, %s2790_s7 }
  0x9c   : > { %p2787_p2 = pnand %p2785_p13, %p2773_p3  ;;  %p2793_p7 = scmp.lt.s32.totalorder %s2791_s8, %s2784_s1 }
  0x9e   : > { %p2788_p1 = pneg %p2787_p2  ;;  %p2794_p6 = por %p2793_p7, %p2792_p4 }
  0xa0   : > { %p2795_p0 = pnand %p2794_p6, %p2788_p1 }
  0xa2   : > { %2798 = shalt.err (!%p2795_p0)
}
  0xa3   : > { %2426 = dma.hbm_to_vmem [thread:$0]  (!%p3150_p5), %s3148_s29, 128, %s482_s2, %s471_s4  }
  0xa4   : > { %p3516_p8 = scmp.ne.s32.totalorder %s3499_s15, 0 }
  0xa5   : > { %s3171_s5 = sand.u32 (!%p3516_p8), 1, %s2875_s26   ;;  %p3517_p6 = scmp.ne.s32.totalorder (!%p3516_p8), %s3512_s23, 0 }
  0xa6   : > { %490 = sbr.rel (%p3516_p8) target bundleno = 2658 (0xa62), region = 72  ;;  %s2204_s6 = sshll.u32 (!%p3516_p8), %s3171_s5, 3 }
  0xa7   : > { %s493_s7 = scalar_lea.sflag (!%p3516_p8), [#allocation3], %s3171_s5  ;;  %s496_s8 = scalar_lea.vmem (!%p3516_p8), [#allocation2], %s2204_s6 }
  0xab   : > { %2842 = dma.done.wait (%p3517_p6), %s493_s7, 128  }
  0xac   : > { %2844 = vsyncadd (%p3517_p6), %s493_s7, 4294967168  ;;  %p3518_p0 = scmp.eq.s32.totalorder %s3002_s14, 0 }
  0xae   : > { %2846 = dma.done.wait (%p3518_p0), [#allocation6], 32   ;;  %p3519_p1 = pmov %p3518_p0 }
  0xaf   : > { %p3520_p5 = pmov %p3518_p0 }
  0xb0   : > { %2848 = vsyncadd (%p3519_p1), [#allocation6], 4294967264 }
  0xb1   : > { %2850 = dma.done.wait (%p3520_p5), [#allocation9], 272   ;;  %p3521_p3 = pmov %p3518_p0 }
  0xb2   : > { %p3522_p9 = pmov %p3518_p0 }
  0xb3   : > { %2852 = vsyncadd (%p3521_p3), [#allocation9], 4294967024 }
  0xb4   : > { %2854 = dma.done.wait (%p3522_p9), [#allocation12], 272   ;;  %p3523_p11 = pmov %p3518_p0 }
  0xb5   : > { %p3524_p10 = pmov %p3518_p0 }
  0xb6   : > { %2856 = vsyncadd (%p3523_p11), [#allocation12], 4294967024 }
  0xb7   : > { %2858 = dma.done.wait (%p3524_p10), [#allocation15], 32   ;;  %p3525_p12 = pmov %p3518_p0 }
  0xb8   : > { %p3526_p13 = pmov %p3518_p0 }
  0xb9   : > { %2860 = vsyncadd (%p3525_p12), [#allocation15], 4294967264 }
  0xba   : > { %2862 = dma.done.wait (%p3526_p13), [#allocation18], 256   ;;  %p3527_p2 = pmov %p3518_p0 }
  0xbb   : > { %vm579_vm0 = vcmask 261120   ;;  %v3201_v0 = vld [vmem:[%s496_s8] sm:$0xff]  ;;  %v2897_v8 = vmov 0.0   ;;  %vm2898_vm1 = vmmov 0   ;;  %v2508_v9 = vld [vmem:[#allocation8] sm:$0xff]   ;;  %s2899_s2 = smov 104   ;;  %v686_v32 = vlaneseq }
  0xbc   : > { %2864 = vsyncadd (%p3527_p2), [#allocation18], 4294967040  ;;  %v580_v1 = vsel %vm579_vm0, %v3201_v0, 0.0  ;;  %v2507_v7 = vld [vmem:[#allocation8 + $0x8] sm:$0xff]   ;;  %2275 = vmatprep.subr.bf16.mxu0 %v2897_v8  ;;  %2279 = vmatprep.mubr.msk.bf16.mxu0 %vm2898_vm1, %v2897_v8  ;;  %v2215_v14 = vld [vmem:[#allocation5] ss:$0 sm:$0xff] }
  0xbd   : > { %581 = vadd.xlane.f32.xlu0 %v580_v1  ;;  %2276 = vmatpush3.bf16.msra.mxu0 %v2507_v7  ;;  %v2216_v16 = vld [vmem:[#allocation7] ss:$0 sm:$0xff]  ;;  %v2217_v20 = vld [vmem:[#allocation10] ss:$0 sm:$0xff]  ;;  %s2900_s4 = smov 120   ;;  %s2901_s15 = smov 112  }
  0xbe   : > { %2283 = vmatprep.subr.bf16.mxu1 %v2897_v8  ;;  %2277 = vmatprep.subr.bf16.mxu0 %v2897_v8  ;;  %s2902_s23 = smov 96   ;;  %s2903_s29 = smov 64   ;;  %v2904_v30 = vmov 1983009808   ;;  %v687_v34 = vshrl.u32 %v686_v32, 7  ;;  %v2906_v57 = vmov 0  }
  0xbf   : > { %2285 = vmatprep.mubr.msk.bf16.mxu1 %vm2898_vm1, %v2897_v8  ;;  %v684_v31 = vunpack.c.l.s4 %v2904_v30  ;;  %v2905_v35 = vmov 1934713408   ;;  %vm1184_vm2 = vcmask 64512   ;;  %vm1412_vm3 = vcmask 1043456   ;;  %s2907_s18 = smov 8   ;;  %s2908_s30 = smov 16  }
  0xc0   : > { %v701_v36 = vunpack.c.l.s4 %v2905_v35  ;;  %s2909_s24 = smov 24   ;;  %vm1773_vm4 = vcmask 130048   ;;  %vm1776_vm5 = vcmask 195584   ;;  %p3528_p7 = scmp.ne.s32.totalorder %s3513_s22, 0 }
  0xc1   : > { %2278 = vmatpush3.bf16.msra.mxu0 %v2508_v9  ;;  %v685_v33 = vunpack.c.0.s8 %v684_v31  ;;  %s2910_s16 = smov [#allocation19]  }
  0xc2   : > { %2289 = vmatprep.subr.bf16.mxu0 %v2897_v8  ;;  %v702_v40 = vunpack.c.0.s8 %v701_v36  ;;  %s2803_s19 = sshll.u32 %s2910_s16, 4  ;;  %s2804_s19 = int_to_ptr.vmem [resolvable:$false] %s2803_s19 }
  0xc3   : > { %v3228_v37 = vsub.s32 %v685_v33, %v687_v34  ;;  %s2805_s1 = scalar_lea.vmem %s2804_s19, 256 }
  0xc4   : > { %v3237_v46 = vsub.s32 %v702_v40, %v687_v34 }
 0x146   : > { %v582_v2 = vpop.xlane.xlu0 %581 }
 0x147   : > { %v584_v3 = vmul.f32 0.03125, %v582_v2 }
 0x149   : > { %v585_v4 = vsub.f32 %v3201_v0, %v584_v3 }
 0x14b   : > { %v586_v5 = vmul.f32 %v585_v4, %v585_v4 }
 0x14d   : > { %v587_v6 = vsel %vm579_vm0, %v586_v5, 0.0 }
 0x14e   : > { %588 = vadd.xlane.f32.xlu0 %v587_v6 }
 0x1d7   : > { %v589_v10 = vpop.xlane.xlu0 %588 }
 0x1d8   : > { %v590_v11 = vmul.f32 0.03125, %v589_v10 }
 0x1da   : > { %v591_v12 = vadd.f32 1e-05, %v590_v11 }
 0x1dc   : > { %2515 = vrsqrt.f32 %v591_v12 }
 0x1e9   : > { %v2516_v13 = vpop.eup %2515 }
 0x1ea   : > { %v593_v15 = vmul.f32 %v2516_v13, %v585_v4 }
 0x1ec   : > { %v600_v17 = vmul.f32 %v2215_v14, %v593_v15 }
 0x1ee   : > { %v607_v18 = vadd.f32 %v2216_v16, %v600_v17 }
 0x1f0   : > { %v608_v19 = vpack.c.bf16 %v607_v18, %v607_v18 }
 0x1f2   : > { %2280 = vmatmul.mubr.msk.bf16.vlgmr.msra.gmra.mxu0 %vm579_vm0, %v608_v19 }
 0x1f3   : > { %2291 = vmatprep.mubr.msk.bf16.mxu0 %vm2898_vm1, %v2897_v8 }
 0x2b2   : > { %v669_v21 = vpop.f32.mrf.mxu0 }
 0x2b3   : > { %v670_v22 = vadd.f32 %v2217_v20, %v669_v21 }
 0x2b4   : > { %v2281_v23 = vpop.f32.mrf.mxu0 }
 0x2b5   : > { %v675_v24 = vpack.c.bf16 %v670_v22, %v670_v22 }
 0x2b6   : > { %v672_v25 = vpop.f32.mrf.mxu0 }
 0x2b7   : > { %681 = vrot.lane.b32.xlu0 %v675_v24, %s2899_s2  ;;  %677 = vrot.lane.b32.xlu1 %v675_v24, %s2900_s4  ;;  %v689_v43 = vrot.slane %v675_v24, %v3228_v37 }
 0x2b8   : > { %v2282_v26 = vpop.f32.mrf.mxu0 }
 0x2bb   : > { %679 = vrot.lane.b32.xlu1 %v675_v24, %s2901_s15  ;;  %s2244_s15 = sshll.u32 %s3002_s14, 7  ;;  %s2020_s14 = scalar_lea.sflag [#allocation4], %s3171_s5 }
 0x2bf   : > { %844 = vrot.lane.b32.xlu1 %v675_v24, %s2902_s23 }
 0x329   : > { %v3218_v27 = vpop.permute.xlu1 %677  ;;  %v3224_v29 = vpop.permute.xlu0 %681 }
 0x32a   : > { %846 = vrot.lane.b32.xlu1 %v3218_v27, %s2902_s23  ;;  %v731_v39 = vrot.slane %v3224_v29, %v3228_v37  ;;  %v723_v41 = vrot.slane %v3218_v27, %v3228_v37 }
 0x32c   : > { %v732_v47 = vcombine.low %v723_v41, %v731_v39  ;;  %v733_v49 = vcombine.high %v723_v41, %v731_v39 }
 0x32d   : > { %v3221_v28 = vpop.permute.xlu1 %679 }
 0x32e   : > { %848 = vrot.lane.b32.xlu1 %v3221_v28, %s2902_s23  ;;  %v697_v38 = vrot.slane %v3221_v28, %v3228_v37  ;;  %v3246_v52 = vrot.slane %v732_v47, %v3237_v46  ;;  %v3249_v54 = vrot.slane %v733_v49, %v3237_v46 }
 0x330   : > { %v698_v44 = vcombine.low %v689_v43, %v697_v38  ;;  %v699_v45 = vcombine.high %v689_v43, %v697_v38  ;;  %v748_v62 = vcombine.high %v3246_v52, %v2906_v57  ;;  %v749_v1 = vcombine.high %v3249_v54, %v2906_v57 }
 0x331   : > { %v845_v42 = vpop.permute.xlu1 %844  ;;  %v755_v7 = vshrl.u32 %v3246_v52, 16  ;;  %v771_v13 = vshrl.u32 %v3249_v54, 16 }
 0x332   : > { %850 = vrot.lane.b32.xlu1 %v3224_v29, %s2902_s23  ;;  %v3240_v50 = vrot.slane %v698_v44, %v3237_v46  ;;  %v3243_v51 = vrot.slane %v699_v45, %v3237_v46  ;;  %v859_v55 = vrot.slane %v845_v42, %v3228_v37  ;;  %v763_v12 = vshrl.u32 %v748_v62, 16  ;;  %s574_s23 = scalar_lea.vmem [#allocation19], %s2204_s6 }
 0x333   : > { %v779_v16 = vshrl.u32 %v749_v1, 16 }
 0x334   : > { %v714_v58 = vcombine.high %v3240_v50, %v2906_v57  ;;  %v715_v59 = vcombine.high %v3243_v51, %v2906_v57  ;;  %v754_v2 = vshrl.u32 %v3240_v50, 16  ;;  %v770_v5 = vshrl.u32 %v3243_v51, 16 }
 0x335   : > { %v752_v49 = vpack.i.b16 %v3246_v52, %v3240_v50 }
 0x336   : > { %1014 = vrot.lane.b32.xlu1 %v675_v24, %s2903_s29  ;;  %v762_v9 = vshrl.u32 %v714_v58, 16  ;;  %v778_v10 = vshrl.u32 %v715_v59, 16  ;;  %v756_v17 = vpack.i.b16 %v755_v7, %v754_v2  ;;  %v760_v18 = vpack.i.b16 %v748_v62, %v714_v58 }
 0x337   : > { %v772_v20 = vpack.i.b16 %v771_v13, %v770_v5  ;;  %v776_v21 = vpack.i.b16 %v749_v1, %v715_v59 }
 0x338   : > { %v764_v24 = vpack.i.b16 %v763_v12, %v762_v9  ;;  %v780_v25 = vpack.i.b16 %v779_v16, %v778_v10 }
 0x339   : > { %v807_v1 = vcombine.low %v756_v17, %v772_v20 }
 0x33b   : > { %v814_v7 = vrot.slane %v807_v1, %v3228_v37 }
 0x39c   : > { %v847_v48 = vpop.permute.xlu1 %846 }
 0x39d   : > { %v893_v6 = vrot.slane %v847_v48, %v3228_v37 }
 0x3a0   : > { %v849_v53 = vpop.permute.xlu1 %848 }
 0x3a1   : > { %v867_v56 = vrot.slane %v849_v53, %v3228_v37  ;;  %v768_v53 = vpack.i.b16 %v3249_v54, %v3243_v51 }
 0x3a3   : > { %v868_v60 = vcombine.low %v859_v55, %v867_v56  ;;  %v869_v61 = vcombine.high %v859_v55, %v867_v56 }
 0x3a4   : > { %v851_v63 = vpop.permute.xlu1 %850 }
 0x3a5   : > { %v876_v3 = vrot.slane %v868_v60, %v3237_v46  ;;  %v901_v4 = vrot.slane %v851_v63, %v3228_v37  ;;  %v883_v11 = vrot.slane %v869_v61, %v3237_v46  ;;  %v815_v60 = vcombine.low %v764_v24, %v780_v25 }
 0x3a6   : > { %v790_v61 = vcombine.low %v760_v18, %v776_v21 }
 0x3a7   : > { %v902_v14 = vcombine.low %v893_v6, %v901_v4  ;;  %v903_v15 = vcombine.high %v893_v6, %v901_v4  ;;  %v884_v19 = vcombine.high %v876_v3, %v2906_v57  ;;  %v885_v26 = vcombine.high %v883_v11, %v2906_v57 }
 0x3a8   : > { %v924_v30 = vshrl.u32 %v876_v3, 16  ;;  %v940_v36 = vshrl.u32 %v883_v11, 16  ;;  %v822_v51 = vrot.slane %v815_v60, %v3228_v37  ;;  %v797_v52 = vrot.slane %v790_v61, %v3228_v37 }
 0x3a9   : > { %v910_v22 = vrot.slane %v902_v14, %v3237_v46  ;;  %v917_v23 = vrot.slane %v903_v15, %v3237_v46  ;;  %v932_v35 = vshrl.u32 %v884_v19, 16  ;;  %v948_v44 = vshrl.u32 %v885_v26, 16 }
 0x3ab   : > { %v918_v31 = vcombine.high %v910_v22, %v2906_v57  ;;  %v919_v32 = vcombine.high %v917_v23, %v2906_v57  ;;  %v922_v33 = vpack.i.b16 %v910_v22, %v876_v3  ;;  %v925_v34 = vshrl.u32 %v910_v22, 16 }
 0x3ac   : > { %v938_v38 = vpack.i.b16 %v917_v23, %v883_v11  ;;  %v941_v39 = vshrl.u32 %v917_v23, 16  ;;  %v782_v3 = vcombine.low %v752_v49, %v768_v53  ;;  %v823_v11 = vcombine.low %v814_v7, %v822_v51 }
 0x3ad   : > { %v926_v40 = vpack.i.b16 %v925_v34, %v924_v30  ;;  %v930_v41 = vpack.i.b16 %v918_v31, %v884_v19  ;;  %v933_v42 = vshrl.u32 %v918_v31, 16  ;;  %v946_v43 = vpack.i.b16 %v919_v32, %v885_v26 }
 0x3ae   : > { %v942_v45 = vpack.i.b16 %v941_v39, %v940_v36  ;;  %v949_v47 = vshrl.u32 %v919_v32, 16  ;;  %v952_v48 = vcombine.low %v922_v33, %v938_v38  ;;  %v789_v9 = vrot.slane %v782_v3, %v3228_v37 }
 0x3af   : > { %v934_v55 = vpack.i.b16 %v933_v42, %v932_v35  ;;  %v960_v56 = vcombine.low %v930_v41, %v946_v43  ;;  %v830_v19 = vrot.slane %v823_v11, %v3237_v46 }
 0x3b0   : > { %v950_v58 = vpack.i.b16 %v949_v47, %v948_v44  ;;  %v977_v59 = vcombine.low %v926_v40, %v942_v45  ;;  %v959_v62 = vrot.slane %v952_v48, %v3228_v37  ;;  %v798_v12 = vcombine.low %v789_v9, %v797_v52 }
 0x3b1   : > { %v967_v63 = vrot.slane %v960_v56, %v3228_v37  ;;  %v836_v25 = vshrl.u32 %v830_v19, 16  ;;  %v831_v35 = vcombine.high %v830_v19, %v2906_v57 }
 0x3b2   : > { %v985_v2 = vcombine.low %v934_v55, %v950_v58  ;;  %v984_v5 = vrot.slane %v977_v59, %v3228_v37  ;;  %v805_v22 = vrot.slane %v798_v12, %v3237_v46 }
 0x3b3   : > { %v968_v4 = vcombine.low %v959_v62, %v967_v63  ;;  %v842_v39 = vshrl.u32 %v831_v35, 16 }
 0x3b4   : > { %v992_v50 = vrot.slane %v985_v2, %v3228_v37  ;;  %v834_v30 = vpack.i.b16 %v830_v19, %v805_v22  ;;  %v835_v31 = vshrl.u32 %v805_v22, 16  ;;  %v806_v38 = vcombine.high %v805_v22, %v2906_v57 }
 0x3b5   : > { %v975_v54 = vrot.slane %v968_v4, %v3237_v46 }
 0x3b6   : > { %v993_v6 = vcombine.low %v984_v5, %v992_v50  ;;  %v837_v34 = vpack.i.b16 %v836_v25, %v835_v31  ;;  %v840_v40 = vpack.i.b16 %v831_v35, %v806_v38  ;;  %v841_v41 = vshrl.u32 %v806_v38, 16  ;;  %v1015_v50 = vpop.permute.xlu1 %1014 }
 0x3b7   : > { %v1005_v14 = vshrl.u32 %v975_v54, 16  ;;  %v976_v20 = vcombine.high %v975_v54, %v2906_v57 }
 0x3b8   : > { %v1000_v10 = vrot.slane %v993_v6, %v3237_v46  ;;  %v843_v42 = vpack.i.b16 %v842_v39, %v841_v41 }
 0x3b9   : > { %v1011_v26 = vshrl.u32 %v976_v20, 16 }
 0x3ba   : > { %v1004_v13 = vpack.i.b16 %v1000_v10, %v975_v54  ;;  %v1006_v15 = vshrl.u32 %v1000_v10, 16  ;;  %v1001_v16 = vcombine.high %v1000_v10, %v2906_v57 }
 0x3bc   : > { %v1189_v17 = vsel %vm1184_vm2, %v1004_v13, 0  ;;  %v1007_v18 = vpack.i.b16 %v1006_v15, %v1005_v14  ;;  %v1012_v23 = vshrl.u32 %v1001_v16, 16  ;;  %v1010_v24 = vpack.i.b16 %v1001_v16, %v976_v20 }
 0x3bd   : > { %2284 = vmatpush3.bf16.xpose.msra.mxu1 %v1189_v17 }
 0x3be   : > { %v1235_v21 = vsel %vm1184_vm2, %v1007_v18, 0  ;;  %2295 = vmatprep.subr.bf16.mxu1 %v2897_v8  ;;  %v1013_v32 = vpack.i.b16 %v1012_v23, %v1011_v26  ;;  %v1281_v33 = vsel %vm1184_vm2, %v1010_v24, 0 }
 0x3bf   : > { %2290 = vmatpush3.bf16.xpose.msra.mxu0 %v1235_v21 }
 0x3c0   : > { %2301 = vmatprep.subr.bf16.mxu0 %v2897_v8  ;;  %v1327_v36 = vsel %vm1184_vm2, %v1013_v32, 0 }
 0x3c4   : > { %2286 = vmatmul.mubr.msk.bf16.vlgmr.msra.gmra.mxu1 %vm1184_vm2, %v834_v30 }
 0x3c5   : > { %2296 = vmatpush3.bf16.xpose.msra.mxu1 %v1281_v33  ;;  %2297 = vmatprep.mubr.msk.bf16.mxu1 %vm2898_vm1, %v2897_v8 }
 0x3c6   : > { %2292 = vmatmul.mubr.msk.bf16.vlgmr.msra.gmra.mxu0 %vm1184_vm2, %v837_v34  ;;  %2307 = vmatprep.subr.bf16.mxu1 %v2897_v8 }
 0x3c7   : > { %2302 = vmatpush3.bf16.xpose.msra.mxu0 %v1327_v36  ;;  %2303 = vmatprep.mubr.msk.bf16.mxu0 %vm2898_vm1, %v2897_v8 }
 0x3c8   : > { %2313 = vmatprep.subr.bf16.mxu0 %v2897_v8 }
 0x3cc   : > { %2298 = vmatmul.mubr.msk.bf16.vlgmr.msra.gmra.mxu1 %vm1184_vm2, %v840_v40 }
 0x3cd   : > { %2309 = vmatprep.mubr.msk.bf16.mxu1 %vm2898_vm1, %v2897_v8 }
 0x3ce   : > { %2304 = vmatmul.mubr.msk.bf16.vlgmr.msra.gmra.mxu0 %vm1184_vm2, %v843_v42 }
 0x3cf   : > { %2315 = vmatprep.mubr.msk.bf16.mxu0 %vm2898_vm1, %v2897_v8 }
 0x484   : > { %v1225_v43 = vpop.f32.mrf.mxu1 }
 0x485   : > { %v1369_v44 = vsel %vm1184_vm2, %v1225_v43, -inf }
 0x486   : > { %1370 = vmax.xlane.f32.xlu1 %v1369_v44  ;;  %v2287_v45 = vpop.f32.mrf.mxu1  ;;  %v1271_v47 = vpop.f32.mrf.mxu0 }
 0x487   : > { %v1372_v48 = vsel %vm1184_vm2, %v1271_v47, -inf }
 0x488   : > { %v1228_v49 = vpop.f32.mrf.mxu1  ;;  %1373 = vmax.xlane.f32.xlu0 %v1372_v48  ;;  %v2293_v53 = vpop.f32.mrf.mxu0 }
 0x48a   : > { %v2288_v55 = vpop.f32.mrf.mxu1  ;;  %v1274_v56 = vpop.f32.mrf.mxu0 }
 0x48c   : > { %v2294_v58 = vpop.f32.mrf.mxu0  ;;  %v3317_v59 = vpop.f32.mrf.mxu1 }
 0x48d   : > { %v1375_v4 = vsel %vm1184_vm2, %v3317_v59, -inf }
 0x48e   : > { %v2299_v60 = vpop.f32.mrf.mxu1  ;;  %v3319_v61 = vpop.f32.mrf.mxu0 }
 0x48f   : > { %v1378_v5 = vsel %vm1184_vm2, %v3319_v61, -inf }
 0x490   : > { %v1320_v62 = vpop.f32.mrf.mxu1  ;;  %v2305_v63 = vpop.f32.mrf.mxu0 }
 0x492   : > { %v2300_v1 = vpop.f32.mrf.mxu1  ;;  %v1366_v2 = vpop.f32.mrf.mxu0 }
 0x494   : > { %v2306_v3 = vpop.f32.mrf.mxu0 }
 0x497   : > { %1018 = vrot.lane.b32.xlu1 %v3221_v28, %s2903_s29 }
 0x49b   : > { %1020 = vrot.lane.b32.xlu1 %v3224_v29, %s2903_s29  ;;  %v1029_v29 = vrot.slane %v1015_v50, %v3228_v37 }
 0x49e   : > { %1016 = vrot.lane.b32.xlu0 %v3218_v27, %s2903_s29  ;;  %s2033_s29 = sshll.u32 %s574_s23, 4  ;;  %s3430_s29 = int_to_ptr.vmem [resolvable:$true] %s2033_s29 }
 0x49f   : > { %s2799_s6 = scalar_lea.vmem %s3430_s29, 128  ;;  %p2806_p0 = scmp.lt.s32.totalorder %s3430_s29, %s2804_s19 }
 0x4a0   : > { %p2800_p4 = scmp.ne.s32.totalorder %s3430_s29, %s2799_s6  ;;  %p2807_p1 = scmp.lt.s32.totalorder %s2805_s1, %s2799_s6 }
 0x4a2   : > { %p2801_p8 = pnand %p2800_p4, %p3528_p7  ;;  %p2808_p5 = por %p2807_p1, %p2806_p0 }
 0x4a4   : > { %p2802_p6 = pneg %p2801_p8 }
 0x4a6   : > { %p2809_p3 = pnand %p2808_p5, %p2802_p6 }
 0x4bd   : > { %1376 = vmax.xlane.f32.xlu0 %v1375_v4 }
 0x4bf   : > { %1379 = vmax.xlane.f32.xlu1 %v1378_v5 }
 0x50f   : > { %v1371_v51 = vpop.xlane.xlu1 %1370 }
 0x510   : > { %v1381_v52 = vsub.f32 %v1225_v43, %v1371_v51 }
 0x511   : > { %v1374_v54 = vpop.xlane.xlu0 %1373 }
 0x512   : > { %v1385_v6 = vmul.f32 1.442695, %v1381_v52  ;;  %v1382_v28 = vsub.f32 %v1271_v47, %v1374_v54 }
 0x513   : > { %v1019_v7 = vpop.permute.xlu1 %1018 }
 0x514   : > { %2517 = vpow2.f32 %v1385_v6  ;;  %v1387_v9 = vmul.f32 1.442695, %v1382_v28  ;;  %v1037_v27 = vrot.slane %v1019_v7, %v3228_v37 }
 0x515   : > { %v1017_v12 = vpop.permute.xlu0 %1016 }
 0x516   : > { %2519 = vpow2.f32 %v1387_v9  ;;  %v1038_v10 = vcombine.low %v1029_v29, %v1037_v27  ;;  %v1039_v11 = vcombine.high %v1029_v29, %v1037_v27  ;;  %v1063_v17 = vrot.slane %v1017_v12, %v3228_v37 }
 0x517   : > { %v1021_v13 = vpop.permute.xlu1 %1020 }
 0x518   : > { %v1046_v14 = vrot.slane %v1038_v10, %v3237_v46  ;;  %v1053_v15 = vrot.slane %v1039_v11, %v3237_v46  ;;  %v1071_v16 = vrot.slane %v1021_v13, %v3228_v37 }
 0x51a   : > { %v1072_v18 = vcombine.low %v1063_v17, %v1071_v16  ;;  %v1073_v19 = vcombine.high %v1063_v17, %v1071_v16  ;;  %v1054_v20 = vcombine.high %v1046_v14, %v2906_v57  ;;  %v1055_v21 = vcombine.high %v1053_v15, %v2906_v57 }
 0x51b   : > { %v1094_v24 = vshrl.u32 %v1046_v14, 16  ;;  %v1110_v25 = vshrl.u32 %v1053_v15, 16 }
 0x51c   : > { %v1080_v22 = vrot.slane %v1072_v18, %v3237_v46  ;;  %v1087_v23 = vrot.slane %v1073_v19, %v3237_v46  ;;  %v1102_v33 = vshrl.u32 %v1054_v20, 16  ;;  %v1118_v34 = vshrl.u32 %v1055_v21, 16 }
 0x51e   : > { %v1088_v26 = vcombine.high %v1080_v22, %v2906_v57  ;;  %v1089_v30 = vcombine.high %v1087_v23, %v2906_v57  ;;  %v1092_v31 = vpack.i.b16 %v1080_v22, %v1046_v14  ;;  %v1095_v32 = vshrl.u32 %v1080_v22, 16 }
 0x51f   : > { %v1108_v35 = vpack.i.b16 %v1087_v23, %v1053_v15  ;;  %v1111_v36 = vshrl.u32 %v1087_v23, 16 }
 0x520   : > { %v1096_v39 = vpack.i.b16 %v1095_v32, %v1094_v24  ;;  %v1100_v40 = vpack.i.b16 %v1088_v26, %v1054_v20  ;;  %v1103_v41 = vshrl.u32 %v1088_v26, 16  ;;  %v1116_v42 = vpack.i.b16 %v1089_v30, %v1055_v21 }
 0x521   : > { %v2518_v38 = vpop.eup %2517  ;;  %v1112_v43 = vpack.i.b16 %v1111_v36, %v1110_v25  ;;  %v1119_v44 = vshrl.u32 %v1089_v30, 16  ;;  %v1122_v45 = vcombine.low %v1092_v31, %v1108_v35 }
 0x522   : > { %v1393_v47 = vsel %vm1184_vm2, %v2518_v38, 0.0  ;;  %v1104_v49 = vpack.i.b16 %v1103_v41, %v1102_v33  ;;  %v1130_v53 = vcombine.low %v1100_v40, %v1116_v42  ;;  %v1405_v12 = vpack.c.bf16 %v2518_v38, %v2518_v38 }
 0x523   : > { %v2520_v48 = vpop.eup %2519  ;;  %1394 = vadd.xlane.f32.xlu0 %v1393_v47  ;;  %v1120_v55 = vpack.i.b16 %v1119_v44, %v1118_v34  ;;  %v1147_v56 = vcombine.low %v1096_v39, %v1112_v43  ;;  %v1129_v58 = vrot.slane %v1122_v45, %v3228_v37 }
 0x524   : > { %v1137_v60 = vrot.slane %v1130_v53, %v3228_v37  ;;  %v1396_v63 = vsel %vm1184_vm2, %v2520_v48, 0.0  ;;  %v1406_v15 = vpack.c.bf16 %v2520_v48, %v2520_v48 }
 0x525   : > { %v1155_v62 = vcombine.low %v1104_v49, %v1120_v55  ;;  %v1154_v2 = vrot.slane %v1147_v56, %v3228_v37 }
 0x526   : > { %v1138_v1 = vcombine.low %v1129_v58, %v1137_v60 }
 0x527   : > { %1397 = vadd.xlane.f32.xlu0 %v1396_v63  ;;  %v1162_v3 = vrot.slane %v1155_v62, %v3228_v37 }
 0x528   : > { %v1145_v4 = vrot.slane %v1138_v1, %v3237_v46 }
 0x529   : > { %v1163_v5 = vcombine.low %v1154_v2, %v1162_v3 }
 0x52a   : > { %v1146_v50 = vcombine.high %v1145_v4, %v2906_v57  ;;  %v1175_v54 = vshrl.u32 %v1145_v4, 16 }
 0x52b   : > { %v1170_v51 = vrot.slane %v1163_v5, %v3237_v46 }
 0x52c   : > { %v1181_v7 = vshrl.u32 %v1146_v50, 16 }
 0x52d   : > { %v1174_v52 = vpack.i.b16 %v1170_v51, %v1145_v4  ;;  %v1176_v6 = vshrl.u32 %v1170_v51, 16  ;;  %v1171_v28 = vcombine.high %v1170_v51, %v2906_v57 }
 0x52f   : > { %v1414_v29 = vsel %vm1412_vm3, %v1174_v52, 0  ;;  %v1177_v9 = vpack.i.b16 %v1176_v6, %v1175_v54  ;;  %v1180_v27 = vpack.i.b16 %v1171_v28, %v1146_v50  ;;  %v1182_v10 = vshrl.u32 %v1171_v28, 16 }
 0x530   : > { %2308 = vmatpush3.bf16.msra.mxu1 %v1414_v29 }
 0x531   : > { %v1460_v11 = vsel %vm1412_vm3, %v1177_v9, 0  ;;  %2319 = vmatprep.subr.bf16.mxu1 %v2897_v8  ;;  %v1183_v13 = vpack.i.b16 %v1182_v10, %v1181_v7  ;;  %v1506_v14 = vsel %vm1412_vm3, %v1180_v27, 0 }
 0x532   : > { %2314 = vmatpush3.bf16.msra.mxu0 %v1460_v11 }
 0x533   : > { %2310 = vmatmul.mubr.msk.bf16.vlgmr.msra.gmra.mxu1 %vm1184_vm2, %v1405_v12  ;;  %2325 = vmatprep.subr.bf16.mxu0 %v2897_v8  ;;  %v1552_v16 = vsel %vm1412_vm3, %v1183_v13, 0 }
 0x534   : > { %2320 = vmatpush3.bf16.msra.mxu1 %v1506_v14  ;;  %2321 = vmatprep.mubr.msk.bf16.mxu1 %vm2898_vm1, %v2897_v8 }
 0x535   : > { %2316 = vmatmul.mubr.msk.bf16.vlgmr.msra.gmra.mxu0 %vm1184_vm2, %v1406_v15  ;;  %2331 = vmatprep.subr.bf16.mxu1 %v2897_v8 }
 0x536   : > { %2326 = vmatpush3.bf16.msra.mxu0 %v1552_v16  ;;  %2327 = vmatprep.mubr.msk.bf16.mxu0 %vm2898_vm1, %v2897_v8 }
 0x537   : > { %2339 = vmatprep.subr.bf16.mxu0 %v2897_v8 }
 0x546   : > { %v1377_v17 = vpop.xlane.xlu0 %1376 }
 0x547   : > { %v1383_v18 = vsub.f32 %v3317_v59, %v1377_v17  ;;  %v2509_v59 = vld [vmem:[#allocation11 + $0x8] sm:$0xff]  }
 0x548   : > { %v1380_v19 = vpop.xlane.xlu1 %1379 }
 0x549   : > { %v1389_v20 = vmul.f32 1.442695, %v1383_v18  ;;  %v1384_v21 = vsub.f32 %v3319_v61, %v1380_v19 }
 0x54b   : > { %2521 = vpow2.f32 %v1389_v20  ;;  %v1391_v22 = vmul.f32 1.442695, %v1384_v21 }
 0x54d   : > { %2523 = vpow2.f32 %v1391_v22 }
 0x558   : > { %v2522_v23 = vpop.eup %2521 }
 0x559   : > { %v1399_v24 = vsel %vm1184_vm2, %v2522_v23, 0.0  ;;  %v1407_v25 = vpack.c.bf16 %v2522_v23, %v2522_v23 }
 0x55a   : > { %v2524_v26 = vpop.eup %2523  ;;  %1400 = vadd.xlane.f32.xlu1 %v1399_v24 }
 0x55b   : > { %2322 = vmatmul.mubr.msk.bf16.vlgmr.msra.gmra.mxu1 %vm1184_vm2, %v1407_v25  ;;  %v1402_v30 = vsel %vm1184_vm2, %v2524_v26, 0.0  ;;  %v1408_v31 = vpack.c.bf16 %v2524_v26, %v2524_v26 }
 0x55c   : > { %1403 = vadd.xlane.f32.xlu0 %v1402_v30  ;;  %2335 = vmatprep.mubr.msk.bf16.mxu1 %vm2898_vm1, %v2897_v8 }
 0x55d   : > { %2328 = vmatmul.mubr.msk.bf16.vlgmr.msra.gmra.mxu0 %vm1184_vm2, %v1408_v31  ;;  %2332 = vmatpush3.bf16.msra.mxu1 %v2509_v59 }
 0x55e   : > { %2343 = vmatprep.mubr.msk.bf16.mxu0 %vm2898_vm1, %v2897_v8  ;;  %2333 = vmatprep.subr.bf16.mxu1 %v2897_v8 }
 0x5ac   : > { %v1395_v40 = vpop.xlane.xlu0 %1394 }
 0x5ad   : > { %2525 = vrcp.f32 %v1395_v40 }
 0x5b0   : > { %v1398_v41 = vpop.xlane.xlu0 %1397 }
 0x5b1   : > { %2527 = vrcp.f32 %v1398_v41 }
 0x5ba   : > { %v2526_v44 = vpop.eup %2525 }
 0x5be   : > { %v2528_v47 = vpop.eup %2527 }
 0x5e3   : > { %v1401_v42 = vpop.xlane.xlu1 %1400 }
 0x5e4   : > { %2529 = vrcp.f32 %v1401_v42  ;;  %v2510_v42 = vld [vmem:[#allocation11] sm:$0xff]  }
 0x5e5   : > { %v1404_v43 = vpop.xlane.xlu0 %1403  ;;  %2334 = vmatpush3.bf16.msra.mxu1 %v2510_v42 }
 0x5e6   : > { %2531 = vrcp.f32 %v1404_v43  ;;  %2347 = vmatprep.subr.bf16.mxu1 %v2897_v8 }
 0x5f1   : > { %v2530_v49 = vpop.eup %2529 }
 0x5f3   : > { %v1450_v61 = vpop.f32.mrf.mxu1  ;;  %v2532_v58 = vpop.eup %2531 }
 0x5f4   : > { %v1598_v45 = vmul.f32 %v2526_v44, %v1450_v61 }
 0x5f5   : > { %v2311_v32 = vpop.f32.mrf.mxu1  ;;  %v1496_v33 = vpop.f32.mrf.mxu0 }
 0x5f6   : > { %v1599_v48 = vmul.f32 %v2528_v47, %v1496_v33  ;;  %v1602_v55 = vpack.c.bf16 %v1598_v45, %v1598_v45 }
 0x5f7   : > { %v1453_v34 = vpop.f32.mrf.mxu1  ;;  %v2317_v35 = vpop.f32.mrf.mxu0 }
 0x5f8   : > { %v1636_v63 = vpack.c.bf16 %v1599_v48, %v1599_v48  ;;  %v1609_v5 = vrot.slane %v1602_v55, %v3228_v37 }
 0x5f9   : > { %v2312_v36 = vpop.f32.mrf.mxu1  ;;  %v1499_v38 = vpop.f32.mrf.mxu0 }
 0x5fa   : > { %v1643_v6 = vrot.slane %v1636_v63, %v3228_v37 }
 0x5fb   : > { %v2318_v39 = vpop.f32.mrf.mxu0 }
 0x61b   : > { %v1542_v53 = vpop.f32.mrf.mxu1 }
 0x61c   : > { %v1600_v56 = vmul.f32 %v2530_v49, %v1542_v53 }
 0x61d   : > { %v2323_v60 = vpop.f32.mrf.mxu1  ;;  %v1588_v62 = vpop.f32.mrf.mxu0 }
 0x61e   : > { %v1610_v1 = vpack.c.bf16 %v1600_v56, %v1600_v56  ;;  %v1601_v2 = vmul.f32 %v2532_v58, %v1588_v62 }
 0x61f   : > { %v1545_v3 = vpop.f32.mrf.mxu1  ;;  %v2329_v4 = vpop.f32.mrf.mxu0 }
 0x620   : > { %v1617_v50 = vrot.slane %v1610_v1, %v3228_v37  ;;  %v1644_v51 = vpack.c.bf16 %v1601_v2, %v1601_v2 }
 0x621   : > { %v2324_v52 = vpop.f32.mrf.mxu1  ;;  %v1591_v54 = vpop.f32.mrf.mxu0 }
 0x622   : > { %v1618_v28 = vcombine.low %v1609_v5, %v1617_v50  ;;  %v1619_v7 = vcombine.high %v1609_v5, %v1617_v50  ;;  %v1651_v29 = vrot.slane %v1644_v51, %v3228_v37  ;;  %v2229_v52 = vld [vmem:[#allocation13] ss:$0 sm:$0xff] }
 0x623   : > { %v2330_v9 = vpop.f32.mrf.mxu0 }
 0x624   : > { %v1626_v27 = vrot.slane %v1618_v28, %v3237_v46  ;;  %v1633_v10 = vrot.slane %v1619_v7, %v3237_v46  ;;  %v1652_v11 = vcombine.low %v1643_v6, %v1651_v29  ;;  %v1653_v12 = vcombine.high %v1643_v6, %v1651_v29 }
 0x626   : > { %v1634_v13 = vcombine.high %v1626_v27, %v2906_v57  ;;  %v1660_v14 = vrot.slane %v1652_v11, %v3237_v46  ;;  %v1667_v15 = vrot.slane %v1653_v12, %v3237_v46  ;;  %v1635_v16 = vcombine.high %v1633_v10, %v2906_v57 }
 0x627   : > { %v1674_v17 = vshrl.u32 %v1626_v27, 16  ;;  %v1690_v23 = vshrl.u32 %v1633_v10, 16 }
 0x628   : > { %v1668_v18 = vcombine.high %v1660_v14, %v2906_v57  ;;  %v1669_v19 = vcombine.high %v1667_v15, %v2906_v57  ;;  %v1672_v20 = vpack.i.b16 %v1660_v14, %v1626_v27  ;;  %v1675_v21 = vshrl.u32 %v1660_v14, 16 }
 0x629   : > { %v1682_v22 = vshrl.u32 %v1634_v13, 16  ;;  %v1688_v24 = vpack.i.b16 %v1667_v15, %v1633_v10  ;;  %v1691_v25 = vshrl.u32 %v1667_v15, 16  ;;  %v1698_v61 = vshrl.u32 %v1635_v16, 16  ;;  %v2511_v15 = vld [vmem:[%s3481_s9 + $0x8] sm:$0xff]  }
 0x62a   : > { %v1676_v26 = vpack.i.b16 %v1675_v21, %v1674_v17  ;;  %v1680_v30 = vpack.i.b16 %v1668_v18, %v1634_v13  ;;  %v1683_v31 = vshrl.u32 %v1668_v18, 16  ;;  %v1696_v59 = vpack.i.b16 %v1669_v19, %v1635_v16  ;;  %2340 = vmatpush3.bf16.msra.mxu0 %v2511_v15 }
 0x62b   : > { %v1692_v32 = vpack.i.b16 %v1691_v25, %v1690_v23  ;;  %v1699_v33 = vshrl.u32 %v1669_v19, 16  ;;  %v1702_v34 = vcombine.low %v1672_v20, %v1688_v24  ;;  %2341 = vmatprep.subr.bf16.mxu0 %v2897_v8  ;;  %v2233_v20 = vld [vmem:[#allocation14] ss:$0 sm:$0xff] }
 0x62c   : > { %v1684_v35 = vpack.i.b16 %v1683_v31, %v1682_v22  ;;  %v1710_v36 = vcombine.low %v1680_v30, %v1696_v59  ;;  %v2234_v22 = vld [vmem:[#allocation16] ss:$0 sm:$0xff]  ;;  %v2514_v30 = vld [vmem:[#allocation17] sm:$0xff]  }
 0x62d   : > { %v1700_v38 = vpack.i.b16 %v1699_v33, %v1698_v61  ;;  %v1727_v39 = vcombine.low %v1676_v26, %v1692_v32  ;;  %v1709_v40 = vrot.slane %v1702_v34, %v3228_v37  ;;  %v2513_v26 = vld [vmem:[#allocation17 + $0x8] sm:$0xff]   ;;  %v2235_v31 = vld [vmem:[%s3482_s10] ss:$0 sm:$0xff] }
 0x62e   : > { %v1717_v41 = vrot.slane %v1710_v36, %v3228_v37 }
 0x62f   : > { %v1735_v43 = vcombine.low %v1684_v35, %v1700_v38  ;;  %v1734_v45 = vrot.slane %v1727_v39, %v3228_v37 }
 0x630   : > { %v1718_v44 = vcombine.low %v1709_v40, %v1717_v41 }
 0x631   : > { %v1742_v47 = vrot.slane %v1735_v43, %v3228_v37 }
 0x632   : > { %v1725_v48 = vrot.slane %v1718_v44, %v3237_v46 }
 0x633   : > { %v1743_v49 = vcombine.low %v1734_v45, %v1742_v47  ;;  %v2239_v45 = vld [vmem:[%s3484_s12] ss:$0 sm:$0xff] }
 0x634   : > { %v1755_v55 = vshrl.u32 %v1725_v48, 16  ;;  %v1726_v58 = vcombine.high %v1725_v48, %v2906_v57 }
 0x635   : > { %v1750_v53 = vrot.slane %v1743_v49, %v3237_v46 }
 0x636   : > { %v1761_v37 = vshrl.u32 %v1726_v58, 16 }
 0x637   : > { %v1756_v56 = vshrl.u32 %v1750_v53, 16  ;;  %v1751_v60 = vcombine.high %v1750_v53, %v2906_v57  ;;  %v1754_v62 = vpack.i.b16 %v1750_v53, %v1725_v48 }
 0x639   : > { %v1757_v63 = vpack.i.b16 %v1756_v56, %v1755_v55  ;;  %v1760_v1 = vpack.i.b16 %v1751_v60, %v1726_v58  ;;  %v1762_v2 = vshrl.u32 %v1751_v60, 16 }
 0x63b   : > { %1764 = vrot.lane.b32.xlu1 %v1757_v63, %s2907_s18  ;;  %1766 = vrot.lane.b32.xlu0 %v1760_v1, %s2908_s30  ;;  %v1763_v3 = vpack.i.b16 %v1762_v2, %v1761_v37 }
 0x63f   : > { %1768 = vrot.lane.b32.xlu1 %v1763_v3, %s2909_s24  ;;  %s3428_s24 = scalar_lea.hbm %s3485_s13, %s2244_s15 }
 0x6ad   : > { %v1765_v4 = vpop.permute.xlu1 %1764  ;;  %v1767_v5 = vpop.permute.xlu0 %1766 }
 0x6ae   : > { %v1772_v46 = vsel %vm1184_vm2, %v1754_v62, %v1765_v4 }
 0x6af   : > { %v1775_v50 = vsel %vm1773_vm4, %v1772_v46, %v1767_v5 }
 0x6b1   : > { %v1769_v57 = vpop.permute.xlu1 %1768 }
 0x6b2   : > { %v1778_v51 = vsel %vm1776_vm5, %v1775_v50, %v1769_v57 }
 0x6b3   : > { %2336 = vmatmul.mubr.msk.bf16.vlgmr.msra.gmra.mxu1 %vm579_vm0, %v1778_v51 }
 0x6b4   : > { %2351 = vmatprep.mubr.msk.bf16.mxu1 %vm2898_vm1, %v2897_v8  ;;  %2348 = vmatpush3.bf16.msra.mxu1 %v2513_v26 }
 0x6b5   : > { %2349 = vmatprep.subr.bf16.mxu1 %v2897_v8 }
 0x6b8   : > { %2350 = vmatpush3.bf16.msra.mxu1 %v2514_v30 }
 0x773   : > { %v1838_v54 = vpop.f32.mrf.mxu1 }
 0x774   : > { %v1839_v6 = vadd.f32 %v2229_v52, %v1838_v54 }
 0x775   : > { %v2337_v28 = vpop.f32.mrf.mxu1 }
 0x776   : > { %v1844_v7 = vadd.f32 %v1839_v6, %v3201_v0  ;;  %v2512_v0 = vld [vmem:[%s3481_s9] sm:$0xff]  }
 0x777   : > { %v1841_v29 = vpop.f32.mrf.mxu1  ;;  %2342 = vmatpush3.bf16.msra.mxu0 %v2512_v0 }
 0x778   : > { %v1847_v9 = vsel %vm579_vm0, %v1844_v7, 0.0 }
 0x779   : > { %1848 = vadd.xlane.f32.xlu1 %v1847_v9  ;;  %v2338_v27 = vpop.f32.mrf.mxu1 }
 0x802   : > { %v1849_v10 = vpop.xlane.xlu1 %1848 }
 0x803   : > { %v1850_v11 = vmul.f32 0.03125, %v1849_v10 }
 0x805   : > { %v1851_v12 = vsub.f32 %v1844_v7, %v1850_v11 }
 0x807   : > { %v1852_v13 = vmul.f32 %v1851_v12, %v1851_v12 }
 0x809   : > { %v1853_v14 = vsel %vm579_vm0, %v1852_v13, 0.0 }
 0x80a   : > { %1854 = vadd.xlane.f32.xlu0 %v1853_v14 }
 0x893   : > { %v1855_v16 = vpop.xlane.xlu0 %1854 }
 0x894   : > { %v1856_v17 = vmul.f32 0.03125, %v1855_v16 }
 0x896   : > { %v1857_v18 = vadd.f32 1e-05, %v1856_v17 }
 0x898   : > { %2533 = vrsqrt.f32 %v1857_v18 }
 0x8a5   : > { %v2534_v19 = vpop.eup %2533 }
 0x8a6   : > { %v1859_v21 = vmul.f32 %v2534_v19, %v1851_v12 }
 0x8a8   : > { %v1866_v23 = vmul.f32 %v2233_v20, %v1859_v21 }
 0x8aa   : > { %v1873_v24 = vadd.f32 %v2234_v22, %v1866_v23 }
 0x8ac   : > { %v1874_v25 = vpack.c.bf16 %v1873_v24, %v1873_v24 }
 0x8ae   : > { %2344 = vmatmul.mubr.msk.bf16.vlgmr.msra.gmra.mxu0 %vm579_vm0, %v1874_v25 }
 0x96e   : > { %v1935_v59 = vpop.f32.mrf.mxu0 }
 0x96f   : > { %v1936_v61 = vadd.f32 %v2235_v31, %v1935_v59 }
 0x970   : > { %v2345_v32 = vpop.f32.mrf.mxu0 }
 0x971   : > { %v1942_v33 = vmul.f32 0.044715, %v1936_v61  ;;  %v1941_v8 = vmul.f32 0.5, %v1936_v61 }
 0x972   : > { %v1938_v34 = vpop.f32.mrf.mxu0 }
 0x973   : > { %v1943_v35 = vmul.f32 %v1942_v33, %v1936_v61 }
 0x974   : > { %v2346_v36 = vpop.f32.mrf.mxu0 }
 0x975   : > { %v1944_v38 = vmul.f32 %v1943_v35, %v1936_v61 }
 0x977   : > { %v1945_v39 = vadd.f32 %v1944_v38, %v1936_v61 }
 0x979   : > { %v1946_v40 = vmul.f32 0.7978846, %v1945_v39 }
 0x97b   : > { %2535 = vtanh.f32 %v1946_v40 }
 0x988   : > { %v2536_v41 = vpop.eup %2535 }
 0x989   : > { %v1948_v42 = vadd.f32 1.0, %v2536_v41 }
 0x98b   : > { %v1949_v43 = vmul.f32 %v1948_v42, %v1941_v8 }
 0x98d   : > { %v1950_v44 = vpack.c.bf16 %v1949_v43, %v1949_v43 }
 0x98f   : > { %2352 = vmatmul.mubr.msk.bf16.vlgmr.msra.gmra.mxu1 %vm579_vm0, %v1950_v44 }
 0xa4f   : > { %v2011_v47 = vpop.f32.mrf.mxu1 }
 0xa50   : > { %v2012_v48 = vadd.f32 %v2239_v45, %v2011_v47 }
 0xa51   : > { %v2353_v49 = vpop.f32.mrf.mxu1 }
 0xa52   : > { %v2017_v53 = vadd.f32 %v2012_v48, %v1844_v7 }
 0xa53   : > { %v2014_v55 = vpop.f32.mrf.mxu1 }
 0xa54   : > { %2018 = vst.msk [vmem:[%s574_s23] sm:$0xff] %vm579_vm0, %v2017_v53 }
 0xa55   : > { %v2354_v56 = vpop.f32.mrf.mxu1 }
 0xa56   : > { %2812 = shalt.err (!%p2809_p3)
}
 0xa57   : > { %s2813_s17 = scalar_lea.hbm %s3428_s24, 128  ;;  %s2817_s8 = scalar_lea.hbm %s3485_s13, 256 }
 0xa58   : > { %p2814_p9 = scmp.ne.s32.totalorder %s3428_s24, %s2813_s17  ;;  %p2818_p12 = scmp.lt.s32.totalorder %s3428_s24, %s3485_s13 }
 0xa59   : > { %p2819_p13 = scmp.lt.s32.totalorder %s2817_s8, %s2813_s17 }
 0xa5a   : > { %p2815_p11 = pnand %p2814_p9, %p3528_p7 }
 0xa5b   : > { %p2820_p2 = por %p2819_p13, %p2818_p12 }
 0xa5c   : > { %p2816_p10 = pneg %p2815_p11 }
 0xa5e   : > { %p2821_p4 = pnand %p2820_p2, %p2816_p10 }
 0xa60   : > { %2824 = shalt.err (!%p2821_p4)
}
 0xa61   : > { %2393 = dma.vmem_to_hbm [thread:$0]  (%p3528_p7), %s3430_s29, 128, %s3428_s24, %s2020_s14  }
 0xa62 PF: > { %s2045_s15 = sand.u32 1, %s2871_s25   ;;  %p3529_p8 = scmp.ne.s32.totalorder %s3514_s20, 0 }
 0xa63   : > { %p3530_p6 = scmp.ge.s32.totalorder %s2883_s28, 2  ;;  %s2046_s23 = scalar_lea.sflag [#allocation4], %s2045_s15 }
 0xa65   : > { %p2428_p0 = pnand %p3530_p6, %p3529_p8 }
 0xa67   : > { %p2429_p1 = pneg %p2428_p0 }
 0xa69   : > { %2866 = dma.done.wait (%p2429_p1), %s2046_s23, 128  }
 0xa6a   : > { %2868 = vsyncadd (%p2429_p1), %s2046_s23, 4294967168  ;;  %p31_p5 = scmp.ge.s32.totalorder %s3114_s21, 4   ;;  %s3531_s25 = smov %s2875_s26 }
 0xa6b   : > { %s3532_s26 = smov %s2879_s27  ;;  %s3533_s27 = smov %s3126_s3 }
 0xa6c   : > { %s3534_s28 = smov %s3114_s21  ;;  %33 = sbr.rel (!%p31_p5) target bundleno = 19 (0x13), region = 153 }
 0xa71   :  { %2051 = vsyncpa [#allocation3], 1 }
 0xa72   :  { %2053 = vsyncpa [#allocation3 + $0x1], 1 }
 0xa73   :  { %2054 = vsyncpa [#allocation6], 1 }
 0xa74   :  { %2055 = vsyncpa [#allocation9], 1 }
 0xa75   :  { %2056 = vsyncpa [#allocation12], 1 }
 0xa76   :  { %2057 = vsyncpa [#allocation15], 1 }
 0xa77   :  { %2058 = vsyncpa [#allocation18], 1 }
 0xa78   :  { %2059 = vsyncpa [#allocation4], 1 }
 0xa79   :  { %2061 = vsyncpa [#allocation4 + $0x1], 1 }

</bundles_post_ra>
